<compile_context>
chip_gen: v7x
topology: tpu7x:2x2x1
jax: 0.10.0
libtpu: 0.0.40
codegen_flags: <defaults>
</compile_context>

<pallas_src>
import functools

import jax
import jax.numpy as jnp
from jax.experimental import pallas as pl
from jax.experimental.pallas import tpu as pltpu


def _gat_spatial_kernel(x_ref, wblk_ref, bblk_ref, eax_ref, eb_ref, seg_ref,
                        segt_ref, eg_ref, mix_ref, o_ref, *, alpha, fast):
    """One grid step: nb batch elements folded onto the lane axis (L = nb*H*W).

    x_ref:    (V*C_in,  L)        input features (lane = n*HW + h*W + w)
    wblk_ref: (V*C_out, V*C_in)   kron(I_V, W^T)            (linear mapping)
    bblk_ref: (V*C_out, 1)        bias tiled over vertices
    eax_ref:  (V*V, V*C_in)       row i*V+j: (W@a1) on vertex-i chans + (W@a2) on vertex-j chans
    eb_ref:   (V*V, 1)            a1.b + a2.b
    seg_ref:  (L, nb*H)           kron(I_{nb*H}, ones(W,1))  thin segment-sum factor
    segt_ref: (nb*H, L)           its transpose (group -> lane broadcast)
    eg_ref:   (V*C_out, V*V)      kron(I_V, ones(C_out, V)): sum over j + channel bcast
    mix_ref:  (V*C_out, V*C_out)  kron(adj_norm^T, I_C)      (vertex mixing)
    o_ref:    (V*C_out, L)        output
    """
    f32 = jnp.float32
    hi = jax.lax.Precision.HIGHEST
    lo = None if fast else hi          # DEFAULT precision on exact 0/1 contractions

    x = x_ref[...]                                         # (V*C_in, L)

    # ---- linear mapping, all vertices at once (data matmul -> HIGHEST) ----
    wh = jnp.dot(wblk_ref[...], x, preferred_element_type=f32, precision=hi)
    wh = wh + bblk_ref[...]                                # (V*C_out, L)

    # ---- all V*V attention-logit rows in one matmul, straight from x ----
    e = jnp.dot(eax_ref[...], x, preferred_element_type=f32, precision=hi)
    e = e + eb_ref[...]                                    # (V*V, L)
    e = jnp.where(e > 0, e, alpha * e)                     # LeakyReLU(alpha)
    e = e - jnp.max(e, axis=-1, keepdims=True)             # exact row bound -> exp args <= 0
    p = jnp.exp(e)                                         # (V*V, L), EUP

    # ---- softmax-over-W denominators via thin 0/1 segment factors ----
    # weights are exact in bf16; only p/p_s suffer bf16 rounding in fast mode.
    p_s = jnp.dot(p, seg_ref[...], preferred_element_type=f32, precision=lo)
    denom = jnp.dot(p_s, segt_ref[...], preferred_element_type=f32, precision=lo)
    # Guard fully-underflowed W groups (exp flush-to-zero far below the row max):
    # returns 0 contribution for those groups instead of 0/0 = NaN.
    denom = jnp.maximum(denom, 1e-30)
    if fast:
        att = p * pl.reciprocal(denom, approx=True)        # EUP slot, ~2.4e-4 rel
    else:
        att = p / denom                                    # exact divide

    # ---- sum over j + broadcast over out-channels, fused into one 0/1 matmul ----
    att_e = jnp.dot(eg_ref[...], att, preferred_element_type=f32, precision=lo)

    # ---- attention-weighted features + vertex mixing, then ELU ----
    pre = jnp.dot(mix_ref[...], wh * att_e, preferred_element_type=f32, precision=hi)
    o_ref[...] = jnp.where(pre > 0, pre, jnp.exp(jnp.minimum(pre, 0.0)) - 1.0)


def _tensorcores_per_chip():
    """1 TensorCore per chip on v5e/v6e, 2 on v7x (best-effort device_kind sniff)."""
    try:
        kind = (jax.devices()[0].device_kind or "").lower()
    except Exception:
        return 1
    return 2 if "v7" in kind else 1


def _pick_batch_block(n, n_cores, max_nb=8):
    """Largest divisor of n (capped at max_nb) that still leaves >= n_cores grid
    steps: single-TC chips (v5e/v6e) get one big step, v7x gets >= 2 steps."""
    want_steps = min(n_cores, n)
    best = 1
    for nb in range(1, min(n, max_nb) + 1):
        if n % nb == 0 and (n // nb) >= want_steps:
            best = nb
    return best


def gat_layer_spatial_forward(h, w_map, b_map, a_vec, b_adj, alpha, *,
                              batch_block=None, fast=True):
    """h: (N, H, W, C_in, V) float32 -> (N, W, H, C_out, V) float32 (PyTorch layout)."""
    f32 = jnp.float32
    N, H, W, C_in, V = h.shape
    C_out = w_map.shape[1]
    HW = H * W

    nb = batch_block if batch_block is not None else _pick_batch_block(N, _tensorcores_per_chip())
    assert N % nb == 0, (N, nb)
    L = nb * HW
    assert L % 128 == 0, "lane block must be a multiple of 128 lanes"

    # ---- layout glue: (N, H, W, C_in, V) -> (V*C_in, N*H*W); lane = n*HW + h*W + w ----
    x = jnp.transpose(h, (4, 3, 0, 1, 2)).reshape(V * C_in, N * HW).astype(f32)

    # ---- parameter-only constant packing (data independent) ----
    w = w_map.astype(f32)
    bb = b_map.astype(f32)
    a = a_vec.astype(f32)
    eye_v = jnp.eye(V, dtype=f32)

    w_blk = jnp.kron(eye_v, w.T)                                      # (V*C_out, V*C_in)
    b_blk = jnp.tile(bb, V)[:, None]                                  # (V*C_out, 1)

    a1, a2 = a[:C_out], a[C_out:]
    u1, u2 = w @ a1, w @ a2                                           # (C_in,) each
    r_i = jnp.repeat(eye_v, V, axis=0)                                # (V*V, V): row i*V+j -> i
    r_j = jnp.tile(eye_v, (V, 1))                                     # (V*V, V): row i*V+j -> j
    eax = jnp.kron(r_i, u1[None, :]) + jnp.kron(r_j, u2[None, :])     # (V*V, V*C_in)
    eb = (jnp.dot(a1, bb) + jnp.dot(a2, bb)) * jnp.ones((V * V, 1), f32)

    seg = jnp.kron(jnp.eye(nb * H, dtype=f32), jnp.ones((W, 1), f32)) # (L, nb*H), thin factor
    seg_t = seg.T                                                     # (nb*H, L)
    eg = jnp.kron(eye_v, jnp.ones((C_out, V), f32))                   # (V*C_out, V*V)

    # adjacency normalization: adj = B + I, min-max normalize, D^-1/2 adj D^-1/2
    adj = b_adj.astype(f32) + eye_v
    rng = jnp.max(adj) - jnp.min(adj)
    adj = (adj - jnp.min(adj)) / jnp.where(rng == 0, 1.0, rng)        # guard degenerate B
    r = 1.0 / jnp.sqrt(jnp.sum(adj, axis=1))
    adj_norm = adj * r[:, None] * r[None, :]
    mix = jnp.kron(adj_norm.T, jnp.eye(C_out, dtype=f32))             # (V*C_out, V*C_out)

    kernel = functools.partial(_gat_spatial_kernel, alpha=float(alpha), fast=bool(fast))

    out = pl.pallas_call(
        kernel,
        out_shape=jax.ShapeDtypeStruct((V * C_out, N * HW), f32),
        grid=(N // nb,),
        in_specs=[
            pl.BlockSpec((V * C_in, L), lambda n: (0, n)),            # x: lane-axis blocks
            pl.BlockSpec((V * C_out, V * C_in), lambda n: (0, 0)),    # w_blk
            pl.BlockSpec((V * C_out, 1), lambda n: (0, 0)),           # b_blk
            pl.BlockSpec((V * V, V * C_in), lambda n: (0, 0)),        # eax
            pl.BlockSpec((V * V, 1), lambda n: (0, 0)),               # eb
            pl.BlockSpec((L, nb * H), lambda n: (0, 0)),              # seg
            pl.BlockSpec((nb * H, L), lambda n: (0, 0)),              # seg_t
            pl.BlockSpec((V * C_out, V * V), lambda n: (0, 0)),       # eg
            pl.BlockSpec((V * C_out, V * C_out), lambda n: (0, 0)),   # mix
        ],
        out_specs=pl.BlockSpec((V * C_out, L), lambda n: (0, n)),
        compiler_params=pltpu.CompilerParams(
            dimension_semantics=("parallel",),        # independent lane-axis blocks (2 TCs on v7x)
            vmem_limit_bytes=32 * 1024 * 1024,        # explicit budget; v7x-safe (64 MiB physical)
        ),
    )(x, w_blk, b_blk, eax, eb, seg, seg_t, eg, mix)

    # kernel (V*C_out, N*H*W)  ->  PyTorch output layout (N, W, H, C_out, V)
    out = out.reshape(V, C_out, N, H, W)
    return jnp.transpose(out, (2, 4, 3, 1, 0))


def reference_forward(h, w_map, b_map, a_vec, b_adj, alpha):
    """Pure-JAX transcription of the PyTorch forward (for verification)."""
    hi = jax.lax.Precision.HIGHEST
    N, H, W, C_in, V = h.shape
    C_out = w_map.shape[1]
    hp = jnp.transpose(h, (0, 4, 1, 2, 3))                       # (N, V, H, W, C_in)
    Wh = jnp.einsum('nvhwc,cd->nvhwd', hp, w_map, precision=hi) + b_map
    a1, a2 = a_vec[:C_out], a_vec[C_out:]
    sA = jnp.einsum('nvhwd,d->nvhw', Wh, a1, precision=hi)
    sB = jnp.einsum('nvhwd,d->nvhw', Wh, a2, precision=hi)
    e = sA[:, :, None, :, :] + sB[:, None, :, :, :]              # (N, V, V, H, W)
    e = jnp.where(e > 0, e, alpha * e)
    attn = jax.nn.softmax(e, axis=-1)
    att_sum = jnp.sum(attn, axis=2)                              # (N, V, H, W)
    adj = b_adj + jnp.eye(V, dtype=jnp.float32)
    adj = (adj - jnp.min(adj)) / (jnp.max(adj) - jnp.min(adj))
    r = 1.0 / jnp.sqrt(jnp.sum(adj, axis=1))
    adj_norm = adj * r[:, None] * r[None, :]
    M = Wh * att_sum[..., None]                                  # (N, V, H, W, C_out)
    out = jnp.einsum('nihwc,iv->nwhcv', M, adj_norm, precision=hi)
    return jax.nn.elu(out)


def _check(out, ref, atol, rtol, name):
    if not bool(jnp.all(jnp.isfinite(out))):
        raise SystemExit(f"{name}: non-finite output")
    err = jnp.abs(out - ref)
    tol = atol + rtol * jnp.abs(ref)
    if not bool(jnp.all(err <= tol)):
        raise SystemExit(f"{name}: max abs err {float(jnp.max(err)):.3e} "
                         f"exceeds atol={atol} rtol={rtol}")


if __name__ == "__main__":
    N, H, W, V = 2, 16, 16, 8          # batch, image_height, image_width, n_vertices
    C_in, C_out = 4, 8                 # in_features, out_features
    alpha = 0.2

    key = jax.random.PRNGKey(0)
    k0, k1, k2, k3, k4 = jax.random.split(key, 5)
    h = jax.random.normal(k0, (N, H, W, C_in, V), dtype=jnp.float32)
    # deterministic synthetic parameters (shapes from the module's __init__)
    w_map = jax.random.normal(k1, (C_in, C_out), dtype=jnp.float32) * (1.414 / jnp.sqrt(C_in))
    b_map = jax.random.normal(k2, (C_out,), dtype=jnp.float32) * 0.1
    a_vec = jax.random.normal(k3, (2 * C_out,), dtype=jnp.float32) * 0.3
    b_adj = 1e-6 + 0.1 * jax.random.uniform(k4, (V, V), dtype=jnp.float32)

    ref = reference_forward(h, w_map, b_map, a_vec, b_adj, alpha)

    # Fast (default) path: DEFAULT MXU precision on the exact-0/1 contractions +
    # approx reciprocal -> tolerance reflects bf16 rounding of p / attention
    # (<~1% rel) plus the ~2.4e-4 reciprocal error.
    out_fast = jax.block_until_ready(
        gat_layer_spatial_forward(h, w_map, b_map, a_vec, b_adj, alpha))
    assert out_fast.shape == (N, W, H, C_out, V), out_fast.shape

    # Exact path: HIGHEST everywhere + exact divide -> tight gate.
    out_exact = jax.block_until_ready(
        gat_layer_spatial_forward(h, w_map, b_map, a_vec, b_adj, alpha, fast=False))

    _check(out_exact, ref, atol=2e-3, rtol=2e-3, name="exact")
    _check(out_fast, ref, atol=2e-2, rtol=2e-2, name="fast")
    print("KERNEL_OK")
</pallas_src>

<mosaic_0001>
module attributes {stable_mosaic.version = 11 : i64} {
  func.func @_gat_spatial_kernel(%arg0: i32, %arg1: memref<32x512xf32, #tpu.memory_space<vmem>>, %arg2: memref<64x32xf32, #tpu.memory_space<vmem>>, %arg3: memref<64x1xf32, #tpu.memory_space<vmem>>, %arg4: memref<64x32xf32, #tpu.memory_space<vmem>>, %arg5: memref<64x1xf32, #tpu.memory_space<vmem>>, %arg6: memref<512x32xf32, #tpu.memory_space<vmem>>, %arg7: memref<32x512xf32, #tpu.memory_space<vmem>>, %arg8: memref<64x64xf32, #tpu.memory_space<vmem>>, %arg9: memref<64x64xf32, #tpu.memory_space<vmem>>, %arg10: memref<64x512xf32, #tpu.memory_space<vmem>>) attributes {dimension_semantics = [#tpu.dimension_semantics<parallel>], iteration_bounds = array<i64: 1>, scalar_prefetch = 0 : i64, scratch_operands = 0 : i64, tpu.core_type = #tpu.core_type<tc>, window_params = [{transform_indices = @transform_0, window_bounds = array<i64: 32, 512>}, {pipeline_mode = #tpu.pipeline_mode<synchronous>, transform_indices = @transform_1, window_bounds = array<i64: 64, 32>}, {pipeline_mode = #tpu.pipeline_mode<synchronous>, transform_indices = @transform_2, window_bounds = array<i64: 64, 1>}, {pipeline_mode = #tpu.pipeline_mode<synchronous>, transform_indices = @transform_3, window_bounds = array<i64: 64, 32>}, {pipeline_mode = #tpu.pipeline_mode<synchronous>, transform_indices = @transform_4, window_bounds = array<i64: 64, 1>}, {pipeline_mode = #tpu.pipeline_mode<synchronous>, transform_indices = @transform_5, window_bounds = array<i64: 512, 32>}, {pipeline_mode = #tpu.pipeline_mode<synchronous>, transform_indices = @transform_6, window_bounds = array<i64: 32, 512>}, {pipeline_mode = #tpu.pipeline_mode<synchronous>, transform_indices = @transform_7, window_bounds = array<i64: 64, 64>}, {pipeline_mode = #tpu.pipeline_mode<synchronous>, transform_indices = @transform_8, window_bounds = array<i64: 64, 64>}, {transform_indices = @transform_9, window_bounds = array<i64: 64, 512>}]} {
    %c0 = arith.constant 0 : index
    %c0_0 = arith.constant 0 : index
    %0 = vector.load %arg1[%c0, %c0_0] : memref<32x512xf32, #tpu.memory_space<vmem>>, vector<32x512xf32>
    %c0_1 = arith.constant 0 : index
    %c0_2 = arith.constant 0 : index
    %1 = vector.load %arg2[%c0_1, %c0_2] : memref<64x32xf32, #tpu.memory_space<vmem>>, vector<64x32xf32>
    %cst = arith.constant dense<0.000000e+00> : vector<64x512xf32>
    %2 = tpu.matmul %1, %0, %cst {dimension_numbers = #tpu.dot_dimension_numbers<[1], [0], [0], [1], [0, 0, 1, 1], [], []>, precision = #tpu.contract_precision<fp32>} : vector<64x32xf32>, vector<32x512xf32>, vector<64x512xf32> -> vector<64x512xf32>
    %c0_3 = arith.constant 0 : index
    %c0_4 = arith.constant 0 : index
    %3 = vector.load %arg3[%c0_3, %c0_4] : memref<64x1xf32, #tpu.memory_space<vmem>>, vector<64x1xf32>
    %4 = vector.broadcast %3 : vector<64x1xf32> to vector<64x512xf32>
    %5 = arith.addf %2, %4 : vector<64x512xf32>
    %c0_5 = arith.constant 0 : index
    %c0_6 = arith.constant 0 : index
    %6 = vector.load %arg4[%c0_5, %c0_6] : memref<64x32xf32, #tpu.memory_space<vmem>>, vector<64x32xf32>
    %cst_7 = arith.constant dense<0.000000e+00> : vector<64x512xf32>
    %7 = tpu.matmul %6, %0, %cst_7 {dimension_numbers = #tpu.dot_dimension_numbers<[1], [0], [0], [1], [0, 0, 1, 1], [], []>, precision = #tpu.contract_precision<fp32>} : vector<64x32xf32>, vector<32x512xf32>, vector<64x512xf32> -> vector<64x512xf32>
    %c0_8 = arith.constant 0 : index
    %c0_9 = arith.constant 0 : index
    %8 = vector.load %arg5[%c0_8, %c0_9] : memref<64x1xf32, #tpu.memory_space<vmem>>, vector<64x1xf32>
    %9 = vector.broadcast %8 : vector<64x1xf32> to vector<64x512xf32>
    %10 = arith.addf %7, %9 : vector<64x512xf32>
    %cst_10 = arith.constant 0.000000e+00 : f32
    %11 = vector.broadcast %cst_10 : f32 to vector<64x512xf32>
    %12 = arith.cmpf ogt, %10, %11 : vector<64x512xf32>
    %cst_11 = arith.constant 2.000000e-01 : f32
    %13 = vector.broadcast %cst_11 : f32 to vector<64x512xf32>
    %14 = arith.mulf %13, %10 : vector<64x512xf32>
    %15 = arith.select %12, %10, %14 : vector<64x512xi1>, vector<64x512xf32>
    %cst_12 = arith.constant dense<0xFF800000> : vector<64xf32>
    %16 = vector.multi_reduction <maximumf>, %15, %cst_12 [1] : vector<64x512xf32> to vector<64xf32>
    %17 = vector.shape_cast %16 : vector<64xf32> to vector<64x1xf32>
    %18 = vector.broadcast %17 : vector<64x1xf32> to vector<64x512xf32>
    %19 = arith.subf %15, %18 : vector<64x512xf32>
    %20 = math.exp %19 : vector<64x512xf32>
    %c0_13 = arith.constant 0 : index
    %c0_14 = arith.constant 0 : index
    %21 = vector.load %arg6[%c0_13, %c0_14] : memref<512x32xf32, #tpu.memory_space<vmem>>, vector<512x32xf32>
    %cst_15 = arith.constant dense<0.000000e+00> : vector<64x32xf32>
    %22 = tpu.matmul %20, %21, %cst_15 {dimension_numbers = #tpu.dot_dimension_numbers<[1], [0], [0], [1], [0, 0, 1, 1], [], []>} : vector<64x512xf32>, vector<512x32xf32>, vector<64x32xf32> -> vector<64x32xf32>
    %c0_16 = arith.constant 0 : index
    %c0_17 = arith.constant 0 : index
    %23 = vector.load %arg7[%c0_16, %c0_17] : memref<32x512xf32, #tpu.memory_space<vmem>>, vector<32x512xf32>
    %cst_18 = arith.constant dense<0.000000e+00> : vector<64x512xf32>
    %24 = tpu.matmul %22, %23, %cst_18 {dimension_numbers = #tpu.dot_dimension_numbers<[1], [0], [0], [1], [0, 0, 1, 1], [], []>} : vector<64x32xf32>, vector<32x512xf32>, vector<64x512xf32> -> vector<64x512xf32>
    %cst_19 = arith.constant 1.000000e-30 : f32
    %25 = vector.broadcast %cst_19 : f32 to vector<64x512xf32>
    %26 = arith.maximumf %24, %25 : vector<64x512xf32>
    %27 = tpu.reciprocal %26 {approx = true} : vector<64x512xf32> -> vector<64x512xf32>
    %28 = arith.mulf %20, %27 : vector<64x512xf32>
    %c0_20 = arith.constant 0 : index
    %c0_21 = arith.constant 0 : index
    %29 = vector.load %arg8[%c0_20, %c0_21] : memref<64x64xf32, #tpu.memory_space<vmem>>, vector<64x64xf32>
    %cst_22 = arith.constant dense<0.000000e+00> : vector<64x512xf32>
    %30 = tpu.matmul %29, %28, %cst_22 {dimension_numbers = #tpu.dot_dimension_numbers<[1], [0], [0], [1], [0, 0, 1, 1], [], []>} : vector<64x64xf32>, vector<64x512xf32>, vector<64x512xf32> -> vector<64x512xf32>
    %c0_23 = arith.constant 0 : index
    %c0_24 = arith.constant 0 : index
    %31 = vector.load %arg9[%c0_23, %c0_24] : memref<64x64xf32, #tpu.memory_space<vmem>>, vector<64x64xf32>
    %32 = arith.mulf %5, %30 : vector<64x512xf32>
    %cst_25 = arith.constant dense<0.000000e+00> : vector<64x512xf32>
    %33 = tpu.matmul %31, %32, %cst_25 {dimension_numbers = #tpu.dot_dimension_numbers<[1], [0], [0], [1], [0, 0, 1, 1], [], []>, precision = #tpu.contract_precision<fp32>} : vector<64x64xf32>, vector<64x512xf32>, vector<64x512xf32> -> vector<64x512xf32>
    %cst_26 = arith.constant 0.000000e+00 : f32
    %34 = vector.broadcast %cst_26 : f32 to vector<64x512xf32>
    %35 = arith.cmpf ogt, %33, %34 : vector<64x512xf32>
    %cst_27 = arith.constant 0.000000e+00 : f32
    %36 = vector.broadcast %cst_27 : f32 to vector<64x512xf32>
    %37 = arith.minimumf %33, %36 : vector<64x512xf32>
    %38 = math.exp %37 : vector<64x512xf32>
    %cst_28 = arith.constant 1.000000e+00 : f32
    %39 = vector.broadcast %cst_28 : f32 to vector<64x512xf32>
    %40 = arith.subf %38, %39 : vector<64x512xf32>
    %41 = arith.select %35, %33, %40 : vector<64x512xi1>, vector<64x512xf32>
    %c0_29 = arith.constant 0 : index
    %c0_30 = arith.constant 0 : index
    %42 = vector.load %arg10[%c0_29, %c0_30] : memref<64x512xf32, #tpu.memory_space<vmem>>, vector<64x512xf32>
    tpu.vector_store %arg10[%c0_29, %c0_30], %41 {strides = array<i32>} : memref<64x512xf32, #tpu.memory_space<vmem>>, vector<64x512xf32>,
    return
  }
  func.func @transform_0(%arg0: i32) -> (i32, i32) {
    %c0_i32 = arith.constant 0 : i32
    %c0_i32_0 = arith.constant 0 : i32
    return %c0_i32, %arg0 : i32, i32
  }
  func.func @transform_1(%arg0: i32) -> (i32, i32) {
    %c0_i32 = arith.constant 0 : i32
    %c0_i32_0 = arith.constant 0 : i32
    %c0_i32_1 = arith.constant 0 : i32
    return %c0_i32, %c0_i32_0 : i32, i32
  }
  func.func @transform_2(%arg0: i32) -> (i32, i32) {
    %c0_i32 = arith.constant 0 : i32
    %c0_i32_0 = arith.constant 0 : i32
    %c0_i32_1 = arith.constant 0 : i32
    return %c0_i32, %c0_i32_0 : i32, i32
  }
  func.func @transform_3(%arg0: i32) -> (i32, i32) {
    %c0_i32 = arith.constant 0 : i32
    %c0_i32_0 = arith.constant 0 : i32
    %c0_i32_1 = arith.constant 0 : i32
    return %c0_i32, %c0_i32_0 : i32, i32
  }
  func.func @transform_4(%arg0: i32) -> (i32, i32) {
    %c0_i32 = arith.constant 0 : i32
    %c0_i32_0 = arith.constant 0 : i32
    %c0_i32_1 = arith.constant 0 : i32
    return %c0_i32, %c0_i32_0 : i32, i32
  }
  func.func @transform_5(%arg0: i32) -> (i32, i32) {
    %c0_i32 = arith.constant 0 : i32
    %c0_i32_0 = arith.constant 0 : i32
    %c0_i32_1 = arith.constant 0 : i32
    return %c0_i32, %c0_i32_0 : i32, i32
  }
  func.func @transform_6(%arg0: i32) -> (i32, i32) {
    %c0_i32 = arith.constant 0 : i32
    %c0_i32_0 = arith.constant 0 : i32
    %c0_i32_1 = arith.constant 0 : i32
    return %c0_i32, %c0_i32_0 : i32, i32
  }
  func.func @transform_7(%arg0: i32) -> (i32, i32) {
    %c0_i32 = arith.constant 0 : i32
    %c0_i32_0 = arith.constant 0 : i32
    %c0_i32_1 = arith.constant 0 : i32
    return %c0_i32, %c0_i32_0 : i32, i32
  }
  func.func @transform_8(%arg0: i32) -> (i32, i32) {
    %c0_i32 = arith.constant 0 : i32
    %c0_i32_0 = arith.constant 0 : i32
    %c0_i32_1 = arith.constant 0 : i32
    return %c0_i32, %c0_i32_0 : i32, i32
  }
  func.func @transform_9(%arg0: i32) -> (i32, i32) {
    %c0_i32 = arith.constant 0 : i32
    %c0_i32_0 = arith.constant 0 : i32
    return %c0_i32, %arg0 : i32, i32
  }
}

</mosaic_0001>

<bundles_post_ra>
// kernel: tpu_custom_call.1
= control target key start
LH: loop header
LB: loop body
LE: loop exit
PB: predicated region body
PF: predicated region fallthrough
CT: control target
= control target key end

     0   :  { %vm105_vm0 = vcmask 261120   ;;  %v11633_v9 = vmov 0.0   ;;  %s11611_s0 = inlined_call_operand.vmem [shape: f32[32,512], index: 0, kind: input, shape index: {}]   ;;  %s11612_s1 = inlined_call_operand.vmem [shape: f32[64,32], index: 1, kind: input, shape index: {}]   ;;  %s11613_s2 = inlined_call_operand.vmem [shape: f32[64,1], index: 2, kind: input, shape index: {}]   ;;  %s11614_s3 = inlined_call_operand.vmem [shape: f32[64,32], index: 3, kind: input, shape index: {}]   ;;  %s11615_s4 = inlined_call_operand.vmem [shape: f32[64,1], index: 4, kind: input, shape index: {}]   ;;  %s11616_s5 = inlined_call_operand.vmem [shape: f32[512,32], index: 5, kind: input, shape index: {}]   ;;  %s11617_s6 = inlined_call_operand.vmem [shape: f32[32,512], index: 6, kind: input, shape index: {}]   ;;  %s11618_s7 = inlined_call_operand.vmem [shape: f32[64,64], index: 7, kind: input, shape index: {}]   ;;  %s11619_s8 = inlined_call_operand.vmem [shape: f32[64,64], index: 8, kind: input, shape index: {}]   ;;  %s11620_s9 = inlined_call_operand.hbm [shape: f32[64,512], index: 9, kind: output, shape index: {}]  }
   0x1   :  { %v34_v0 = vld [vmem:[%s11611_s0 + $0x8] sm:$0xff]  ;;  %v36_v2 = vld [vmem:[%s11611_s0 + $0x18] sm:$0xff]  ;;  %v33_v7 = vld [vmem:[%s11611_s0] sm:$0xff]  ;;  %202 = vmatprep.mubr.f32.mxu0 %v11633_v9  ;;  %1088 = vmatprep.mubr.f32.mxu1 %v11633_v9 }
   0x2   :  { %v38_v1 = vld [vmem:[%s11611_s0 + $0x28] sm:$0xff]  ;;  %v130_v3 = vand.u32 4294901760, %v34_v0  ;;  %v40_v5 = vld [vmem:[%s11611_s0 + $0x38] sm:$0xff]  ;;  %v1016_v6 = vand.u32 4294901760, %v36_v2  ;;  %v37_v8 = vld [vmem:[%s11611_s0 + $0x20] sm:$0xff]  ;;  %v132_v11 = vand.u32 4294901760, %v33_v7 }
   0x3   :  { %v134_v4 = vand.u32 4294901760, %v38_v1  ;;  %v1020_v10 = vand.u32 4294901760, %v40_v5  ;;  %v136_v12 = vand.u32 4294901760, %v37_v8  ;;  %v8682_v13 = vld [vmem:[%s11611_s0 + $0x10] sm:$0xff]  ;;  %v8692_v15 = vld [vmem:[%s11611_s0 + $0x48] sm:$0xff]  ;;  %v8707_v21 = vld [vmem:[%s11611_s0 + $0x58] sm:$0xff] }
   0x4   :  { %v8687_v14 = vld [vmem:[%s11611_s0 + $0x30] sm:$0xff]  ;;  %v1018_v17 = vand.u32 4294901760, %v8682_v13  ;;  %v8701_v19 = vld [vmem:[%s11611_s0 + $0x68] sm:$0xff]  ;;  %v138_v20 = vand.u32 4294901760, %v8692_v15  ;;  %v8712_v22 = vld [vmem:[%s11611_s0 + $0x78] sm:$0xff]  ;;  %v1024_v26 = vand.u32 4294901760, %v8707_v21  ;;  %v8792_v47 = vsub.f32 %v34_v0, %v130_v3 }
   0x5   :  { %v8694_v16 = vpack.c.bf16 %v134_v4, %v130_v3  ;;  %v1022_v18 = vand.u32 4294901760, %v8687_v14  ;;  %v8714_v23 = vpack.c.bf16 %v1020_v10, %v1016_v6  ;;  %v8716_v24 = vpack.c.bf16 %v136_v12, %v132_v11  ;;  %v8723_v27 = vld [vmem:[%s11611_s0 + $0x40] sm:$0xff]  ;;  %v8733_v29 = vld [vmem:[%s11611_s0 + $0x50] sm:$0xff]  ;;  %v50_v36 = vld [vmem:[%s11612_s1 + $0x8] sm:$0xff] }
   0x6   :  { %v142_v25 = vand.u32 4294901760, %v8701_v19  ;;  %v8728_v28 = vld [vmem:[%s11611_s0 + $0x60] sm:$0xff]  ;;  %v1028_v31 = vand.u32 4294901760, %v8712_v22  ;;  %v140_v32 = vand.u32 4294901760, %v8723_v27  ;;  %v8748_v34 = vld [vmem:[%s11611_s0 + $0x70] sm:$0xff]  ;;  %v1026_v38 = vand.u32 4294901760, %v8733_v29 }
   0x7   :  { %7342 = vmatprep.subr.bf16.mxu0 %v8694_v16  ;;  %v8740_v30 = vpack.c.bf16 %v1022_v18, %v1018_v17  ;;  %v144_v33 = vand.u32 4294901760, %v8728_v28  ;;  %v49_v35 = vld [vmem:[%s11612_s1] sm:$0xff]  ;;  %7390 = vmatprep.subr.bf16.mxu1 %v8714_v23  ;;  %v11629_v39 = vand.u32 4294901760, %v8748_v34  ;;  %v110_v44 = vsel %vm105_vm0, %v50_v36, 0 }
   0x8   :  { %7344 = vmatpush1.bf16.msra.mxu0 %v8716_v24  ;;  %v8762_v37 = vpack.c.bf16 %v142_v25, %v138_v20  ;;  %v107_v40 = vsel %vm105_vm0, %v49_v35, 0  ;;  %v8772_v41 = vpack.c.bf16 %v1028_v31, %v1024_v26  ;;  %v8790_v46 = vand.u32 4294901760, %v110_v44 }
   0x9   :  { %7392 = vmatpush1.bf16.msra.mxu1 %v8740_v30  ;;  %v8778_v42 = vpack.c.bf16 %v144_v33, %v140_v32  ;;  %v8780_v43 = vand.u32 4294901760, %v107_v40  ;;  %v8788_v45 = vpack.c.bf16 %v11629_v39, %v1026_v38  ;;  %v8794_v48 = vsub.f32 %v38_v1, %v134_v4 }
   0xa   :  { %7346 = vmatprep.subr.bf16.mxu0 %v8762_v37 }
   0xb   :  { %14 = vsyncpa [#allocation3], 0  ;;  %7394 = vmatprep.subr.bf16.mxu1 %v8772_v41  ;;  %v8798_v49 = vsub.f32 %v107_v40, %v8780_v43  ;;  %v8800_v50 = vsub.f32 %v33_v7, %v132_v11  ;;  %v8802_v51 = vsub.f32 %v37_v8, %v136_v12  ;;  %v8804_v52 = vsub.f32 %v36_v2, %v1016_v6  ;;  %v52_v11 = vld [vmem:[%s11612_s1 + $0x18] sm:$0xff] }
   0xc   :  { %7348 = vmatpush1.bf16.msra.mxu0 %v8778_v42  ;;  %v8808_v53 = vsub.f32 %v110_v44, %v8790_v46  ;;  %v11628_v54 = vand.u32 4294901760, %v8792_v47  ;;  %v11627_v55 = vand.u32 4294901760, %v8794_v48  ;;  %v8812_v56 = vsub.f32 %v40_v5, %v1020_v10  ;;  %v51_v5 = vld [vmem:[%s11612_s1 + $0x10] sm:$0xff]  ;;  %v53_v44 = vld [vmem:[%s11612_s1 + $0x20] sm:$0xff] }
   0xd   :  { %7396 = vmatpush1.bf16.msra.mxu1 %v8788_v45  ;;  %v8816_v57 = vand.u32 4294901760, %v8798_v49  ;;  %v11626_v58 = vand.u32 4294901760, %v8800_v50  ;;  %v11623_v59 = vand.u32 4294901760, %v8802_v51  ;;  %v11621_v60 = vand.u32 4294901760, %v8804_v52 }
   0xe   :  { %v8822_v61 = vand.u32 4294901760, %v8808_v53  ;;  %v294_v62 = vsub.f32 %v8792_v47, %v11628_v54  ;;  %v306_v63 = vsub.f32 %v8794_v48, %v11627_v55  ;;  %v11622_v0 = vand.u32 4294901760, %v8812_v56 }
   0xf   :  { %v206_v1 = vsub.f32 %v8798_v49, %v8816_v57  ;;  %v300_v2 = vsub.f32 %v8800_v50, %v11626_v58  ;;  %v312_v3 = vsub.f32 %v8802_v51, %v11623_v59  ;;  %v1180_v4 = vsub.f32 %v8804_v52, %v11621_v60 }
  0x10   :  { %11744 = vst [vmem:[#allocation5_spill] sm:$0xff] %v8822_v61  ;;  %v217_v6 = vsub.f32 %v8808_v53, %v8822_v61  ;;  %v295_v7 = vand.u32 4294901760, %v294_v62  ;;  %v307_v8 = vand.u32 4294901760, %v306_v63  ;;  %v1192_v10 = vsub.f32 %v8812_v56, %v11622_v0  ;;  %v54_v62 = vld [vmem:[%s11612_s1 + $0x28] sm:$0xff] }
  0x11   :  { %v207_v12 = vand.u32 4294901760, %v206_v1  ;;  %v301_v35 = vand.u32 4294901760, %v300_v2  ;;  %v313_v36 = vand.u32 4294901760, %v312_v3  ;;  %v1181_v40 = vand.u32 4294901760, %v1180_v4 }
  0x12   :  { %v218_v63 = vand.u32 4294901760, %v217_v6  ;;  %v8859_v60 = vpack.c.bf16 %v307_v8, %v295_v7  ;;  %v1193_v0 = vand.u32 4294901760, %v1192_v10  ;;  %v113_v59 = vsel %vm105_vm0, %v51_v5, 0 }
  0x13   :  { %208 = vmatmul.mubr.f32.vlgmr.msra.gmra.mrb[0].mxu0 %v207_v12  ;;  %1094 = vmatmul.mubr.f32.vlgmr.msra.gmra.mrb[0].mxu1 %v207_v12  ;;  %v8862_v1 = vpack.c.bf16 %v313_v36, %v301_v35  ;;  %v8864_v2 = vand.u32 4294901760, %v113_v59  ;;  %v8869_v3 = vsub.f32 %v8682_v13, %v1018_v17  ;;  %v8874_v4 = vsub.f32 %v8687_v14, %v1022_v18 }
  0x14   :  { %11745 = vst [vmem:[#allocation6_spill] sm:$0xff] %v8859_v60  ;;  %213 = vmatprep.mubr.f32.mxu0 %v11633_v9  ;;  %1099 = vmatprep.mubr.f32.mxu1 %v11633_v9  ;;  %v8878_v5 = vpack.c.bf16 %v1193_v0, %v1181_v40  ;;  %v116_v6 = vsel %vm105_vm0, %v52_v11, 0  ;;  %v119_v7 = vsel %vm105_vm0, %v53_v44, 0  ;;  %v122_v8 = vsel %vm105_vm0, %v54_v62, 0 }
  0x15   :  { %11746 = vst [vmem:[#allocation7_spill] sm:$0xff] %v8862_v1  ;;  %7350 = vmatprep.subr.bf16.mxu0 %v8859_v60  ;;  %v8885_v13 = vsub.f32 %v113_v59, %v8864_v2  ;;  %v11625_v14 = vand.u32 4294901760, %v8869_v3  ;;  %v11624_v17 = vand.u32 4294901760, %v8874_v4  ;;  %v8889_v18 = vand.u32 4294901760, %v116_v6 }
  0x16   :  { %11747 = vst [vmem:[#allocation8_spill] sm:$0xff] %v8878_v5  ;;  %7352 = vmatpush1.bf16.msra.mxu0 %v8862_v1  ;;  %7398 = vmatprep.subr.bf16.mxu1 %v8878_v5  ;;  %v8893_v0 = vand.u32 4294901760, %v119_v7  ;;  %v8895_v10 = vand.u32 4294901760, %v122_v8  ;;  %v8900_v11 = vsub.f32 %v8692_v15, %v138_v20  ;;  %v8905_v59 = vsub.f32 %v8701_v19, %v142_v25 }
  0x17   :  { %219 = vmatmul.mubr.f32.gmra.mrb[2].mxu0 %v218_v63  ;;  %1105 = vmatmul.mubr.f32.gmra.mrb[2].mxu1 %v218_v63  ;;  %v8908_v12 = vand.u32 4294901760, %v8885_v13  ;;  %v1186_v35 = vsub.f32 %v8869_v3, %v11625_v14  ;;  %v1198_v36 = vsub.f32 %v8874_v4, %v11624_v17  ;;  %v8917_v15 = vsub.f32 %v116_v6, %v8889_v18 }
  0x18   :  { %224 = vmatprep.mubr.f32.mxu0 %v11633_v9  ;;  %1110 = vmatprep.mubr.f32.mxu1 %v11633_v9  ;;  %v8922_v19 = vsub.f32 %v119_v7, %v8893_v0  ;;  %v8925_v20 = vsub.f32 %v122_v8, %v8895_v10  ;;  %v11630_v25 = vand.u32 4294901760, %v8900_v11  ;;  %v11631_v40 = vand.u32 4294901760, %v8905_v59 }
  0x19   :  { %11748 = vst [vmem:[#allocation9_spill] sm:$0xff] %v8908_v12  ;;  %v228_v44 = vsub.f32 %v8885_v13, %v8908_v12  ;;  %v1187_v62 = vand.u32 4294901760, %v1186_v35  ;;  %v1199_v63 = vand.u32 4294901760, %v1198_v36  ;;  %v8932_v6 = vand.u32 4294901760, %v8917_v15 }
  0x1a   :  { %v8935_v17 = vand.u32 4294901760, %v8922_v19  ;;  %v8938_v7 = vand.u32 4294901760, %v8925_v20  ;;  %v318_v8 = vsub.f32 %v8900_v11, %v11630_v25  ;;  %v330_v14 = vsub.f32 %v8905_v59, %v11631_v40  ;;  %v55_v40 = vld [vmem:[%s11612_s1 + $0x30] sm:$0xff] }
  0x1b   :  { %11749 = vst [vmem:[#allocation10_spill] sm:$0xff] %v8932_v6  ;;  %v229_v58 = vand.u32 4294901760, %v228_v44  ;;  %v8946_v35 = vpack.c.bf16 %v1199_v63, %v1187_v62  ;;  %v239_v36 = vsub.f32 %v8917_v15, %v8932_v6  ;;  %v8953_v55 = vsub.f32 %v8723_v27, %v140_v32 }
  0x1c   :  { %11750 = vst [vmem:[#allocation11_spill] sm:$0xff] %v8935_v17  ;;  %11751 = vst [vmem:[#allocation12_spill] sm:$0xff] %v8938_v7  ;;  %v250_v54 = vsub.f32 %v8922_v19, %v8935_v17  ;;  %v319_v39 = vand.u32 4294901760, %v318_v8  ;;  %v331_v25 = vand.u32 4294901760, %v330_v14  ;;  %v8964_v63 = vsub.f32 %v8728_v28, %v144_v33 }
  0x1d   :  { %11752 = vst [vmem:[#allocation13_spill] sm:$0xff] %v8946_v35  ;;  %230 = vmatmul.mubr.f32.gmra.mrb[4].mxu0 %v229_v58  ;;  %1116 = vmatmul.mubr.f32.gmra.mrb[4].mxu1 %v229_v58  ;;  %v240_v44 = vand.u32 4294901760, %v239_v36  ;;  %v11632_v62 = vand.u32 4294901760, %v8953_v55  ;;  %v8969_v27 = vsub.f32 %v8707_v21, %v1024_v26  ;;  %v261_v58 = vsub.f32 %v8925_v20, %v8938_v7  ;;  %v56_v21 = vld [vmem:[%s11612_s1 + $0x38] sm:$0xff] }
  0x1e   :  { %7400 = vmatpush1.bf16.msra.mxu1 %v8946_v35  ;;  %235 = vmatprep.mubr.f32.mxu0 %v11633_v9  ;;  %v251_v32 = vand.u32 4294901760, %v250_v54  ;;  %v8975_v14 = vpack.c.bf16 %v331_v25, %v319_v39  ;;  %v8980_v28 = vsub.f32 %v8712_v22, %v1028_v31  ;;  %v335_v33 = vand.u32 4294901760, %v8964_v63 }
  0x1f   :  { %1121 = vmatprep.mubr.f32.mxu1 %v11633_v9  ;;  %v324_v26 = vsub.f32 %v8953_v55, %v11632_v62  ;;  %v1203_v39 = vand.u32 4294901760, %v8969_v27  ;;  %v125_v54 = vsel %vm105_vm0, %v55_v40, 0  ;;  %v8999_v25 = vsub.f32 %v8733_v29, %v1026_v38 }
  0x20   :  { %11753 = vst [vmem:[#allocation14_spill] sm:$0xff] %v8975_v14  ;;  %7354 = vmatprep.subr.bf16.mxu0 %v8975_v14  ;;  %v1215_v22 = vand.u32 4294901760, %v8980_v28  ;;  %v8994_v31 = vand.u32 4294901760, %v125_v54  ;;  %v11754_v8 = vand.u32 4294901760, %v8748_v34  ;;  %v336_v40 = vsub.f32 %v8964_v63, %v335_v33 }
  0x21   :  { %241 = vmatmul.mubr.f32.gmra.mrb[6].mxu0 %v240_v44  ;;  %1127 = vmatmul.mubr.f32.gmra.mrb[6].mxu1 %v240_v44  ;;  %v325_v62 = vand.u32 4294901760, %v324_v26  ;;  %v1204_v9 = vsub.f32 %v8969_v27, %v1203_v39  ;;  %v128_v14 = vsel %vm105_vm0, %v56_v21, 0  ;;  %v11755_v35 = vmov 0.0  }
  0x22   :  { %v9004_v36 = vsub.f32 %v8748_v34, %v11754_v8  ;;  %246 = vmatprep.mubr.f32.mxu0 %v11755_v35  ;;  %1132 = vmatprep.mubr.f32.mxu1 %v11755_v35  ;;  %v1216_v29 = vsub.f32 %v8980_v28, %v1215_v22  ;;  %v9013_v38 = vsub.f32 %v125_v54, %v8994_v31  ;;  %v1209_v34 = vand.u32 4294901760, %v8999_v25 }
  0x23   :  { %v337_v26 = vand.u32 4294901760, %v336_v40  ;;  %v1205_v8 = vand.u32 4294901760, %v1204_v9  ;;  %v9017_v1 = vand.u32 4294901760, %v128_v14  ;;  %v9021_v21 = vpack.c.bf16 %v8794_v48, %v8792_v47 }
  0x24   :  { %v1221_v44 = vand.u32 4294901760, %v9004_v36  ;;  %v1217_v5 = vand.u32 4294901760, %v1216_v29  ;;  %v9024_v60 = vand.u32 4294901760, %v9013_v38  ;;  %v1210_v7 = vsub.f32 %v8999_v25, %v1209_v34 }
  0x25   :  { %11756 = vst [vmem:[#allocation15_spill] sm:$0xff] %v9021_v21  ;;  %252 = vmatmul.mubr.f32.gmra.mrb[8].mxu0 %v251_v32  ;;  %1138 = vmatmul.mubr.f32.gmra.mrb[8].mxu1 %v251_v32  ;;  %v262_v17 = vand.u32 4294901760, %v261_v58  ;;  %v9028_v6 = vpack.c.bf16 %v337_v26, %v325_v62  ;;  %v9031_v9 = vsub.f32 %v128_v14, %v9017_v1  ;;  %v11758_v14 = vand.u32 4294901760, %v8792_v47 }
  0x26   :  { %v1222_v54 = vsub.f32 %v9004_v36, %v1221_v44  ;;  %257 = vmatprep.mubr.f32.mxu0 %v11755_v35  ;;  %1143 = vmatprep.mubr.f32.mxu1 %v11755_v35  ;;  %v9035_v40 = vpack.c.bf16 %v1217_v5, %v1205_v8  ;;  %v272_v29 = vsub.f32 %v9013_v38, %v9024_v60  ;;  %v1211_v12 = vand.u32 4294901760, %v1210_v7 }
  0x27   :  { %11757 = vst [vmem:[#allocation16_spill] sm:$0xff] %v9028_v6  ;;  %7356 = vmatpush1.bf16.msra.mxu0 %v9028_v6  ;;  %v9041_v32 = vand.u32 4294901760, %v9031_v9  ;;  %v9049_v5 = vpack.c.bf16 %v8812_v56, %v8804_v52  ;;  %v11759_v26 = vand.u32 4294901760, %v8794_v48  ;;  %v11764_v47 = vand.u32 4294901760, %v8869_v3 }
  0x28   :  { %v1223_v61 = vand.u32 4294901760, %v1222_v54  ;;  %7402 = vmatprep.subr.bf16.mxu1 %v9035_v40  ;;  %7358 = vmatprep.subr.bf16.mxu0 %v9021_v21  ;;  %v273_v58 = vand.u32 4294901760, %v272_v29  ;;  %v11763_v29 = vand.u32 4294901760, %v8812_v56  ;;  %v11765_v48 = vand.u32 4294901760, %v8874_v4 }
  0x29   :  { %263 = vmatmul.mubr.f32.gmra.mrb[10].mxu0 %v262_v17  ;;  %1149 = vmatmul.mubr.f32.gmra.mrb[10].mxu1 %v262_v17  ;;  %v283_v7 = vsub.f32 %v9031_v9, %v9041_v32  ;;  %v9057_v8 = vpack.c.bf16 %v11759_v26, %v11758_v14  ;;  %v11762_v17 = vand.u32 4294901760, %v8804_v52  ;;  %v11766_v26 = vand.u32 4294901760, %v8900_v11 }
  0x2a   :  { %v9044_v62 = vpack.c.bf16 %v1223_v61, %v1211_v12  ;;  %268 = vmatprep.mubr.f32.mxu0 %v11755_v35  ;;  %1154 = vmatprep.mubr.f32.mxu1 %v11755_v35  ;;  %v11760_v61 = vand.u32 4294901760, %v8800_v50  ;;  %v11761_v12 = vand.u32 4294901760, %v8802_v51  ;;  %v9077_v14 = vpack.c.bf16 %v11765_v48, %v11764_v47 }
  0x2b   :  { %v9071_v21 = vpack.c.bf16 %v11763_v29, %v11762_v17  ;;  %v11767_v6 = vand.u32 4294901760, %v8905_v59  ;;  %v11768_v52 = vand.u32 4294901760, %v8953_v55  ;;  %v9090_v56 = vpack.c.bf16 %v1215_v22, %v1203_v39 }
  0x2c   :  { %v9065_v54 = vpack.c.bf16 %v11761_v12, %v11760_v61  ;;  %7404 = vmatpush1.bf16.msra.mxu1 %v9044_v62  ;;  %v9093_v17 = vpack.c.bf16 %v1221_v44, %v1209_v34  ;;  %v284_v29 = vand.u32 4294901760, %v283_v7  ;;  %v9109_v39 = vpack.c.bf16 %v8905_v59, %v8900_v11  ;;  %v1904_v59 = vld [vmem:[%s11614_s3 + $0x10] sm:$0xff] }
  0x2d   :  { %v9084_v61 = vpack.c.bf16 %v11767_v6, %v11766_v26  ;;  %v9088_v12 = vpack.c.bf16 %v335_v33, %v11768_v52  ;;  %7406 = vmatprep.subr.bf16.mxu1 %v9049_v5  ;;  %274 = vmatmul.mubr.f32.gmra.mrb[12].mxu0 %v273_v58  ;;  %v9101_v6 = vpack.c.bf16 %v8802_v51, %v8800_v50  ;;  %v1908_v26 = vld [vmem:[%s11614_s3 + $0x30] sm:$0xff] }
  0x2e   :  { %1160 = vmatmul.mubr.f32.gmra.mrb[12].mxu1 %v273_v58  ;;  %279 = vmatprep.mubr.f32.mxu0 %v11755_v35  ;;  %v9105_v33 = vpack.c.bf16 %v8874_v4, %v8869_v3  ;;  %v9113_v22 = vpack.c.bf16 %v8980_v28, %v8969_v27  ;;  %v9123_v50 = vpack.c.bf16 %v8964_v63, %v8953_v55  ;;  %v11771_v55 = vld [vmem:[#allocation10_spill] sm:$0xff]  ;;  %v11773_v3 = vld [vmem:[#allocation12_spill] sm:$0xff] }
  0x2f   :  { %1165 = vmatprep.mubr.f32.mxu1 %v11755_v35  ;;  %v9127_v51 = vpack.c.bf16 %v9004_v36, %v8999_v25  ;;  %v11775_v4 = vld [vmem:[#allocation8_spill] sm:$0xff]  ;;  %v1906_v25 = vld [vmem:[%s11614_s3 + $0x20] sm:$0xff] }
  0x30   :  { %v1971_v44 = vsel %vm105_vm0, %v1906_v25, 0 }
  0x31   :  { %285 = vmatmul.mubr.f32.gmra.mrb[14].mxu0 %v284_v29  ;;  %v9377_v47 = vand.u32 4294901760, %v1971_v44 }
  0x32   :  { %1171 = vmatmul.mubr.f32.gmra.mrb[14].mxu1 %v284_v29  ;;  %395 = vmatprep.mubr.f32.mxu0 %v11755_v35 }
  0x33   :  { %1281 = vmatprep.mubr.f32.mxu1 %v11755_v35 }
  0x35   :  { %397 = vmatmul.mubr.f32.vlgmr.msra.gmra.mrb[0].mxu0 %v8780_v43 }
  0x36   :  { %1283 = vmatmul.mubr.f32.vlgmr.msra.gmra.mrb[0].mxu1 %v8780_v43  ;;  %402 = vmatprep.mubr.f32.mxu0 %v11755_v35 }
  0x37   :  { %1288 = vmatprep.mubr.f32.mxu1 %v11755_v35  ;;  %7360 = vmatpush1.bf16.msra.mxu0 %v9101_v6 }
  0x38   :  { %7408 = vmatpush1.bf16.msra.mxu1 %v9105_v33  ;;  %7362 = vmatprep.subr.bf16.mxu0 %v9109_v39 }
  0x39   :  { %7410 = vmatprep.subr.bf16.mxu1 %v9113_v22  ;;  %404 = vmatmul.mubr.f32.gmra.mrb[2].mxu0 %v8790_v46 }
  0x3a   :  { %1290 = vmatmul.mubr.f32.gmra.mrb[2].mxu1 %v8790_v46  ;;  %409 = vmatprep.mubr.f32.mxu0 %v11755_v35 }
  0x3b   :  { %1295 = vmatprep.mubr.f32.mxu1 %v11755_v35  ;;  %7364 = vmatpush1.bf16.msra.mxu0 %v9123_v50 }
  0x3c   :  { %7412 = vmatpush1.bf16.msra.mxu1 %v9127_v51  ;;  %7366 = vmatprep.subr.bf16.mxu0 %v8694_v16 }
  0x3d   :  { %7414 = vmatprep.subr.bf16.mxu1 %v8714_v23  ;;  %411 = vmatmul.mubr.f32.gmra.mrb[4].mxu0 %v8864_v2 }
  0x3e   :  { %1297 = vmatmul.mubr.f32.gmra.mrb[4].mxu1 %v8864_v2  ;;  %416 = vmatprep.mubr.f32.mxu0 %v11755_v35 }
  0x3f   :  { %1302 = vmatprep.mubr.f32.mxu1 %v11755_v35 }
  0x41   :  { %418 = vmatmul.mubr.f32.gmra.mrb[6].mxu0 %v8889_v18 }
  0x42   :  { %1304 = vmatmul.mubr.f32.gmra.mrb[6].mxu1 %v8889_v18  ;;  %423 = vmatprep.mubr.f32.mxu0 %v11755_v35 }
  0x43   :  { %1309 = vmatprep.mubr.f32.mxu1 %v11755_v35 }
  0x45   :  { %425 = vmatmul.mubr.f32.gmra.mrb[8].mxu0 %v8893_v0 }
  0x46   :  { %1311 = vmatmul.mubr.f32.gmra.mrb[8].mxu1 %v8893_v0  ;;  %430 = vmatprep.mubr.f32.mxu0 %v11755_v35 }
  0x47   :  { %1316 = vmatprep.mubr.f32.mxu1 %v11755_v35 }
  0x49   :  { %432 = vmatmul.mubr.f32.gmra.mrb[10].mxu0 %v8895_v10 }
  0x4a   :  { %1318 = vmatmul.mubr.f32.gmra.mrb[10].mxu1 %v8895_v10  ;;  %437 = vmatprep.mubr.f32.mxu0 %v11755_v35 }
  0x4b   :  { %1323 = vmatprep.mubr.f32.mxu1 %v11755_v35 }
  0x4d   :  { %439 = vmatmul.mubr.f32.gmra.mrb[12].mxu0 %v8994_v31 }
  0x4e   :  { %1325 = vmatmul.mubr.f32.gmra.mrb[12].mxu1 %v8994_v31  ;;  %444 = vmatprep.mubr.f32.mxu0 %v11755_v35 }
  0x4f   :  { %1330 = vmatprep.mubr.f32.mxu1 %v11755_v35 }
  0x51   :  { %446 = vmatmul.mubr.f32.gmra.mrb[14].mxu0 %v9017_v1 }
  0x52   :  { %1332 = vmatmul.mubr.f32.gmra.mrb[14].mxu1 %v9017_v1  ;;  %532 = vmatprep.mubr.f32.mxu0 %v11755_v35 }
  0x53   :  { %1418 = vmatprep.mubr.f32.mxu1 %v11755_v35 }
  0x55   :  { %535 = vmatmul.mubr.f32.vlgmr.msra.gmra.mrb[0].mxu0 %v8798_v49 }
  0x56   :  { %1421 = vmatmul.mubr.f32.vlgmr.msra.gmra.mrb[0].mxu1 %v8798_v49  ;;  %540 = vmatprep.mubr.f32.mxu0 %v11755_v35  ;;  %v11769_v49 = vld [vmem:[#allocation5_spill] sm:$0xff] }
  0x57   :  { %1426 = vmatprep.mubr.f32.mxu1 %v11755_v35  ;;  %7368 = vmatpush1.bf16.msra.mxu0 %v8716_v24 }
  0x58   :  { %7416 = vmatpush1.bf16.msra.mxu1 %v8740_v30  ;;  %7370 = vmatprep.subr.bf16.mxu0 %v8762_v37 }
  0x59   :  { %7418 = vmatprep.subr.bf16.mxu1 %v8772_v41  ;;  %543 = vmatmul.mubr.f32.gmra.mrb[2].mxu0 %v8808_v53 }
  0x5a   :  { %1429 = vmatmul.mubr.f32.gmra.mrb[2].mxu1 %v8808_v53  ;;  %548 = vmatprep.mubr.f32.mxu0 %v11755_v35  ;;  %v11770_v53 = vld [vmem:[#allocation9_spill] sm:$0xff] }
  0x5b   :  { %1434 = vmatprep.mubr.f32.mxu1 %v11755_v35  ;;  %7372 = vmatpush1.bf16.msra.mxu0 %v8778_v42 }
  0x5c   :  { %7420 = vmatpush1.bf16.msra.mxu1 %v8788_v45  ;;  %7374 = vmatprep.subr.bf16.mxu0 %v9057_v8 }
  0x5d   :  { %7422 = vmatprep.subr.bf16.mxu1 %v9071_v21  ;;  %551 = vmatmul.mubr.f32.gmra.mrb[4].mxu0 %v8885_v13 }
  0x5e   :  { %1437 = vmatmul.mubr.f32.gmra.mrb[4].mxu1 %v8885_v13  ;;  %556 = vmatprep.mubr.f32.mxu0 %v11755_v35  ;;  %v1903_v13 = vld [vmem:[%s11614_s3 + $0x8] sm:$0xff] }
  0x5f   :  { %1442 = vmatprep.mubr.f32.mxu1 %v11755_v35 }
  0x61   :  { %559 = vmatmul.mubr.f32.gmra.mrb[6].mxu0 %v8917_v15 }
  0x62   :  { %1445 = vmatmul.mubr.f32.gmra.mrb[6].mxu1 %v8917_v15  ;;  %564 = vmatprep.mubr.f32.mxu0 %v11755_v35 }
  0x63   :  { %1450 = vmatprep.mubr.f32.mxu1 %v11755_v35 }
  0x65   :  { %567 = vmatmul.mubr.f32.gmra.mrb[8].mxu0 %v8922_v19 }
  0x66   :  { %1453 = vmatmul.mubr.f32.gmra.mrb[8].mxu1 %v8922_v19  ;;  %572 = vmatprep.mubr.f32.mxu0 %v11755_v35  ;;  %v1965_v19 = vsel %vm105_vm0, %v1904_v59, 0 }
  0x67   :  { %1458 = vmatprep.mubr.f32.mxu1 %v11755_v35  ;;  %v9341_v27 = vand.u32 4294901760, %v1965_v19 }
  0x69   :  { %575 = vmatmul.mubr.f32.gmra.mrb[10].mxu0 %v8925_v20  ;;  %v9359_v34 = vsub.f32 %v1965_v19, %v9341_v27 }
  0x6a   :  { %1461 = vmatmul.mubr.f32.gmra.mrb[10].mxu1 %v8925_v20  ;;  %580 = vmatprep.mubr.f32.mxu0 %v11755_v35  ;;  %v1905_v20 = vld [vmem:[%s11614_s3 + $0x18] sm:$0xff] }
  0x6b   :  { %1466 = vmatprep.mubr.f32.mxu1 %v11755_v35  ;;  %v1968_v28 = vsel %vm105_vm0, %v1905_v20, 0  ;;  %v9375_v7 = vand.u32 4294901760, %v9359_v34  ;;  %v11779_v20 = vld [vmem:[#allocation16_spill] sm:$0xff] }
  0x6c   :  { %v9349_v36 = vand.u32 4294901760, %v1968_v28 }
  0x6d   :  { %583 = vmatmul.mubr.f32.gmra.mrb[12].mxu0 %v9013_v38  ;;  %v2080_v29 = vsub.f32 %v9359_v34, %v9375_v7 }
  0x6e   :  { %1469 = vmatmul.mubr.f32.gmra.mrb[12].mxu1 %v9013_v38  ;;  %588 = vmatprep.mubr.f32.mxu0 %v11755_v35 }
  0x6f   :  { %1474 = vmatprep.mubr.f32.mxu1 %v11755_v35 }
  0x71   :  { %591 = vmatmul.mubr.f32.gmra.mrb[14].mxu0 %v9031_v9 }
  0x72   :  { %1477 = vmatmul.mubr.f32.gmra.mrb[14].mxu1 %v9031_v9  ;;  %669 = vmatprep.mubr.f32.mxu0 %v11755_v35  ;;  %v1907_v9 = vld [vmem:[%s11614_s3 + $0x28] sm:$0xff] }
  0x73   :  { %1555 = vmatprep.mubr.f32.mxu1 %v11755_v35  ;;  %v1974_v48 = vsel %vm105_vm0, %v1907_v9, 0 }
  0x75   :  { %673 = vmatmul.mubr.f32.vlgmr.msra.gmra.mrb[0].mxu0 %v8816_v57 }
  0x76   :  { %1559 = vmatmul.mubr.f32.vlgmr.msra.gmra.mrb[0].mxu1 %v8816_v57  ;;  %678 = vmatprep.mubr.f32.mxu0 %v11755_v35  ;;  %v11772_v57 = vld [vmem:[#allocation11_spill] sm:$0xff] }
  0x77   :  { %1564 = vmatprep.mubr.f32.mxu1 %v11755_v35  ;;  %7376 = vmatpush1.bf16.msra.mxu0 %v9065_v54 }
  0x78   :  { %7424 = vmatpush1.bf16.msra.mxu1 %v9077_v14  ;;  %7378 = vmatprep.subr.bf16.mxu0 %v9084_v61 }
  0x79   :  { %7426 = vmatprep.subr.bf16.mxu1 %v9090_v56  ;;  %682 = vmatmul.mubr.f32.gmra.mrb[2].mxu0 %v11769_v49 }
  0x7a   :  { %1568 = vmatmul.mubr.f32.gmra.mrb[2].mxu1 %v11769_v49  ;;  %687 = vmatprep.mubr.f32.mxu0 %v11755_v35  ;;  %v9391_v49 = vsub.f32 %v1971_v44, %v9377_v47 }
  0x7b   :  { %1573 = vmatprep.mubr.f32.mxu1 %v11755_v35  ;;  %7380 = vmatpush1.bf16.msra.mxu0 %v9088_v12 }
  0x7c   :  { %7428 = vmatpush1.bf16.msra.mxu1 %v9093_v17  ;;  %7382 = vmatprep.subr.bf16.mxu0 %v8694_v16 }
  0x7d   :  { %7430 = vmatprep.subr.bf16.mxu1 %v8714_v23  ;;  %691 = vmatmul.mubr.f32.gmra.mrb[4].mxu0 %v11770_v53 }
  0x7e   :  { %1577 = vmatmul.mubr.f32.gmra.mrb[4].mxu1 %v11770_v53  ;;  %696 = vmatprep.mubr.f32.mxu0 %v11755_v35  ;;  %v9393_v53 = vand.u32 4294901760, %v1974_v48 }
  0x7f   :  { %1582 = vmatprep.mubr.f32.mxu1 %v11755_v35 }
  0x81   :  { %700 = vmatmul.mubr.f32.gmra.mrb[6].mxu0 %v11771_v55 }
  0x82   :  { %1586 = vmatmul.mubr.f32.gmra.mrb[6].mxu1 %v11771_v55  ;;  %705 = vmatprep.mubr.f32.mxu0 %v11755_v35  ;;  %v1977_v55 = vsel %vm105_vm0, %v1908_v26, 0 }
  0x83   :  { %1591 = vmatprep.mubr.f32.mxu1 %v11755_v35  ;;  %v9413_v59 = vand.u32 4294901760, %v1977_v55 }
  0x85   :  { %709 = vmatmul.mubr.f32.gmra.mrb[8].mxu0 %v11772_v57  ;;  %v9428_v44 = vsub.f32 %v1977_v55, %v9413_v59 }
  0x86   :  { %1595 = vmatmul.mubr.f32.gmra.mrb[8].mxu1 %v11772_v57  ;;  %714 = vmatprep.mubr.f32.mxu0 %v11755_v35  ;;  %v11776_v57 = vld [vmem:[#allocation7_spill] sm:$0xff] }
  0x87   :  { %1600 = vmatprep.mubr.f32.mxu1 %v11755_v35 }
  0x89   :  { %718 = vmatmul.mubr.f32.gmra.mrb[10].mxu0 %v11773_v3 }
  0x8a   :  { %1604 = vmatmul.mubr.f32.gmra.mrb[10].mxu1 %v11773_v3  ;;  %723 = vmatprep.mubr.f32.mxu0 %v11755_v35  ;;  %v11777_v3 = vld [vmem:[#allocation13_spill] sm:$0xff] }
  0x8b   :  { %1609 = vmatprep.mubr.f32.mxu1 %v11755_v35 }
  0x8d   :  { %727 = vmatmul.mubr.f32.gmra.mrb[12].mxu0 %v9024_v60 }
  0x8e   :  { %1613 = vmatmul.mubr.f32.gmra.mrb[12].mxu1 %v9024_v60  ;;  %732 = vmatprep.mubr.f32.mxu0 %v11755_v35  ;;  %v11774_v60 = vld [vmem:[#allocation6_spill] sm:$0xff] }
  0x8f   :  { %1618 = vmatprep.mubr.f32.mxu1 %v11755_v35 }
  0x91   :  { %736 = vmatmul.mubr.f32.gmra.mrb[14].mxu0 %v9041_v32 }
  0x92   :  { %1622 = vmatmul.mubr.f32.gmra.mrb[14].mxu1 %v9041_v32  ;;  %830 = vmatprep.mubr.f32.mxu0 %v11755_v35 }
  0x93   :  { %1716 = vmatprep.mubr.f32.mxu1 %v11755_v35 }
  0x95   :  { %832 = vmatmul.mubr.f32.vlgmr.msra.gmra.mrb[0].mxu0 %v8780_v43 }
  0x96   :  { %1718 = vmatmul.mubr.f32.vlgmr.msra.gmra.mrb[0].mxu1 %v8780_v43  ;;  %837 = vmatprep.mubr.f32.mxu0 %v11755_v35 }
  0x97   :  { %1723 = vmatprep.mubr.f32.mxu1 %v11755_v35  ;;  %7384 = vmatpush1.bf16.msra.mxu0 %v8716_v24 }
  0x98   :  { %7432 = vmatpush1.bf16.msra.mxu1 %v8740_v30  ;;  %7386 = vmatprep.subr.bf16.mxu0 %v8762_v37 }
  0x99   :  { %7434 = vmatprep.subr.bf16.mxu1 %v8772_v41  ;;  %839 = vmatmul.mubr.f32.gmra.mrb[2].mxu0 %v8790_v46 }
  0x9a   :  { %1725 = vmatmul.mubr.f32.gmra.mrb[2].mxu1 %v8790_v46  ;;  %844 = vmatprep.mubr.f32.mxu0 %v11755_v35 }
  0x9b   :  { %1730 = vmatprep.mubr.f32.mxu1 %v11755_v35  ;;  %7388 = vmatpush1.bf16.msra.mxu0 %v8778_v42 }
  0x9c   :  { %7436 = vmatpush1.bf16.msra.mxu1 %v8788_v45  ;;  %7438 = vmatprep.subr.bf16.mxu0 %v8694_v16 }
  0x9d   :  { %7486 = vmatprep.subr.bf16.mxu1 %v8714_v23  ;;  %846 = vmatmul.mubr.f32.gmra.mrb[4].mxu0 %v8864_v2 }
  0x9e   :  { %1732 = vmatmul.mubr.f32.gmra.mrb[4].mxu1 %v8864_v2  ;;  %851 = vmatprep.mubr.f32.mxu0 %v11755_v35 }
  0x9f   :  { %1737 = vmatprep.mubr.f32.mxu1 %v11755_v35 }
  0xa1   :  { %853 = vmatmul.mubr.f32.gmra.mrb[6].mxu0 %v8889_v18 }
  0xa2   :  { %1739 = vmatmul.mubr.f32.gmra.mrb[6].mxu1 %v8889_v18  ;;  %858 = vmatprep.mubr.f32.mxu0 %v11755_v35 }
  0xa3   :  { %1744 = vmatprep.mubr.f32.mxu1 %v11755_v35 }
  0xa5   :  { %860 = vmatmul.mubr.f32.gmra.mrb[8].mxu0 %v8893_v0 }
  0xa6   :  { %1746 = vmatmul.mubr.f32.gmra.mrb[8].mxu1 %v8893_v0  ;;  %865 = vmatprep.mubr.f32.mxu0 %v11755_v35 }
  0xa7   :  { %1751 = vmatprep.mubr.f32.mxu1 %v11755_v35 }
  0xa9   :  { %867 = vmatmul.mubr.f32.gmra.mrb[10].mxu0 %v8895_v10 }
  0xaa   :  { %1753 = vmatmul.mubr.f32.gmra.mrb[10].mxu1 %v8895_v10  ;;  %872 = vmatprep.mubr.f32.mxu0 %v11755_v35 }
  0xab   :  { %1758 = vmatprep.mubr.f32.mxu1 %v11755_v35 }
  0xad   :  { %874 = vmatmul.mubr.f32.gmra.mrb[12].mxu0 %v8994_v31 }
  0xae   :  { %1760 = vmatmul.mubr.f32.gmra.mrb[12].mxu1 %v8994_v31  ;;  %879 = vmatprep.mubr.f32.mxu0 %v11755_v35 }
  0xaf   :  { %1765 = vmatprep.mubr.f32.mxu1 %v11755_v35 }
  0xb1   :  { %881 = vmatmul.mubr.f32.gmra.mrb[14].mxu0 %v9017_v1 }
  0xb2   :  { %1767 = vmatmul.mubr.f32.gmra.mrb[14].mxu1 %v9017_v1  ;;  %959 = vmatprep.mubr.f32.mxu0 %v11755_v35 }
  0xb3   :  { %1845 = vmatprep.mubr.f32.mxu1 %v11755_v35 }
  0xb5   :  { %961 = vmatmul.mubr.f32.vlgmr.msra.gmra.mrb[0].mxu0 %v8780_v43 }
  0xb6   :  { %1847 = vmatmul.mubr.f32.vlgmr.msra.gmra.mrb[0].mxu1 %v8780_v43  ;;  %966 = vmatprep.mubr.f32.mxu0 %v11755_v35  ;;  %v1902_v43 = vld [vmem:[%s11614_s3] sm:$0xff] }
  0xb7   :  { %1852 = vmatprep.mubr.f32.mxu1 %v11755_v35  ;;  %7440 = vmatpush1.bf16.msra.mxu0 %v8716_v24 }
  0xb8   :  { %7488 = vmatpush1.bf16.msra.mxu1 %v8740_v30  ;;  %7442 = vmatprep.subr.bf16.mxu0 %v8762_v37 }
  0xb9   :  { %7490 = vmatprep.subr.bf16.mxu1 %v8772_v41  ;;  %968 = vmatmul.mubr.f32.gmra.mrb[2].mxu0 %v8790_v46 }
  0xba   :  { %1854 = vmatmul.mubr.f32.gmra.mrb[2].mxu1 %v8790_v46  ;;  %973 = vmatprep.mubr.f32.mxu0 %v11755_v35  ;;  %v1959_v46 = vsel %vm105_vm0, %v1902_v43, 0  ;;  %v1909_v43 = vld [vmem:[%s11614_s3 + $0x38] sm:$0xff] }
  0xbb   :  { %1859 = vmatprep.mubr.f32.mxu1 %v11755_v35  ;;  %7444 = vmatpush1.bf16.msra.mxu0 %v8778_v42  ;;  %v9312_v11 = vand.u32 4294901760, %v1959_v46  ;;  %v1980_v19 = vsel %vm105_vm0, %v1909_v43, 0 }
  0xbc   :  { %7492 = vmatpush1.bf16.msra.mxu1 %v8788_v45  ;;  %7446 = vmatprep.subr.bf16.mxu0 %v11774_v60  ;;  %v9430_v9 = vand.u32 4294901760, %v1980_v19 }
  0xbd   :  { %7494 = vmatprep.subr.bf16.mxu1 %v11775_v4  ;;  %975 = vmatmul.mubr.f32.gmra.mrb[4].mxu0 %v8864_v2  ;;  %v9323_v15 = vsub.f32 %v1959_v46, %v9312_v11  ;;  %v11778_v4 = vld [vmem:[#allocation14_spill] sm:$0xff]  ;;  %v2081_v46 = vand.u32 4294901760, %v2080_v29 }
  0xbe   :  { %1861 = vmatmul.mubr.f32.gmra.mrb[4].mxu1 %v8864_v2  ;;  %980 = vmatprep.mubr.f32.mxu0 %v11755_v35  ;;  %v1962_v2 = vsel %vm105_vm0, %v1903_v13, 0  ;;  %v9408_v13 = vand.u32 4294901760, %v9391_v49 }
  0xbf   :  { %1866 = vmatprep.mubr.f32.mxu1 %v11755_v35 }
  0xc0   :  { %v2102_v25 = vsub.f32 %v9391_v49, %v9408_v13 }
  0xc1   :  { %982 = vmatmul.mubr.f32.gmra.mrb[6].mxu0 %v8889_v18 }
  0xc2   :  { %1868 = vmatmul.mubr.f32.gmra.mrb[6].mxu1 %v8889_v18  ;;  %987 = vmatprep.mubr.f32.mxu0 %v11755_v35  ;;  %v9325_v18 = vand.u32 4294901760, %v1962_v2 }
  0xc3   :  { %1873 = vmatprep.mubr.f32.mxu1 %v11755_v35 }
  0xc4   :  { %v9339_v63 = vsub.f32 %v1962_v2, %v9325_v18  ;;  %v9411_v2 = vsub.f32 %v1974_v48, %v9393_v53 }
  0xc5   :  { %989 = vmatmul.mubr.f32.gmra.mrb[8].mxu0 %v8893_v0 }
  0xc6   :  { %1875 = vmatmul.mubr.f32.gmra.mrb[8].mxu1 %v8893_v0  ;;  %994 = vmatprep.mubr.f32.mxu0 %v11755_v35  ;;  %v9336_v0 = vand.u32 4294901760, %v9323_v15  ;;  %v9356_v38 = vand.u32 4294901760, %v9339_v63 }
  0xc7   :  { %1880 = vmatprep.mubr.f32.mxu1 %v11755_v35 }
  0xc8   :  { %v2069_v58 = vsub.f32 %v9339_v63, %v9356_v38 }
  0xc9   :  { %996 = vmatmul.mubr.f32.gmra.mrb[10].mxu0 %v8895_v10 }
  0xca   :  { %1882 = vmatmul.mubr.f32.gmra.mrb[10].mxu1 %v8895_v10  ;;  %1001 = vmatprep.mubr.f32.mxu0 %v11755_v35  ;;  %v2058_v10 = vsub.f32 %v9323_v15, %v9336_v0  ;;  %v2070_v52 = vand.u32 4294901760, %v2069_v58  ;;  %v9440_v58 = vsub.f32 %v1980_v19, %v9430_v9  ;;  %v4035_v19 = vld [vmem:[%s11616_s5 + $0x188] sm:$0xff] }
  0xcb   :  { %1887 = vmatprep.mubr.f32.mxu1 %v11755_v35 }
  0xcc   :  { %v2059_v32 = vand.u32 4294901760, %v2058_v10  ;;  %v9425_v10 = vand.u32 4294901760, %v9411_v2 }
  0xcd   :  { %1003 = vmatmul.mubr.f32.gmra.mrb[12].mxu0 %v8994_v31 }
  0xce   :  { %1889 = vmatmul.mubr.f32.gmra.mrb[12].mxu1 %v8994_v31  ;;  %1008 = vmatprep.mubr.f32.mxu0 %v11755_v35  ;;  %v9368_v31 = vsub.f32 %v1968_v28, %v9349_v36  ;;  %v11780_v28 = vld [vmem:[#allocation15_spill] sm:$0xff] }
  0xcf   :  { %1894 = vmatprep.mubr.f32.mxu1 %v11755_v35 }
  0xd1   :  { %1010 = vmatmul.mubr.f32.gmra.mrb[14].mxu0 %v9017_v1 }
  0xd2   :  { %1896 = vmatmul.mubr.f32.gmra.mrb[14].mxu1 %v9017_v1  ;;  %2054 = vmatprep.mubr.f32.mxu0 %v11755_v35  ;;  %v9386_v1 = vand.u32 4294901760, %v9368_v31 }
  0xd3   :  { %2940 = vmatprep.mubr.f32.mxu1 %v11755_v35 }
  0xd4   :  { %v2091_v60 = vsub.f32 %v9368_v31, %v9386_v1 }
  0xd5   :  { %2060 = vmatmul.mubr.f32.vlgmr.msra.gmra.mrb[16].mxu0 %v2059_v32 }
  0xd6   :  { %2946 = vmatmul.mubr.f32.vlgmr.msra.gmra.mrb[16].mxu1 %v2059_v32  ;;  %2065 = vmatprep.mubr.f32.mxu0 %v11755_v35  ;;  %v9437_v32 = vand.u32 4294901760, %v9428_v44 }
  0xd7   :  { %2951 = vmatprep.mubr.f32.mxu1 %v11755_v35  ;;  %7448 = vmatpush1.bf16.msra.mxu0 %v11776_v57 }
  0xd8   :  { %7496 = vmatpush1.bf16.msra.mxu1 %v11777_v3  ;;  %7450 = vmatprep.subr.bf16.mxu0 %v11778_v4  ;;  %v2124_v26 = vsub.f32 %v9428_v44, %v9437_v32 }
  0xd9   :  { %7498 = vmatprep.subr.bf16.mxu1 %v9035_v40  ;;  %2071 = vmatmul.mubr.f32.gmra.mrb[18].mxu0 %v2070_v52  ;;  %v2092_v40 = vand.u32 4294901760, %v2091_v60 }
  0xda   :  { %2957 = vmatmul.mubr.f32.gmra.mrb[18].mxu1 %v2070_v52  ;;  %2076 = vmatprep.mubr.f32.mxu0 %v11755_v35  ;;  %v9447_v52 = vand.u32 4294901760, %v9440_v58  ;;  %v2125_v29 = vand.u32 4294901760, %v2124_v26  ;;  %v3988_v26 = vld [vmem:[%s11616_s5 + $0x10] sm:$0xff] }
  0xdb   :  { %2962 = vmatprep.mubr.f32.mxu1 %v11755_v35  ;;  %7452 = vmatpush1.bf16.msra.mxu0 %v11779_v20  ;;  %v3986_v20 = vld [vmem:[%s11616_s5] sm:$0xff] }
  0xdc   :  { %7500 = vmatpush1.bf16.msra.mxu1 %v9044_v62  ;;  %7454 = vmatprep.subr.bf16.mxu0 %v11780_v28  ;;  %v2103_v62 = vand.u32 4294901760, %v2102_v25  ;;  %v2135_v55 = vsub.f32 %v9440_v58, %v9447_v52  ;;  %v3987_v28 = vld [vmem:[%s11616_s5 + $0x8] sm:$0xff]  ;;  %v4018_v25 = vld [vmem:[%s11616_s5 + $0x100] sm:$0xff] }
  0xdd   :  { %7502 = vmatprep.subr.bf16.mxu1 %v9049_v5  ;;  %2082 = vmatmul.mubr.f32.gmra.mrb[20].mxu0 %v2081_v46  ;;  %v2113_v5 = vsub.f32 %v9411_v2, %v9425_v10 }
  0xde   :  { %2968 = vmatmul.mubr.f32.gmra.mrb[20].mxu1 %v2081_v46  ;;  %2087 = vmatprep.mubr.f32.mxu0 %v11755_v35  ;;  %v2136_v57 = vand.u32 4294901760, %v2135_v55  ;;  %v4002_v46 = vld [vmem:[%s11616_s5 + $0x80] sm:$0xff] }
  0xdf   :  { %2973 = vmatprep.mubr.f32.mxu1 %v11755_v35  ;;  %v2114_v48 = vand.u32 4294901760, %v2113_v5  ;;  %v4005_v5 = vld [vmem:[%s11616_s5 + $0x98] sm:$0xff] }
  0xe1   :  { %2093 = vmatmul.mubr.f32.gmra.mrb[22].mxu0 %v2092_v40 }
  0xe2   :  { %2979 = vmatmul.mubr.f32.gmra.mrb[22].mxu1 %v2092_v40  ;;  %2098 = vmatprep.mubr.f32.mxu0 %v11755_v35 }
  0xe3   :  { %2984 = vmatprep.mubr.f32.mxu1 %v11755_v35 }
  0xe5   :  { %2104 = vmatmul.mubr.f32.gmra.mrb[24].mxu0 %v2103_v62 }
  0xe6   :  { %2990 = vmatmul.mubr.f32.gmra.mrb[24].mxu1 %v2103_v62  ;;  %2109 = vmatprep.mubr.f32.mxu0 %v11755_v35  ;;  %v4004_v62 = vld [vmem:[%s11616_s5 + $0x90] sm:$0xff] }
  0xe7   :  { %2995 = vmatprep.mubr.f32.mxu1 %v11755_v35 }
  0xe9   :  { %2115 = vmatmul.mubr.f32.gmra.mrb[26].mxu0 %v2114_v48 }
  0xea   :  { %3001 = vmatmul.mubr.f32.gmra.mrb[26].mxu1 %v2114_v48  ;;  %2120 = vmatprep.mubr.f32.mxu0 %v11755_v35  ;;  %v4037_v48 = vld [vmem:[%s11616_s5 + $0x198] sm:$0xff] }
  0xeb   :  { %3006 = vmatprep.mubr.f32.mxu1 %v11755_v35 }
  0xed   :  { %2126 = vmatmul.mubr.f32.gmra.mrb[28].mxu0 %v2125_v29 }
  0xee   :  { %3012 = vmatmul.mubr.f32.gmra.mrb[28].mxu1 %v2125_v29  ;;  %2131 = vmatprep.mubr.f32.mxu0 %v11755_v35 }
  0xef   :  { %3017 = vmatprep.mubr.f32.mxu1 %v11755_v35 }
  0xf1   :  { %2137 = vmatmul.mubr.f32.gmra.mrb[30].mxu0 %v2136_v57 }
  0xf2   :  { %3023 = vmatmul.mubr.f32.gmra.mrb[30].mxu1 %v2136_v57  ;;  %2247 = vmatprep.mubr.f32.mxu0 %v11755_v35  ;;  %v4020_v57 = vld [vmem:[%s11616_s5 + $0x110] sm:$0xff] }
  0xf3   :  { %3133 = vmatprep.mubr.f32.mxu1 %v11755_v35 }
  0xf5   :  { %2249 = vmatmul.mubr.f32.vlgmr.msra.gmra.mrb[16].mxu0 %v9312_v11 }
  0xf6   :  { %3135 = vmatmul.mubr.f32.vlgmr.msra.gmra.mrb[16].mxu1 %v9312_v11  ;;  %2254 = vmatprep.mubr.f32.mxu0 %v11755_v35 }
  0xf7   :  { %3140 = vmatprep.mubr.f32.mxu1 %v11755_v35  ;;  %7456 = vmatpush1.bf16.msra.mxu0 %v9101_v6  ;;  %v8605_v6 = vmov 0  }
  0xf8   :  { %7504 = vmatpush1.bf16.msra.mxu1 %v9105_v33  ;;  %7458 = vmatprep.subr.bf16.mxu0 %v9109_v39  ;;  %v1911_v33 = vld [vmem:[%s11615_s4 + $0x8] sm:$0xff]  ;;  %v1913_v39 = vld [vmem:[%s11615_s4 + $0x18] sm:$0xff] }
  0xf9   :  { %7506 = vmatprep.subr.bf16.mxu1 %v9113_v22  ;;  %2256 = vmatmul.mubr.f32.gmra.mrb[18].mxu0 %v9325_v18  ;;  %v1914_v22 = vld [vmem:[%s11615_s4 + $0x20] sm:$0xff] }
  0xfa   :  { %3142 = vmatmul.mubr.f32.gmra.mrb[18].mxu1 %v9325_v18  ;;  %2261 = vmatprep.mubr.f32.mxu0 %v11755_v35 }
  0xfb   :  { %3147 = vmatprep.mubr.f32.mxu1 %v11755_v35  ;;  %7460 = vmatpush1.bf16.msra.mxu0 %v9123_v50  ;;  %v1915_v50 = vld [vmem:[%s11615_s4 + $0x28] sm:$0xff] }
  0xfc   :  { %7508 = vmatpush1.bf16.msra.mxu1 %v9127_v51  ;;  %7462 = vmatprep.subr.bf16.mxu0 %v8694_v16  ;;  %v1916_v51 = vld [vmem:[%s11615_s4 + $0x30] sm:$0xff] }
  0xfd   :  { %7510 = vmatprep.subr.bf16.mxu1 %v8714_v23  ;;  %2263 = vmatmul.mubr.f32.gmra.mrb[20].mxu0 %v9341_v27 }
  0xfe   :  { %3149 = vmatmul.mubr.f32.gmra.mrb[20].mxu1 %v9341_v27  ;;  %2268 = vmatprep.mubr.f32.mxu0 %v11755_v35 }
  0xff   :  { %3154 = vmatprep.mubr.f32.mxu1 %v11755_v35  ;;  %8386 = vset.pattern.permute.xlu0 %v8605_v6 }
 0x100   :  { %8387 = vset.pattern.permute.xlu1 %v8605_v6 }
 0x101   :  { %2270 = vmatmul.mubr.f32.gmra.mrb[22].mxu0 %v9349_v36 }
 0x102   :  { %3156 = vmatmul.mubr.f32.gmra.mrb[22].mxu1 %v9349_v36  ;;  %2275 = vmatprep.mubr.f32.mxu0 %v11755_v35 }
 0x103   :  { %3161 = vmatprep.mubr.f32.mxu1 %v11755_v35 }
 0x105   :  { %2277 = vmatmul.mubr.f32.gmra.mrb[24].mxu0 %v9377_v47 }
 0x106   :  { %3163 = vmatmul.mubr.f32.gmra.mrb[24].mxu1 %v9377_v47  ;;  %2282 = vmatprep.mubr.f32.mxu0 %v11755_v35 }
 0x107   :  { %3168 = vmatprep.mubr.f32.mxu1 %v11755_v35 }
 0x109   :  { %2284 = vmatmul.mubr.f32.gmra.mrb[26].mxu0 %v9393_v53 }
 0x10a   :  { %3170 = vmatmul.mubr.f32.gmra.mrb[26].mxu1 %v9393_v53  ;;  %2289 = vmatprep.mubr.f32.mxu0 %v11755_v35 }
 0x10b   :  { %3175 = vmatprep.mubr.f32.mxu1 %v11755_v35 }
 0x10d   :  { %2291 = vmatmul.mubr.f32.gmra.mrb[28].mxu0 %v9413_v59 }
 0x10e   :  { %3177 = vmatmul.mubr.f32.gmra.mrb[28].mxu1 %v9413_v59  ;;  %2296 = vmatprep.mubr.f32.mxu0 %v11755_v35 }
 0x10f   :  { %3182 = vmatprep.mubr.f32.mxu1 %v11755_v35 }
 0x111   :  { %2298 = vmatmul.mubr.f32.gmra.mrb[30].mxu0 %v9430_v9 }
 0x112   :  { %3184 = vmatmul.mubr.f32.gmra.mrb[30].mxu1 %v9430_v9  ;;  %2384 = vmatprep.mubr.f32.mxu0 %v11755_v35 }
 0x113   :  { %3270 = vmatprep.mubr.f32.mxu1 %v11755_v35 }
 0x115   :  { %2387 = vmatmul.mubr.f32.vlgmr.msra.gmra.mrb[16].mxu0 %v9323_v15 }
 0x116   :  { %3273 = vmatmul.mubr.f32.vlgmr.msra.gmra.mrb[16].mxu1 %v9323_v15  ;;  %2392 = vmatprep.mubr.f32.mxu0 %v11755_v35  ;;  %v1917_v15 = vld [vmem:[%s11615_s4 + $0x38] sm:$0xff] }
 0x117   :  { %3278 = vmatprep.mubr.f32.mxu1 %v11755_v35  ;;  %7464 = vmatpush1.bf16.msra.mxu0 %v8716_v24 }
 0x118   :  { %7512 = vmatpush1.bf16.msra.mxu1 %v8740_v30  ;;  %7466 = vmatprep.subr.bf16.mxu0 %v8762_v37 }
 0x119   :  { %7514 = vmatprep.subr.bf16.mxu1 %v8772_v41  ;;  %2395 = vmatmul.mubr.f32.gmra.mrb[18].mxu0 %v9339_v63 }
 0x11a   :  { %3281 = vmatmul.mubr.f32.gmra.mrb[18].mxu1 %v9339_v63  ;;  %2400 = vmatprep.mubr.f32.mxu0 %v11755_v35 }
 0x11b   :  { %3286 = vmatprep.mubr.f32.mxu1 %v11755_v35  ;;  %7468 = vmatpush1.bf16.msra.mxu0 %v8778_v42 }
 0x11c   :  { %7516 = vmatpush1.bf16.msra.mxu1 %v8788_v45  ;;  %7470 = vmatprep.subr.bf16.mxu0 %v9057_v8  ;;  %v1912_v8 = vld [vmem:[%s11615_s4 + $0x10] sm:$0xff] }
 0x11d   :  { %7518 = vmatprep.subr.bf16.mxu1 %v9071_v21  ;;  %2403 = vmatmul.mubr.f32.gmra.mrb[20].mxu0 %v9359_v34  ;;  %v1910_v21 = vld [vmem:[%s11615_s4] sm:$0xff] }
 0x11e   :  { %3289 = vmatmul.mubr.f32.gmra.mrb[20].mxu1 %v9359_v34  ;;  %2408 = vmatprep.mubr.f32.mxu0 %v11755_v35 }
 0x11f   :  { %3294 = vmatprep.mubr.f32.mxu1 %v11755_v35  ;;  %1920 = vperm.xlu0 %8386, %v1910_v21   ;;  %v4021_v21 = vld [vmem:[%s11616_s5 + $0x118] sm:$0xff] }
 0x120   :  { %1930 = vperm.xlu1 %8387, %v1912_v8   ;;  %v4006_v8 = vld [vmem:[%s11616_s5 + $0xa0] sm:$0xff]  ;;  %v7571_v6 = vpack.c.bf16 %v4021_v21, %v4020_v57 }
 0x121   :  { %2411 = vmatmul.mubr.f32.gmra.mrb[22].mxu0 %v9368_v31 }
 0x122   :  { %3297 = vmatmul.mubr.f32.gmra.mrb[22].mxu1 %v9368_v31  ;;  %2416 = vmatprep.mubr.f32.mxu0 %v11755_v35 }
 0x123   :  { %3302 = vmatprep.mubr.f32.mxu1 %v11755_v35  ;;  %1925 = vperm.xlu0 %8386, %v1911_v33   ;;  %v4007_v33 = vld [vmem:[%s11616_s5 + $0xa8] sm:$0xff] }
 0x124   :  { %1935 = vperm.xlu1 %8387, %v1913_v39   ;;  %v4038_v39 = vld [vmem:[%s11616_s5 + $0x1a0] sm:$0xff] }
 0x125   :  { %2419 = vmatmul.mubr.f32.gmra.mrb[24].mxu0 %v9391_v49 }
 0x126   :  { %3305 = vmatmul.mubr.f32.gmra.mrb[24].mxu1 %v9391_v49  ;;  %2424 = vmatprep.mubr.f32.mxu0 %v11755_v35 }
 0x127   :  { %3310 = vmatprep.mubr.f32.mxu1 %v11755_v35  ;;  %1940 = vperm.xlu0 %8386, %v1914_v22   ;;  %v4039_v22 = vld [vmem:[%s11616_s5 + $0x1a8] sm:$0xff] }
 0x128   :  { %1945 = vperm.xlu1 %8387, %v1915_v50   ;;  %v7541_v50 = vpack.c.bf16 %v4007_v33, %v4006_v8 }
 0x129   :  { %2427 = vmatmul.mubr.f32.gmra.mrb[26].mxu0 %v9411_v2 }
 0x12a   :  { %3313 = vmatmul.mubr.f32.gmra.mrb[26].mxu1 %v9411_v2  ;;  %2432 = vmatprep.mubr.f32.mxu0 %v11755_v35 }
 0x12b   :  { %3318 = vmatprep.mubr.f32.mxu1 %v11755_v35  ;;  %1950 = vperm.xlu0 %8386, %v1916_v51   ;;  %v7573_v51 = vpack.c.bf16 %v4039_v22, %v4038_v39 }
 0x12c   :  { %1955 = vperm.xlu1 %8387, %v1917_v15   ;;  %v3990_v15 = vld [vmem:[%s11616_s5 + $0x20] sm:$0xff] }
 0x12d   :  { %2435 = vmatmul.mubr.f32.gmra.mrb[28].mxu0 %v9428_v44 }
 0x12e   :  { %3321 = vmatmul.mubr.f32.gmra.mrb[28].mxu1 %v9428_v44  ;;  %2440 = vmatprep.mubr.f32.mxu0 %v11755_v35  ;;  %v7535_v44 = vpack.c.bf16 %v3987_v28, %v3986_v20  ;;  %v4040_v28 = vld [vmem:[%s11616_s5 + $0x1b0] sm:$0xff] }
 0x12f   :  { %3326 = vmatprep.mubr.f32.mxu1 %v11755_v35 }
 0x131   :  { %2443 = vmatmul.mubr.f32.gmra.mrb[30].mxu0 %v9440_v58 }
 0x132   :  { %3329 = vmatmul.mubr.f32.gmra.mrb[30].mxu1 %v9440_v58  ;;  %2521 = vmatprep.mubr.f32.mxu0 %v11755_v35  ;;  %v7537_v58 = vpack.c.bf16 %v4005_v5, %v4004_v62  ;;  %v3993_v62 = vld [vmem:[%s11616_s5 + $0x38] sm:$0xff]  ;;  %v4024_v5 = vld [vmem:[%s11616_s5 + $0x130] sm:$0xff] }
 0x133   :  { %3407 = vmatprep.mubr.f32.mxu1 %v11755_v35 }
 0x135   :  { %2525 = vmatmul.mubr.f32.vlgmr.msra.gmra.mrb[16].mxu0 %v9336_v0 }
 0x136   :  { %3411 = vmatmul.mubr.f32.vlgmr.msra.gmra.mrb[16].mxu1 %v9336_v0  ;;  %2530 = vmatprep.mubr.f32.mxu0 %v11755_v35 }
 0x137   :  { %3416 = vmatprep.mubr.f32.mxu1 %v11755_v35  ;;  %7472 = vmatpush1.bf16.msra.mxu0 %v9065_v54 }
 0x138   :  { %7520 = vmatpush1.bf16.msra.mxu1 %v9077_v14  ;;  %7474 = vmatprep.subr.bf16.mxu0 %v9084_v61 }
 0x139   :  { %7522 = vmatprep.subr.bf16.mxu1 %v9090_v56  ;;  %2534 = vmatmul.mubr.f32.gmra.mrb[18].mxu0 %v9356_v38 }
 0x13a   :  { %3420 = vmatmul.mubr.f32.gmra.mrb[18].mxu1 %v9356_v38  ;;  %2539 = vmatprep.mubr.f32.mxu0 %v11755_v35 }
 0x13b   :  { %3425 = vmatprep.mubr.f32.mxu1 %v11755_v35  ;;  %7476 = vmatpush1.bf16.msra.mxu0 %v9088_v12 }
 0x13c   :  { %7524 = vmatpush1.bf16.msra.mxu1 %v9093_v17  ;;  %7478 = vmatprep.subr.bf16.mxu0 %v8694_v16 }
 0x13d   :  { %7526 = vmatprep.subr.bf16.mxu1 %v8714_v23  ;;  %2543 = vmatmul.mubr.f32.gmra.mrb[20].mxu0 %v9375_v7 }
 0x13e   :  { %3429 = vmatmul.mubr.f32.gmra.mrb[20].mxu1 %v9375_v7  ;;  %2548 = vmatprep.mubr.f32.mxu0 %v11755_v35 }
 0x13f   :  { %3434 = vmatprep.mubr.f32.mxu1 %v11755_v35 }
 0x141   :  { %2552 = vmatmul.mubr.f32.gmra.mrb[22].mxu0 %v9386_v1 }
 0x142   :  { %3438 = vmatmul.mubr.f32.gmra.mrb[22].mxu1 %v9386_v1  ;;  %2557 = vmatprep.mubr.f32.mxu0 %v11755_v35 }
 0x143   :  { %3443 = vmatprep.mubr.f32.mxu1 %v11755_v35 }
 0x145   :  { %2561 = vmatmul.mubr.f32.gmra.mrb[24].mxu0 %v9408_v13 }
 0x146   :  { %3447 = vmatmul.mubr.f32.gmra.mrb[24].mxu1 %v9408_v13  ;;  %2566 = vmatprep.mubr.f32.mxu0 %v11755_v35  ;;  %v4003_v13 = vld [vmem:[%s11616_s5 + $0x88] sm:$0xff] }
 0x147   :  { %3452 = vmatprep.mubr.f32.mxu1 %v11755_v35  ;;  %v7533_v2 = vpack.c.bf16 %v4003_v13, %v4002_v46  ;;  %v3991_v46 = vld [vmem:[%s11616_s5 + $0x28] sm:$0xff]  ;;  %v4022_v13 = vld [vmem:[%s11616_s5 + $0x120] sm:$0xff] }
 0x148   :  { %v7543_v20 = vpack.c.bf16 %v3991_v46, %v3990_v15 }
 0x149   :  { %2570 = vmatmul.mubr.f32.gmra.mrb[26].mxu0 %v9425_v10 }
 0x14a   :  { %3456 = vmatmul.mubr.f32.gmra.mrb[26].mxu1 %v9425_v10  ;;  %2575 = vmatprep.mubr.f32.mxu0 %v11755_v35  ;;  %v4019_v10 = vld [vmem:[%s11616_s5 + $0x108] sm:$0xff] }
 0x14b   :  { %3461 = vmatprep.mubr.f32.mxu1 %v11755_v35 }
 0x14d   :  { %2579 = vmatmul.mubr.f32.gmra.mrb[28].mxu0 %v9437_v32 }
 0x14e   :  { %3465 = vmatmul.mubr.f32.gmra.mrb[28].mxu1 %v9437_v32  ;;  %2584 = vmatprep.mubr.f32.mxu0 %v11755_v35  ;;  %v4036_v32 = vld [vmem:[%s11616_s5 + $0x190] sm:$0xff] }
 0x14f   :  { %3470 = vmatprep.mubr.f32.mxu1 %v11755_v35  ;;  %v7569_v29 = vpack.c.bf16 %v4037_v48, %v4036_v32  ;;  %v4025_v32 = vld [vmem:[%s11616_s5 + $0x138] sm:$0xff] }
 0x150   :  { %v7579_v48 = vpack.c.bf16 %v4025_v32, %v4024_v5 }
 0x151   :  { %2588 = vmatmul.mubr.f32.gmra.mrb[30].mxu0 %v9447_v52 }
 0x152   :  { %3474 = vmatmul.mubr.f32.gmra.mrb[30].mxu1 %v9447_v52  ;;  %2682 = vmatprep.mubr.f32.mxu0 %v11755_v35  ;;  %v3989_v52 = vld [vmem:[%s11616_s5 + $0x18] sm:$0xff] }
 0x153   :  { %3568 = vmatprep.mubr.f32.mxu1 %v11755_v35  ;;  %v7539_v55 = vpack.c.bf16 %v3989_v52, %v3988_v26 }
 0x155   :  { %2684 = vmatmul.mubr.f32.vlgmr.msra.gmra.mrb[16].mxu0 %v9312_v11 }
 0x156   :  { %3570 = vmatmul.mubr.f32.vlgmr.msra.gmra.mrb[16].mxu1 %v9312_v11  ;;  %2689 = vmatprep.mubr.f32.mxu0 %v11755_v35 }
 0x157   :  { %3575 = vmatprep.mubr.f32.mxu1 %v11755_v35  ;;  %7480 = vmatpush1.bf16.msra.mxu0 %v8716_v24 }
 0x158   :  { %7528 = vmatpush1.bf16.msra.mxu1 %v8740_v30  ;;  %7482 = vmatprep.subr.bf16.mxu0 %v8762_v37 }
 0x159   :  { %7530 = vmatprep.subr.bf16.mxu1 %v8772_v41  ;;  %2691 = vmatmul.mubr.f32.gmra.mrb[18].mxu0 %v9325_v18 }
 0x15a   :  { %3577 = vmatmul.mubr.f32.gmra.mrb[18].mxu1 %v9325_v18  ;;  %2696 = vmatprep.mubr.f32.mxu0 %v11755_v35 }
 0x15b   :  { %3582 = vmatprep.mubr.f32.mxu1 %v11755_v35  ;;  %7484 = vmatpush1.bf16.msra.mxu0 %v8778_v42 }
 0x15c   :  { %7532 = vmatpush1.bf16.msra.mxu1 %v8788_v45  ;;  %7534 = vmatprep.subr.bf16.mxu0 %v7533_v2  ;;  %v4023_v2 = vld [vmem:[%s11616_s5 + $0x128] sm:$0xff] }
 0x15d   :  { %2698 = vmatmul.mubr.f32.gmra.mrb[20].mxu0 %v9341_v27 }
 0x15e   :  { %3584 = vmatmul.mubr.f32.gmra.mrb[20].mxu1 %v9341_v27  ;;  %2703 = vmatprep.mubr.f32.mxu0 %v11755_v35 }
 0x15f   :  { %3589 = vmatprep.mubr.f32.mxu1 %v11755_v35 }
 0x161   :  { %2705 = vmatmul.mubr.f32.gmra.mrb[22].mxu0 %v9349_v36 }
 0x162   :  { %3591 = vmatmul.mubr.f32.gmra.mrb[22].mxu1 %v9349_v36  ;;  %2710 = vmatprep.mubr.f32.mxu0 %v11755_v35 }
 0x163   :  { %3596 = vmatprep.mubr.f32.mxu1 %v11755_v35 }
 0x165   :  { %2712 = vmatmul.mubr.f32.gmra.mrb[24].mxu0 %v9377_v47 }
 0x166   :  { %3598 = vmatmul.mubr.f32.gmra.mrb[24].mxu1 %v9377_v47  ;;  %2717 = vmatprep.mubr.f32.mxu0 %v11755_v35 }
 0x167   :  { %3603 = vmatprep.mubr.f32.mxu1 %v11755_v35 }
 0x169   :  { %2719 = vmatmul.mubr.f32.gmra.mrb[26].mxu0 %v9393_v53 }
 0x16a   :  { %3605 = vmatmul.mubr.f32.gmra.mrb[26].mxu1 %v9393_v53  ;;  %2724 = vmatprep.mubr.f32.mxu0 %v11755_v35 }
 0x16b   :  { %3610 = vmatprep.mubr.f32.mxu1 %v11755_v35 }
 0x16d   :  { %2726 = vmatmul.mubr.f32.gmra.mrb[28].mxu0 %v9413_v59 }
 0x16e   :  { %3612 = vmatmul.mubr.f32.gmra.mrb[28].mxu1 %v9413_v59  ;;  %2731 = vmatprep.mubr.f32.mxu0 %v11755_v35 }
 0x16f   :  { %3617 = vmatprep.mubr.f32.mxu1 %v11755_v35 }
 0x171   :  { %2733 = vmatmul.mubr.f32.gmra.mrb[30].mxu0 %v9430_v9 }
 0x172   :  { %3619 = vmatmul.mubr.f32.gmra.mrb[30].mxu1 %v9430_v9  ;;  %2811 = vmatprep.mubr.f32.mxu0 %v11755_v35 }
 0x173   :  { %3697 = vmatprep.mubr.f32.mxu1 %v11755_v35 }
 0x175   :  { %2813 = vmatmul.mubr.f32.vlgmr.msra.gmra.mrb[16].mxu0 %v9312_v11 }
 0x176   :  { %3699 = vmatmul.mubr.f32.vlgmr.msra.gmra.mrb[16].mxu1 %v9312_v11  ;;  %2818 = vmatprep.mubr.f32.mxu0 %v11755_v35 }
 0x177   :  { %3704 = vmatprep.mubr.f32.mxu1 %v11755_v35  ;;  %7536 = vmatpush3.bf16.msra.mxu0 %v7535_v44 }
 0x178   :  { %7538 = vmatprep.subr.bf16.mxu0 %v7537_v58 }
 0x179   :  { %2820 = vmatmul.mubr.f32.gmra.mrb[18].mxu0 %v9325_v18 }
 0x17a   :  { %3706 = vmatmul.mubr.f32.gmra.mrb[18].mxu1 %v9325_v18  ;;  %2825 = vmatprep.mubr.f32.mxu0 %v11755_v35 }
 0x17b   :  { %3711 = vmatprep.mubr.f32.mxu1 %v11755_v35  ;;  %7540 = vmatpush3.bf16.msra.mxu0 %v7539_v55 }
 0x17c   :  { %7542 = vmatprep.subr.bf16.mxu0 %v7541_v50 }
 0x17d   :  { %2827 = vmatmul.mubr.f32.gmra.mrb[20].mxu0 %v9341_v27 }
 0x17e   :  { %3713 = vmatmul.mubr.f32.gmra.mrb[20].mxu1 %v9341_v27  ;;  %2832 = vmatprep.mubr.f32.mxu0 %v11755_v35 }
 0x17f   :  { %3718 = vmatprep.mubr.f32.mxu1 %v11755_v35  ;;  %7544 = vmatpush3.bf16.msra.mxu0 %v7543_v20 }
 0x181   :  { %2834 = vmatmul.mubr.f32.gmra.mrb[22].mxu0 %v9349_v36 }
 0x182   :  { %3720 = vmatmul.mubr.f32.gmra.mrb[22].mxu1 %v9349_v36  ;;  %2839 = vmatprep.mubr.f32.mxu0 %v11755_v35 }
 0x183   :  { %3725 = vmatprep.mubr.f32.mxu1 %v11755_v35 }
 0x185   :  { %2841 = vmatmul.mubr.f32.gmra.mrb[24].mxu0 %v9377_v47 }
 0x186   :  { %3727 = vmatmul.mubr.f32.gmra.mrb[24].mxu1 %v9377_v47  ;;  %2846 = vmatprep.mubr.f32.mxu0 %v11755_v35 }
 0x187   :  { %3732 = vmatprep.mubr.f32.mxu1 %v11755_v35 }
 0x188   :  { %v9661_v16 = vpop.f32.mrb[0].mxu0 }
 0x189   :  { %v9663_v23 = vpop.f32.mrb[0].mxu1  ;;  %v9665_v24 = vpop.f32.mrb[1].mxu0  ;;  %2848 = vmatmul.mubr.f32.gmra.mrb[26].mxu0 %v9393_v53 }
 0x18a   :  { %v9667_v30 = vpop.f32.mrb[1].mxu1  ;;  %3734 = vmatmul.mubr.f32.gmra.mrb[26].mxu1 %v9393_v53  ;;  %2853 = vmatprep.mubr.f32.mxu0 %v11755_v35 }
 0x18b   :  { %3739 = vmatprep.mubr.f32.mxu1 %v11755_v35 }
 0x18c   :  { %v9673_v37 = vpop.f32.mrb[2].mxu0 }
 0x18d   :  { %v9675_v41 = vpop.f32.mrb[2].mxu1  ;;  %v9677_v42 = vpop.f32.mrb[3].mxu0  ;;  %2855 = vmatmul.mubr.f32.gmra.mrb[28].mxu0 %v9413_v59 }
 0x18e   :  { %11781 = vst [vmem:[#allocation5_spill] sm:$0xff] %v9675_v41  ;;  %11782 = vst [vmem:[#allocation9_spill] sm:$0xff] %v9677_v42  ;;  %v9679_v45 = vpop.f32.mrb[3].mxu1  ;;  %3741 = vmatmul.mubr.f32.gmra.mrb[28].mxu1 %v9413_v59  ;;  %2860 = vmatprep.mubr.f32.mxu0 %v11755_v35  ;;  %v4034_v59 = vld [vmem:[%s11616_s5 + $0x180] sm:$0xff] }
 0x18f   :  { %11783 = vst [vmem:[#allocation10_spill] sm:$0xff] %v9679_v45  ;;  %3746 = vmatprep.mubr.f32.mxu1 %v11755_v35  ;;  %v7565_v40 = vpack.c.bf16 %v4035_v19, %v4034_v59  ;;  %v4008_v59 = vld [vmem:[%s11616_s5 + $0xb0] sm:$0xff]  ;;  %v4009_v19 = vld [vmem:[%s11616_s5 + $0xb8] sm:$0xff] }
 0x190   :  { %v9685_v54 = vpop.f32.mrb[4].mxu0  ;;  %v7545_v44 = vpack.c.bf16 %v4009_v19, %v4008_v59 }
 0x191   :  { %v9687_v14 = vpop.f32.mrb[4].mxu1  ;;  %v9689_v61 = vpop.f32.mrb[5].mxu0  ;;  %2862 = vmatmul.mubr.f32.gmra.mrb[30].mxu0 %v9430_v9  ;;  %7566 = vmatprep.subr.bf16.mxu1 %v7565_v40  ;;  %v7575_v40 = vpack.c.bf16 %v4023_v2, %v4022_v13 }
 0x192   :  { %11784 = vst [vmem:[#allocation11_spill] sm:$0xff] %v9689_v61  ;;  %v9691_v12 = vpop.f32.mrb[5].mxu1  ;;  %3748 = vmatmul.mubr.f32.gmra.mrb[30].mxu1 %v9430_v9  ;;  %v7567_v9 = vpack.c.bf16 %v4019_v10, %v4018_v25  ;;  %v4041_v25 = vld [vmem:[%s11616_s5 + $0x1b8] sm:$0xff]  ;;  %v3992_v10 = vld [vmem:[%s11616_s5 + $0x30] sm:$0xff]  ;;  %7546 = vmatprep.subr.bf16.mxu0 %v7545_v44 }
 0x193   :  { %11785 = vst [vmem:[#allocation12_spill] sm:$0xff] %v9691_v12  ;;  %v7547_v58 = vpack.c.bf16 %v3993_v62, %v3992_v10 }
 0x194   :  { %v9695_v56 = vpop.f32.mrb[6].mxu0  ;;  %7568 = vmatpush3.bf16.msra.mxu1 %v7567_v9  ;;  %v7577_v9 = vpack.c.bf16 %v4041_v25, %v4040_v28 }
 0x195   :  { %11786 = vst [vmem:[#allocation6_spill] sm:$0xff] %v9695_v56  ;;  %v9697_v17 = vpop.f32.mrb[6].mxu1  ;;  %v9699_v11 = vpop.f32.mrb[7].mxu0  ;;  %7570 = vmatprep.subr.bf16.mxu1 %v7569_v29  ;;  %7548 = vmatpush3.bf16.msra.mxu0 %v7547_v58 }
 0x196   :  { %11787 = vst [vmem:[#allocation8_spill] sm:$0xff] %v9697_v17  ;;  %11788 = vst [vmem:[#allocation7_spill] sm:$0xff] %v9699_v11  ;;  %v9701_v18 = vpop.f32.mrb[7].mxu1 }
 0x197   :  { %11789 = vst [vmem:[#allocation13_spill] sm:$0xff] %v9701_v18 }
 0x198   :  { %v9703_v0 = vpop.f32.mrb[8].mxu0  ;;  %7572 = vmatpush3.bf16.msra.mxu1 %v7571_v6 }
 0x199   :  { %11790 = vst [vmem:[#allocation14_spill] sm:$0xff] %v9703_v0  ;;  %v9705_v63 = vpop.f32.mrb[8].mxu1  ;;  %v9707_v27 = vpop.f32.mrb[9].mxu0  ;;  %7574 = vmatprep.subr.bf16.mxu1 %v7573_v51 }
 0x19a   :  { %11791 = vst [vmem:[#allocation16_spill] sm:$0xff] %v9705_v63  ;;  %11792 = vst [vmem:[#allocation15_spill] sm:$0xff] %v9707_v27  ;;  %v9709_v36 = vpop.f32.mrb[9].mxu1 }
 0x19b   :  { %11793 = vst [vmem:[#allocation17_spill] sm:$0xff] %v9709_v36 }
 0x19c   :  { %v9711_v38 = vpop.f32.mrb[10].mxu0  ;;  %7576 = vmatpush3.bf16.msra.mxu1 %v7575_v40 }
 0x19d   :  { %11794 = vst [vmem:[#allocation18_spill] sm:$0xff] %v9711_v38  ;;  %v9713_v34 = vpop.f32.mrb[10].mxu1  ;;  %v9715_v31 = vpop.f32.mrb[11].mxu0  ;;  %7578 = vmatprep.subr.bf16.mxu1 %v7577_v9 }
 0x19e   :  { %11795 = vst [vmem:[#allocation19_spill] sm:$0xff] %v9713_v34  ;;  %11796 = vst [vmem:[#allocation20_spill] sm:$0xff] %v9715_v31  ;;  %v9717_v7 = vpop.f32.mrb[11].mxu1  ;;  %v1921_v26 = vpop.permute.xlu0 %1920 }
 0x19f   :  { %11797 = vst [vmem:[#allocation21_spill] sm:$0xff] %v9717_v7  ;;  %v1931_v10 = vpop.permute.xlu1 %1930 }
 0x1a0   :  { %v9719_v47 = vpop.f32.mrb[12].mxu0  ;;  %7580 = vmatpush3.bf16.msra.mxu1 %v7579_v48 }
 0x1a1   :  { %11798 = vst [vmem:[#allocation22_spill] sm:$0xff] %v9719_v47  ;;  %v9721_v1 = vpop.f32.mrb[12].mxu1  ;;  %v9723_v49 = vpop.f32.mrb[13].mxu0 }
 0x1a2   :  { %11799 = vst [vmem:[#allocation23_spill] sm:$0xff] %v9721_v1  ;;  %11800 = vst [vmem:[#allocation24_spill] sm:$0xff] %v9723_v49  ;;  %v9725_v53 = vpop.f32.mrb[13].mxu1  ;;  %v1926_v22 = vpop.permute.xlu0 %1925 }
 0x1a3   :  { %11801 = vst [vmem:[#allocation25_spill] sm:$0xff] %v9725_v53 }
 0x1a4   :  { %v9727_v3 = vpop.f32.mrb[14].mxu0 }
 0x1a5   :  { %11802 = vst [vmem:[#allocation26_spill] sm:$0xff] %v9727_v3  ;;  %v9729_v43 = vpop.f32.mrb[14].mxu1  ;;  %v9731_v60 = vpop.f32.mrb[15].mxu0 }
 0x1a6   :  { %11803 = vst [vmem:[#allocation27_spill] sm:$0xff] %v9729_v43  ;;  %11804 = vst [vmem:[#allocation28_spill] sm:$0xff] %v9731_v60  ;;  %v9733_v4 = vpop.f32.mrb[15].mxu1 }
 0x1a7   :  { %11805 = vst [vmem:[#allocation29_spill] sm:$0xff] %v9733_v4 }
 0x248   :  { %v2814_v52 = vpop.f32.mrb[16].mxu0 }
 0x249   :  { %v3700_v29 = vpop.f32.mrb[16].mxu1  ;;  %v7869_v55 = vadd.f32 %v2814_v52, %v1921_v26  ;;  %v2816_v21 = vpop.f32.mrb[17].mxu0 }
 0x24a   :  { %v7885_v57 = vadd.f32 %v3700_v29, %v1921_v26  ;;  %v3702_v8 = vpop.f32.mrb[17].mxu1  ;;  %v7870_v6 = vadd.f32 %v2816_v21, %v1921_v26 }
 0x24b   :  { %v7886_v33 = vadd.f32 %v3702_v8, %v1921_v26  ;;  %vm3754_vm1 = vcmp.gt.f32.partialorder %v7869_v55, 0.0  ;;  %v3786_v39 = vmul.f32 0.2, %v7869_v55 }
 0x24c   :  { %v3788_v50 = vmul.f32 0.2, %v7885_v57  ;;  %vm3755_vm2 = vcmp.gt.f32.partialorder %v7870_v6, 0.0  ;;  %v3787_v51 = vmul.f32 0.2, %v7870_v6  ;;  %v2821_v15 = vpop.f32.mrb[18].mxu0 }
 0x24d   :  { %v9831_v46 = vsel %vm3754_vm1, %v7869_v55, %v3786_v39  ;;  %vm3756_vm3 = vcmp.gt.f32.partialorder %v7885_v57, 0.0  ;;  %v3789_v13 = vmul.f32 0.2, %v7886_v33  ;;  %v7871_v2 = vadd.f32 %v2821_v15, %v1926_v22  ;;  %v3707_v59 = vpop.f32.mrb[18].mxu1  ;;  %v2823_v19 = vpop.f32.mrb[19].mxu0 }
 0x24e   :  { %v9833_v20 = vsel %vm3755_vm2, %v7870_v6, %v3787_v51  ;;  %v7887_v40 = vadd.f32 %v3707_v59, %v1926_v22  ;;  %v7872_v28 = vadd.f32 %v2823_v19, %v1926_v22  ;;  %v3709_v25 = vpop.f32.mrb[19].mxu1  ;;  %vm3757_vm4 = vcmp.gt.f32.partialorder %v7886_v33, 0.0 }
 0x24f   :  { %vm3758_vm5 = vcmp.gt.f32.partialorder %v7871_v2, 0.0  ;;  %v3790_v44 = vmul.f32 0.2, %v7871_v2  ;;  %v7888_v9 = vadd.f32 %v3709_v25, %v1926_v22  ;;  %v3850_v62 = vmax.f32 %v9831_v46, %v9833_v20 }
 0x250   :  { %vm3759_vm6 = vcmp.gt.f32.partialorder %v7872_v28, 0.0  ;;  %v3791_v5 = vmul.f32 0.2, %v7872_v28  ;;  %v9838_v32 = vsel %vm3756_vm3, %v7885_v57, %v3788_v50  ;;  %vm3760_vm7 = vcmp.gt.f32.partialorder %v7887_v40, 0.0  ;;  %v2828_v48 = vpop.f32.mrb[20].mxu0 }
 0x251   :  { %v3792_v58 = vmul.f32 0.2, %v7887_v40  ;;  %v3714_v26 = vpop.f32.mrb[20].mxu1  ;;  %v9840_v52 = vsel %vm3757_vm4, %v7886_v33, %v3789_v13  ;;  %v3851_v29 = vmax.f32 %v3850_v62, %v9838_v32  ;;  %v9843_v55 = vsel %vm3758_vm5, %v7871_v2, %v3790_v44  ;;  %v2830_v39 = vpop.f32.mrb[21].mxu0 }
 0x252   :  { %v9845_v21 = vsel %vm3759_vm6, %v7872_v28, %v3791_v5  ;;  %v7873_v8 = vadd.f32 %v2828_v48, %v1931_v10  ;;  %v7889_v6 = vadd.f32 %v3714_v26, %v1931_v10  ;;  %v3716_v22 = vpop.f32.mrb[21].mxu1  ;;  %v3793_v51 = vmul.f32 0.2, %v7888_v9  ;;  %v1936_v33 = vpop.permute.xlu1 %1935 }
 0x253   :  { %v7874_v15 = vadd.f32 %v2830_v39, %v1931_v10  ;;  %v7890_v57 = vadd.f32 %v3716_v22, %v1931_v10  ;;  %v3852_v50 = vmax.f32 %v3851_v29, %v9840_v52  ;;  %vm3761_vm9 = vcmp.gt.f32.partialorder %v7888_v9, 0.0 }
 0x254   :  { %vm3762_vm8 = vcmp.gt.f32.partialorder %v7873_v8, 0.0  ;;  %v3794_v59 = vmul.f32 0.2, %v7873_v8  ;;  %v3796_v19 = vmul.f32 0.2, %v7889_v6  ;;  %vm3764_vm10 = vcmp.gt.f32.partialorder %v7889_v6, 0.0 }
 0x255   :  { %v3795_v13 = vmul.f32 0.2, %v7874_v15  ;;  %v3797_v2 = vmul.f32 0.2, %v7890_v57  ;;  %v2835_v25 = vpop.f32.mrb[22].mxu0  ;;  %3853 = vmax.xlane.f32.xlu0 %v3852_v50  ;;  %v3855_v28 = vmax.f32 %v9843_v55, %v9845_v21  ;;  %vm3763_vm11 = vcmp.gt.f32.partialorder %v7874_v15, 0.0 }
 0x256   :  { %v7875_v44 = vadd.f32 %v2835_v25, %v1936_v33  ;;  %v3721_v62 = vpop.f32.mrb[22].mxu1  ;;  %v2837_v5 = vpop.f32.mrb[23].mxu0  ;;  %v9851_v10 = vsel %vm3760_vm7, %v7887_v40, %v3792_v58  ;;  %vm3765_vm12 = vcmp.gt.f32.partialorder %v7890_v57, 0.0  ;;  %v9854_v39 = vsel %vm3761_vm9, %v7888_v9, %v3793_v51 }
 0x257   :  { %v7891_v48 = vadd.f32 %v3721_v62, %v1936_v33  ;;  %v7876_v26 = vadd.f32 %v2837_v5, %v1936_v33  ;;  %v3723_v29 = vpop.f32.mrb[23].mxu1  ;;  %v3856_v22 = vmax.f32 %v3855_v28, %v9851_v10  ;;  %v9858_v50 = vsel %vm3762_vm8, %v7873_v8, %v3794_v59  ;;  %v1941_v40 = vpop.permute.xlu0 %1940 }
 0x258   :  { %v3798_v4 = vmul.f32 0.2, %v7875_v44  ;;  %v7892_v60 = vadd.f32 %v3723_v29, %v1936_v33  ;;  %v2842_v25 = vpop.f32.mrb[24].mxu0  ;;  %v9861_v3 = vsel %vm3764_vm10, %v7889_v6, %v3796_v19  ;;  %v9864_v58 = vsel %vm3763_vm11, %v7874_v15, %v3795_v13 }
 0x259   :  { %v3728_v43 = vpop.f32.mrb[24].mxu1  ;;  %vm3766_vm13 = vcmp.gt.f32.partialorder %v7875_v44, 0.0  ;;  %v3799_v62 = vmul.f32 0.2, %v7876_v26  ;;  %v9867_v9 = vsel %vm3765_vm12, %v7890_v57, %v3797_v2  ;;  %vm3768_vm14 = vcmp.gt.f32.partialorder %v7891_v48, 0.0  ;;  %v2844_v59 = vpop.f32.mrb[25].mxu0 }
 0x25a   :  { %vm3767_vm15 = vcmp.gt.f32.partialorder %v7876_v26, 0.0  ;;  %v7877_v8 = vadd.f32 %v2842_v25, %v1941_v40  ;;  %v9869_v51 = vadd.f32 %v3728_v43, %v1941_v40  ;;  %v3730_v33 = vpop.f32.mrb[25].mxu1  ;;  %v3800_v28 = vmul.f32 0.2, %v7891_v48  ;;  %v1946_v57 = vpop.permute.xlu1 %1945 }
 0x25b   :  { %v7878_v5 = vadd.f32 %v2844_v59, %v1941_v40  ;;  %v9871_v6 = vadd.f32 %v3730_v33, %v1941_v40  ;;  %v3857_v19 = vmax.f32 %v3856_v22, %v9854_v39  ;;  %v9874_v15 = vsel %vm3766_vm13, %v7875_v44, %v3798_v4  ;;  %v1951_v34 = vpop.permute.xlu0 %1950 }
 0x25c   :  { %v3801_v13 = vmul.f32 0.2, %v7892_v60  ;;  %vm3770_vm1 = vcmp.gt.f32.partialorder %v7877_v8, 0.0  ;;  %v3802_v29 = vmul.f32 0.2, %v7877_v8  ;;  %v9876_v2 = vsel %vm3767_vm15, %v7876_v26, %v3799_v62  ;;  %v2849_v53 = vpop.f32.mrb[26].mxu0 }
 0x25d   :  { %v9879_v25 = vmul.f32 0.2, %v9869_v51  ;;  %v3803_v43 = vmul.f32 0.2, %v7878_v5  ;;  %3858 = vmax.xlane.f32.xlu1 %v3857_v19  ;;  %v3860_v40 = vmax.f32 %v9858_v50, %v9864_v58  ;;  %vm3772_vm2 = vcmp.gt.f32.partialorder %v9869_v51, 0.0  ;;  %v3735_v22 = vpop.f32.mrb[26].mxu1 }
 0x25e   :  { %vm3771_vm3 = vcmp.gt.f32.partialorder %v7878_v5, 0.0  ;;  %v9885_v4 = vmul.f32 0.2, %v9871_v6  ;;  %v7879_v44 = vadd.f32 %v2849_v53, %v1946_v57  ;;  %v2851_v59 = vpop.f32.mrb[27].mxu0  ;;  %vm3769_vm4 = vcmp.gt.f32.partialorder %v7892_v60, 0.0  ;;  %v3737_v19 = vpop.f32.mrb[27].mxu1 }
 0x25f   :  { %v9888_v26 = vsel %vm3770_vm1, %v7877_v8, %v3802_v29  ;;  %v9890_v62 = vadd.f32 %v3735_v22, %v1946_v57  ;;  %v7880_v33 = vadd.f32 %v2851_v59, %v1946_v57  ;;  %v3861_v49 = vmax.f32 %v3860_v40, %v9861_v3 }
 0x260   :  { %vm3774_vm5 = vcmp.gt.f32.partialorder %v7879_v44, 0.0  ;;  %v3806_v1 = vmul.f32 0.2, %v7879_v44  ;;  %v9893_v47 = vadd.f32 %v3737_v19, %v1946_v57  ;;  %v2856_v7 = vpop.f32.mrb[28].mxu0  ;;  %v9896_v53 = vsel %vm3768_vm14, %v7891_v48, %v3800_v28 }
 0x261   :  { %v3742_v31 = vpop.f32.mrb[28].mxu1  ;;  %v9899_v38 = vsel %vm3771_vm3, %v7878_v5, %v3803_v43  ;;  %vm3776_vm6 = vcmp.gt.f32.partialorder %v9890_v62, 0.0  ;;  %v3807_v8 = vmul.f32 0.2, %v7880_v33  ;;  %v9903_v29 = vsel %vm3769_vm4, %v7892_v60, %v3801_v13  ;;  %v2858_v59 = vpop.f32.mrb[29].mxu0 }
 0x262   :  { %v3808_v40 = vmul.f32 0.2, %v9890_v62  ;;  %vm3775_vm7 = vcmp.gt.f32.partialorder %v7880_v33, 0.0  ;;  %v3862_v57 = vmax.f32 %v3861_v49, %v9867_v9  ;;  %v7881_v22 = vadd.f32 %v2856_v7, %v1951_v34  ;;  %v3744_v19 = vpop.f32.mrb[29].mxu1  ;;  %v1956_v49 = vpop.permute.xlu1 %1955 }
 0x263   :  { %v9908_v48 = vsel %vm3774_vm5, %v7879_v44, %v3806_v1  ;;  %v3809_v28 = vmul.f32 0.2, %v9893_v47  ;;  %v7897_v5 = vadd.f32 %v3742_v31, %v1951_v34  ;;  %v7882_v43 = vadd.f32 %v2858_v59, %v1951_v34 }
 0x264   :  { %3863 = vmax.xlane.f32.xlu0 %v3862_v57  ;;  %vm3778_vm8 = vcmp.gt.f32.partialorder %v7881_v22, 0.0  ;;  %v3810_v36 = vmul.f32 0.2, %v7881_v22  ;;  %v7898_v60 = vadd.f32 %v3744_v19, %v1951_v34  ;;  %v3865_v13 = vmax.f32 %v9874_v15, %v9876_v2  ;;  %v2863_v27 = vpop.f32.mrb[30].mxu0 }
 0x265   :  { %v3749_v63 = vpop.f32.mrb[30].mxu1  ;;  %v9914_v7 = vsel %vm3775_vm7, %v7880_v33, %v3807_v8  ;;  %vm3780_vm9 = vcmp.gt.f32.partialorder %v7897_v5, 0.0  ;;  %v3811_v1 = vmul.f32 0.2, %v7882_v43  ;;  %vm3773_vm10 = vcmp.gt.f32.partialorder %v9871_v6, 0.0  ;;  %v2865_v59 = vpop.f32.mrb[31].mxu0 }
 0x266   :  { %v3812_v44 = vmul.f32 0.2, %v7897_v5  ;;  %vm3779_vm11 = vcmp.gt.f32.partialorder %v7882_v43, 0.0  ;;  %v3866_v31 = vmax.f32 %v3865_v13, %v9896_v53  ;;  %v7883_v57 = vadd.f32 %v2863_v27, %v1956_v49  ;;  %v3751_v34 = vpop.f32.mrb[31].mxu1 }
 0x267   :  { %v9919_v19 = vsel %vm3778_vm8, %v7881_v22, %v3810_v36  ;;  %v7899_v0 = vadd.f32 %v3749_v63, %v1956_v49  ;;  %v7884_v18 = vadd.f32 %v2865_v59, %v1956_v49  ;;  %v7900_v11 = vadd.f32 %v3751_v34, %v1956_v49  ;;  %v4043_v59 = vld [vmem:[%s11616_s5 + $0x1c8] sm:$0xff] }
 0x268   :  { %v3813_v17 = vmul.f32 0.2, %v7898_v60  ;;  %v3867_v33 = vmax.f32 %v3866_v31, %v9903_v29  ;;  %vm3782_vm12 = vcmp.gt.f32.partialorder %v7883_v57, 0.0  ;;  %v3814_v8 = vmul.f32 0.2, %v7883_v57  ;;  %v4027_v34 = vld [vmem:[%s11616_s5 + $0x148] sm:$0xff] }
 0x269   :  { %v9922_v56 = vsel %vm3779_vm11, %v7882_v43, %v3811_v1  ;;  %vm3783_vm13 = vcmp.gt.f32.partialorder %v7884_v18, 0.0  ;;  %v3815_v12 = vmul.f32 0.2, %v7884_v18  ;;  %v9928_v27 = vsel %vm3772_vm2, %v9869_v51, %v9879_v25  ;;  %v4010_v51 = vld [vmem:[%s11616_s5 + $0xc0] sm:$0xff]  ;;  %v4011_v25 = vld [vmem:[%s11616_s5 + $0xc8] sm:$0xff] }
 0x26a   :  { %3868 = vmax.xlane.f32.xlu0 %v3867_v33  ;;  %v9930_v36 = vsel %vm3782_vm12, %v7883_v57, %v3814_v8  ;;  %vm3784_vm14 = vcmp.gt.f32.partialorder %v7899_v0, 0.0  ;;  %v3816_v63 = vmul.f32 0.2, %v7899_v0  ;;  %v3870_v22 = vmax.f32 %v9888_v26, %v9899_v38  ;;  %v4042_v57 = vld [vmem:[%s11616_s5 + $0x1c0] sm:$0xff] }
 0x26b   :  { %v9934_v13 = vsel %vm3783_vm13, %v7884_v18, %v3815_v12  ;;  %v3817_v43 = vmul.f32 0.2, %v7900_v11  ;;  %vm3777_vm15 = vcmp.gt.f32.partialorder %v9893_v47, 0.0  ;;  %v3875_v49 = vmax.f32 %v9908_v48, %v9914_v7 }
 0x26c   :  { %v9949_v12 = vsel %vm3773_vm10, %v9871_v6, %v9885_v4  ;;  %v3871_v18 = vmax.f32 %v3870_v22, %v9928_v27  ;;  %v9955_v1 = vsel %vm3776_vm6, %v9890_v62, %v3808_v40  ;;  %v9958_v31 = vsel %vm3777_vm15, %v9893_v47, %v3809_v28  ;;  %v3994_v6 = vld [vmem:[%s11616_s5 + $0x40] sm:$0xff]  ;;  %v3995_v40 = vld [vmem:[%s11616_s5 + $0x48] sm:$0xff] }
 0x26d   :  { %v3876_v4 = vmax.f32 %v3875_v49, %v9955_v1  ;;  %vm3781_vm1 = vcmp.gt.f32.partialorder %v7898_v60, 0.0  ;;  %v9971_v62 = vsel %vm3780_vm9, %v7897_v5, %v3812_v44  ;;  %v3880_v47 = vmax.f32 %v9919_v19, %v9922_v56  ;;  %v4026_v28 = vld [vmem:[%s11616_s5 + $0x140] sm:$0xff] }
 0x26e   :  { %v3872_v33 = vmax.f32 %v3871_v18, %v9949_v12  ;;  %vm3785_vm2 = vcmp.gt.f32.partialorder %v7900_v11, 0.0  ;;  %v9986_v5 = vsel %vm3784_vm14, %v7899_v0, %v3816_v63  ;;  %v3885_v44 = vmax.f32 %v9930_v36, %v9934_v13  ;;  %v4012_v0 = vld [vmem:[%s11616_s5 + $0xd0] sm:$0xff]  ;;  %v4013_v63 = vld [vmem:[%s11616_s5 + $0xd8] sm:$0xff] }
 0x26f   :  { %v3877_v8 = vmax.f32 %v3876_v4, %v9958_v31  ;;  %v3881_v22 = vmax.f32 %v3880_v47, %v9971_v62  ;;  %v7549_v49 = vpack.c.bf16 %v4011_v25, %v4010_v51  ;;  %v7581_v45 = vpack.c.bf16 %v4043_v59, %v4042_v57  ;;  %v4044_v51 = vld [vmem:[%s11616_s5 + $0x1d0] sm:$0xff]  ;;  %v4045_v57 = vld [vmem:[%s11616_s5 + $0x1d8] sm:$0xff] }
 0x270   :  { %3873 = vmax.xlane.f32.xlu1 %v3872_v33  ;;  %v9992_v42 = vsel %vm3781_vm1, %v7898_v60, %v3813_v17  ;;  %v3886_v61 = vmax.f32 %v3885_v44, %v9986_v5  ;;  %v7551_v41 = vpack.c.bf16 %v3995_v40, %v3994_v6  ;;  %v7583_v18 = vpack.c.bf16 %v4027_v34, %v4026_v28  ;;  %v3996_v59 = vld [vmem:[%s11616_s5 + $0x50] sm:$0xff]  ;;  %v3997_v6 = vld [vmem:[%s11616_s5 + $0x58] sm:$0xff]  ;;  %v4047_v33 = vld [vmem:[%s11616_s5 + $0x1e8] sm:$0xff] }
 0x271   :  { %3878 = vmax.xlane.f32.xlu0 %v3877_v8  ;;  %v3882_v17 = vmax.f32 %v3881_v22, %v9992_v42  ;;  %v10006_v60 = vsel %vm3785_vm2, %v7900_v11, %v3817_v43  ;;  %7550 = vmatprep.subr.bf16.mxu0 %v7549_v49  ;;  %v7553_v25 = vpack.c.bf16 %v4013_v63, %v4012_v0  ;;  %v4028_v47 = vld [vmem:[%s11616_s5 + $0x150] sm:$0xff]  ;;  %v4029_v40 = vld [vmem:[%s11616_s5 + $0x158] sm:$0xff]  ;;  %v3998_v44 = vld [vmem:[%s11616_s5 + $0x60] sm:$0xff] }
 0x272   :  { %v3887_v4 = vmax.f32 %v3886_v61, %v10006_v60  ;;  %7582 = vmatprep.subr.bf16.mxu1 %v7581_v45  ;;  %7552 = vmatpush3.bf16.msra.mxu0 %v7551_v41  ;;  %v7585_v11 = vpack.c.bf16 %v4045_v57, %v4044_v51  ;;  %v7555_v43 = vpack.c.bf16 %v3997_v6, %v3996_v59  ;;  %v4014_v45 = vld [vmem:[%s11616_s5 + $0xe0] sm:$0xff]  ;;  %v4015_v41 = vld [vmem:[%s11616_s5 + $0xe8] sm:$0xff]  ;;  %v4016_v51 = vld [vmem:[%s11616_s5 + $0xf0] sm:$0xff] }
 0x273   :  { %7584 = vmatpush3.bf16.msra.mxu1 %v7583_v18  ;;  %7554 = vmatprep.subr.bf16.mxu0 %v7553_v25  ;;  %v7587_v28 = vpack.c.bf16 %v4029_v40, %v4028_v47  ;;  %v4046_v61 = vld [vmem:[%s11616_s5 + $0x1e0] sm:$0xff]  ;;  %v7557_v34 = vpack.c.bf16 %v4015_v41, %v4014_v45  ;;  %v3999_v8 = vld [vmem:[%s11616_s5 + $0x68] sm:$0xff]  ;;  %v4048_v25 = vld [vmem:[%s11616_s5 + $0x1f0] sm:$0xff] }
 0x274   :  { %3883 = vmax.xlane.f32.xlu1 %v3882_v17  ;;  %7586 = vmatprep.subr.bf16.mxu1 %v7585_v11  ;;  %v7589_v22 = vpack.c.bf16 %v4047_v33, %v4046_v61  ;;  %v7559_v49 = vpack.c.bf16 %v3999_v8, %v3998_v44  ;;  %v4030_v18 = vld [vmem:[%s11616_s5 + $0x160] sm:$0xff]  ;;  %v4031_v0 = vld [vmem:[%s11616_s5 + $0x168] sm:$0xff]  ;;  %v4017_v17 = vld [vmem:[%s11616_s5 + $0xf8] sm:$0xff] }
 0x275   :  { %3888 = vmax.xlane.f32.xlu0 %v3887_v4  ;;  %v7591_v63 = vpack.c.bf16 %v4031_v0, %v4030_v18  ;;  %v7561_v57 = vpack.c.bf16 %v4017_v17, %v4016_v51  ;;  %v4049_v59 = vld [vmem:[%s11616_s5 + $0x1f8] sm:$0xff]  ;;  %v4000_v6 = vld [vmem:[%s11616_s5 + $0x70] sm:$0xff]  ;;  %v57_v45 = vld [vmem:[%s11613_s2] sm:$0xff] }
 0x276   :  { %7556 = vmatpush3.bf16.msra.mxu0 %v7555_v43  ;;  %v4001_v4 = vld [vmem:[%s11616_s5 + $0x78] sm:$0xff]  ;;  %v7593_v11 = vpack.c.bf16 %v4049_v59, %v4048_v25  ;;  %v4032_v47 = vld [vmem:[%s11616_s5 + $0x170] sm:$0xff]  ;;  %v58_v61 = vld [vmem:[%s11613_s2 + $0x8] sm:$0xff] }
 0x277   :  { %7588 = vmatpush3.bf16.msra.mxu1 %v7587_v28  ;;  %7558 = vmatprep.subr.bf16.mxu0 %v7557_v34  ;;  %v7563_v43 = vpack.c.bf16 %v4001_v4, %v4000_v6  ;;  %v4033_v40 = vld [vmem:[%s11616_s5 + $0x178] sm:$0xff]  ;;  %v59_v41 = vld [vmem:[%s11613_s2 + $0x10] sm:$0xff]  ;;  %v61_v33 = vld [vmem:[%s11613_s2 + $0x20] sm:$0xff] }
 0x278   :  { %7590 = vmatprep.subr.bf16.mxu1 %v7589_v22  ;;  %v7595_v28 = vpack.c.bf16 %v4033_v40, %v4032_v47  ;;  %v60_v34 = vld [vmem:[%s11613_s2 + $0x18] sm:$0xff]  ;;  %v62_v44 = vld [vmem:[%s11613_s2 + $0x28] sm:$0xff]  ;;  %v63_v8 = vld [vmem:[%s11613_s2 + $0x30] sm:$0xff] }
 0x279   :  { %v64_v22 = vld [vmem:[%s11613_s2 + $0x38] sm:$0xff]  ;;  %v4265_v18 = vld [vmem:[%s11617_s6 + $0x28] sm:$0xff] }
 0x27a   :  { %7560 = vmatpush3.bf16.msra.mxu0 %v7559_v49  ;;  %v4261_v49 = vld [vmem:[%s11617_s6 + $0x8] sm:$0xff]  ;;  %v4263_v0 = vld [vmem:[%s11617_s6 + $0x18] sm:$0xff] }
 0x27b   :  { %7592 = vmatpush3.bf16.msra.mxu1 %v7591_v63  ;;  %7562 = vmatprep.subr.bf16.mxu0 %v7561_v57  ;;  %v7597_v63 = vpack.c.bf16 %v4265_v18, %v4261_v49  ;;  %v4267_v51 = vld [vmem:[%s11617_s6 + $0x38] sm:$0xff] }
 0x27c   :  { %7594 = vmatprep.subr.bf16.mxu1 %v7593_v11  ;;  %v7605_v17 = vpack.c.bf16 %v4267_v51, %v4263_v0  ;;  %v4271_v0 = vld [vmem:[%s11617_s6 + $0x58] sm:$0xff] }
 0x27e   :  { %7564 = vmatpush3.bf16.msra.mxu0 %v7563_v43 }
 0x27f   :  { %7596 = vmatpush3.bf16.msra.mxu1 %v7595_v28  ;;  %7598 = vmatprep.subr.bf16.mxu0 %v7597_v63  ;;  %v4275_v63 = vld [vmem:[%s11617_s6 + $0x78] sm:$0xff] }
 0x280   :  { %7606 = vmatprep.subr.bf16.mxu1 %v7605_v17 }
 0x285   :  { %67 = vperm.xlu1 %8387, %v57_v45  }
 0x289   :  { %77 = vperm.xlu1 %8387, %v59_v41  }
 0x28b   :  { %72 = vperm.xlu0 %8386, %v58_v61  }
 0x28d   :  { %82 = vperm.xlu1 %8387, %v60_v34  }
 0x28f   :  { %87 = vperm.xlu0 %8386, %v61_v33  }
 0x291   :  { %92 = vperm.xlu1 %8387, %v62_v44   ;;  %v4264_v44 = vld [vmem:[%s11617_s6 + $0x20] sm:$0xff] }
 0x293   :  { %97 = vperm.xlu0 %8386, %v63_v8  }
 0x295   :  { %102 = vperm.xlu1 %8387, %v64_v22  }
 0x2e2   :  { %v3854_v25 = vpop.xlane.xlu0 %3853 }
 0x2e3   :  { %v3890_v57 = vsub.f32 %v9831_v46, %v3854_v25  ;;  %v3891_v59 = vsub.f32 %v9833_v20, %v3854_v25  ;;  %v3892_v6 = vsub.f32 %v9838_v32, %v3854_v25  ;;  %v3893_v4 = vsub.f32 %v9840_v52, %v3854_v25  ;;  %v4260_v32 = vld [vmem:[%s11617_s6] sm:$0xff] }
 0x2e4   :  { %v7599_v49 = vpack.c.bf16 %v4264_v44, %v4260_v32 }
 0x2e5   :  { %v3922_v11 = vmul.f32 1.442695, %v3890_v57  ;;  %v3924_v43 = vmul.f32 1.442695, %v3891_v59  ;;  %v3926_v47 = vmul.f32 1.442695, %v3892_v6 }
 0x2e6   :  { %v3928_v40 = vmul.f32 1.442695, %v3893_v4  ;;  %v4268_v59 = vld [vmem:[%s11617_s6 + $0x40] sm:$0xff] }
 0x2e7   :  { %8388 = vpow2.f32 %v3922_v11  ;;  %v4272_v6 = vld [vmem:[%s11617_s6 + $0x60] sm:$0xff] }
 0x2e8   :  { %8390 = vpow2.f32 %v3924_v43 }
 0x2e9   :  { %8392 = vpow2.f32 %v3926_v47 }
 0x2ea   :  { %8394 = vpow2.f32 %v3928_v40  ;;  %v3859_v28 = vpop.xlane.xlu1 %3858 }
 0x2eb   :  { %v3894_v45 = vsub.f32 %v9843_v55, %v3859_v28  ;;  %v3895_v41 = vsub.f32 %v9845_v21, %v3859_v28  ;;  %v3896_v46 = vsub.f32 %v9851_v10, %v3859_v28  ;;  %v3897_v20 = vsub.f32 %v9854_v39, %v3859_v28  ;;  %v4269_v55 = vld [vmem:[%s11617_s6 + $0x48] sm:$0xff]  ;;  %v4262_v10 = vld [vmem:[%s11617_s6 + $0x10] sm:$0xff] }
 0x2ec   :  { %v4273_v21 = vld [vmem:[%s11617_s6 + $0x68] sm:$0xff]  ;;  %v4266_v39 = vld [vmem:[%s11617_s6 + $0x30] sm:$0xff] }
 0x2ed   :  { %v3930_v52 = vmul.f32 1.442695, %v3894_v45  ;;  %v3932_v61 = vmul.f32 1.442695, %v3895_v41  ;;  %v3934_v34 = vmul.f32 1.442695, %v3896_v46  ;;  %v7601_v18 = vpack.c.bf16 %v4273_v21, %v4269_v55 }
 0x2ee   :  { %v3936_v33 = vmul.f32 1.442695, %v3897_v20  ;;  %v7607_v43 = vpack.c.bf16 %v4266_v39, %v4262_v10  ;;  %v7609_v45 = vpack.c.bf16 %v4275_v63, %v4271_v0  ;;  %v7603_v41 = vpack.c.bf16 %v4272_v6, %v4268_v59 }
 0x2ef   :  { %8396 = vpow2.f32 %v3930_v52 }
 0x2f0   :  { %8398 = vpow2.f32 %v3932_v61 }
 0x2f1   :  { %v10134_v8 = vpop.eup %8388  ;;  %8400 = vpow2.f32 %v3934_v34  ;;  %v3864_v22 = vpop.xlane.xlu0 %3863 }
 0x2f2   :  { %v10142_v51 = vpop.eup %8390  ;;  %8402 = vpow2.f32 %v3936_v33  ;;  %v3898_v17 = vsub.f32 %v9858_v50, %v3864_v22  ;;  %v3899_v25 = vsub.f32 %v9864_v58, %v3864_v22  ;;  %v3900_v57 = vsub.f32 %v9861_v3, %v3864_v22  ;;  %v4270_v50 = vld [vmem:[%s11617_s6 + $0x50] sm:$0xff] }
 0x2f3   :  { %v10153_v4 = vpop.eup %8392  ;;  %v3901_v11 = vsub.f32 %v9867_v9, %v3864_v22  ;;  %4114 = vmatprep.mubr.f32.mxu0 %v10142_v51  ;;  %v4274_v3 = vld [vmem:[%s11617_s6 + $0x70] sm:$0xff] }
 0x2f4   :  { %v10163_v58 = vpop.eup %8394  ;;  %v3938_v47 = vmul.f32 1.442695, %v3898_v17  ;;  %v3940_v40 = vmul.f32 1.442695, %v3899_v25  ;;  %v3942_v28 = vmul.f32 1.442695, %v3900_v57  ;;  %4115 = vmatmul.mubr.f32.vlgmr.msra.gmra.mrb[32].mxu0 %v10134_v8  ;;  %v7611_v20 = vpack.c.bf16 %v4274_v3, %v4270_v50 }
 0x2f5   :  { %v3944_v9 = vmul.f32 1.442695, %v3901_v11  ;;  %4219 = vmatprep.mubr.f32.mxu1 %v10163_v58  ;;  %7600 = vmatpush1.bf16.msra.mxu0 %v7599_v49 }
 0x2f6   :  { %8404 = vpow2.f32 %v3938_v47  ;;  %4220 = vmatmul.mubr.f32.vlgmr.msra.gmra.mrb[32].mxu1 %v10153_v4  ;;  %7602 = vmatprep.subr.bf16.mxu0 %v7601_v18 }
 0x2f7   :  { %8406 = vpow2.f32 %v3940_v40  ;;  %v3869_v46 = vpop.xlane.xlu0 %3868  ;;  %7608 = vmatpush1.bf16.msra.mxu1 %v7607_v43 }
 0x2f8   :  { %8408 = vpow2.f32 %v3942_v28  ;;  %v3902_v32 = vsub.f32 %v9874_v15, %v3869_v46  ;;  %v3903_v52 = vsub.f32 %v9876_v2, %v3869_v46  ;;  %v3904_v61 = vsub.f32 %v9896_v53, %v3869_v46  ;;  %7610 = vmatprep.subr.bf16.mxu1 %v7609_v45 }
 0x2f9   :  { %v10171_v34 = vpop.eup %8396  ;;  %8410 = vpow2.f32 %v3944_v9  ;;  %v3905_v33 = vsub.f32 %v9903_v29, %v3869_v46  ;;  %7604 = vmatpush1.bf16.msra.mxu0 %v7603_v41 }
 0x2fa   :  { %v10174_v44 = vpop.eup %8398  ;;  %v3946_v55 = vmul.f32 1.442695, %v3902_v32  ;;  %v3948_v21 = vmul.f32 1.442695, %v3903_v52  ;;  %v3950_v10 = vmul.f32 1.442695, %v3904_v61 }
 0x2fb   :  { %v10176_v39 = vpop.eup %8400  ;;  %v3952_v22 = vmul.f32 1.442695, %v3905_v33  ;;  %4119 = vmatprep.mubr.f32.mxu0 %v10174_v44  ;;  %7612 = vmatpush1.bf16.msra.mxu1 %v7611_v20 }
 0x2fc   :  { %v10179_v15 = vpop.eup %8402  ;;  %8412 = vpow2.f32 %v3946_v55  ;;  %4120 = vmatmul.mubr.f32.gmra.mrb[34].mxu0 %v10171_v34 }
 0x2fd   :  { %8414 = vpow2.f32 %v3948_v21  ;;  %v3874_v2 = vpop.xlane.xlu1 %3873  ;;  %4224 = vmatprep.mubr.f32.mxu1 %v10179_v15 }
 0x2fe   :  { %8416 = vpow2.f32 %v3950_v10  ;;  %v3906_v53 = vsub.f32 %v9888_v26, %v3874_v2  ;;  %v3907_v29 = vsub.f32 %v9899_v38, %v3874_v2  ;;  %v3908_v49 = vsub.f32 %v9928_v27, %v3874_v2  ;;  %v3879_v18 = vpop.xlane.xlu0 %3878  ;;  %4225 = vmatmul.mubr.f32.gmra.mrb[34].mxu1 %v10176_v39 }
 0x2ff   :  { %8418 = vpow2.f32 %v3952_v22  ;;  %v3909_v0 = vsub.f32 %v9949_v12, %v3874_v2  ;;  %v3910_v63 = vsub.f32 %v9908_v48, %v3879_v18  ;;  %v3911_v17 = vsub.f32 %v9914_v7, %v3879_v18 }
 0x300   :  { %v10190_v25 = vpop.eup %8404  ;;  %v3954_v57 = vmul.f32 1.442695, %v3906_v53  ;;  %v3956_v59 = vmul.f32 1.442695, %v3907_v29  ;;  %v3958_v6 = vmul.f32 1.442695, %v3908_v49  ;;  %v3912_v26 = vsub.f32 %v9955_v1, %v3879_v18 }
 0x301   :  { %v10193_v38 = vpop.eup %8406  ;;  %v3960_v27 = vmul.f32 1.442695, %v3909_v0  ;;  %v3913_v11 = vsub.f32 %v9958_v31, %v3879_v18  ;;  %v3884_v43 = vpop.xlane.xlu1 %3883  ;;  %v3962_v12 = vmul.f32 1.442695, %v3910_v63  ;;  %v3964_v3 = vmul.f32 1.442695, %v3911_v17 }
 0x302   :  { %v10196_v50 = vpop.eup %8408  ;;  %8420 = vpow2.f32 %v3954_v57  ;;  %v3914_v48 = vsub.f32 %v9919_v19, %v3884_v43  ;;  %4124 = vmatprep.mubr.f32.mxu0 %v10193_v38  ;;  %v3915_v1 = vsub.f32 %v9922_v56, %v3884_v43  ;;  %v3889_v47 = vpop.xlane.xlu0 %3888  ;;  %v3966_v31 = vmul.f32 1.442695, %v3912_v26 }
 0x303   :  { %v10200_v7 = vpop.eup %8410  ;;  %8422 = vpow2.f32 %v3956_v59  ;;  %4125 = vmatmul.mubr.f32.gmra.mrb[36].mxu0 %v10190_v25  ;;  %v3916_v40 = vsub.f32 %v9971_v62, %v3884_v43  ;;  %v3968_v28 = vmul.f32 1.442695, %v3913_v11  ;;  %v3917_v19 = vsub.f32 %v9992_v42, %v3884_v43 }
 0x304   :  { %8424 = vpow2.f32 %v3958_v6  ;;  %4229 = vmatprep.mubr.f32.mxu1 %v10200_v7  ;;  %v3970_v9 = vmul.f32 1.442695, %v3914_v48  ;;  %v3918_v56 = vsub.f32 %v9930_v36, %v3889_v47  ;;  %v3972_v46 = vmul.f32 1.442695, %v3915_v1 }
 0x305   :  { %8426 = vpow2.f32 %v3960_v27  ;;  %4230 = vmatmul.mubr.f32.gmra.mrb[36].mxu1 %v10196_v50  ;;  %v3919_v62 = vsub.f32 %v9934_v13, %v3889_v47  ;;  %v3974_v32 = vmul.f32 1.442695, %v3916_v40  ;;  %v3920_v42 = vsub.f32 %v9986_v5, %v3889_v47 }
 0x306   :  { %v10208_v45 = vpop.eup %8412  ;;  %8428 = vpow2.f32 %v3962_v12  ;;  %v3976_v61 = vmul.f32 1.442695, %v3917_v19  ;;  %v3921_v36 = vsub.f32 %v10006_v60, %v3889_v47  ;;  %v3978_v13 = vmul.f32 1.442695, %v3918_v56 }
 0x307   :  { %v10211_v41 = vpop.eup %8414  ;;  %8430 = vpow2.f32 %v3964_v3  ;;  %v3980_v33 = vmul.f32 1.442695, %v3919_v62  ;;  %v3982_v5 = vmul.f32 1.442695, %v3920_v42 }
 0x308   :  { %v10214_v20 = vpop.eup %8416  ;;  %8432 = vpow2.f32 %v3966_v31  ;;  %4129 = vmatprep.mubr.f32.mxu0 %v10211_v41  ;;  %v3984_v10 = vmul.f32 1.442695, %v3921_v36 }
 0x309   :  { %v10218_v52 = vpop.eup %8418  ;;  %8434 = vpow2.f32 %v3968_v28  ;;  %4130 = vmatmul.mubr.f32.gmra.mrb[38].mxu0 %v10208_v45 }
 0x30a   :  { %8436 = vpow2.f32 %v3970_v9  ;;  %4234 = vmatprep.mubr.f32.mxu1 %v10218_v52 }
 0x30b   :  { %8438 = vpow2.f32 %v3972_v46  ;;  %4235 = vmatmul.mubr.f32.gmra.mrb[38].mxu1 %v10214_v20 }
 0x30c   :  { %v10224_v55 = vpop.eup %8420  ;;  %8440 = vpow2.f32 %v3974_v32 }
 0x30d   :  { %v10226_v21 = vpop.eup %8422  ;;  %8442 = vpow2.f32 %v3976_v61 }
 0x30e   :  { %v10228_v22 = vpop.eup %8424  ;;  %8444 = vpow2.f32 %v3978_v13  ;;  %4134 = vmatprep.mubr.f32.mxu0 %v10226_v21 }
 0x30f   :  { %v10231_v60 = vpop.eup %8426  ;;  %8446 = vpow2.f32 %v3980_v33  ;;  %4135 = vmatmul.mubr.f32.gmra.mrb[40].mxu0 %v10224_v55 }
 0x310   :  { %v10234_v2 = vpop.eup %8428  ;;  %8448 = vpow2.f32 %v3982_v5  ;;  %4239 = vmatprep.mubr.f32.mxu1 %v10231_v60 }
 0x311   :  { %v10237_v53 = vpop.eup %8430  ;;  %8450 = vpow2.f32 %v3984_v10  ;;  %4240 = vmatmul.mubr.f32.gmra.mrb[40].mxu1 %v10228_v22 }
 0x312   :  { %v10240_v29 = vpop.eup %8432  ;;  %4139 = vmatprep.mubr.f32.mxu0 %v10237_v53 }
 0x313   :  { %v10243_v49 = vpop.eup %8434  ;;  %4140 = vmatmul.mubr.f32.gmra.mrb[42].mxu0 %v10234_v2 }
 0x314   :  { %v10246_v18 = vpop.eup %8436  ;;  %4244 = vmatprep.mubr.f32.mxu1 %v10243_v49 }
 0x315   :  { %v10249_v0 = vpop.eup %8438  ;;  %4245 = vmatmul.mubr.f32.gmra.mrb[42].mxu1 %v10240_v29 }
 0x316   :  { %v10252_v63 = vpop.eup %8440  ;;  %4144 = vmatprep.mubr.f32.mxu0 %v10249_v0 }
 0x317   :  { %v10255_v17 = vpop.eup %8442  ;;  %4145 = vmatmul.mubr.f32.gmra.mrb[44].mxu0 %v10246_v18 }
 0x318   :  { %v10258_v57 = vpop.eup %8444  ;;  %4249 = vmatprep.mubr.f32.mxu1 %v10255_v17 }
 0x319   :  { %v10261_v59 = vpop.eup %8446  ;;  %4250 = vmatmul.mubr.f32.gmra.mrb[44].mxu1 %v10252_v63 }
 0x31a   :  { %v10264_v6 = vpop.eup %8448  ;;  %4149 = vmatprep.mubr.f32.mxu0 %v10261_v59 }
 0x31b   :  { %v10267_v26 = vpop.eup %8450  ;;  %4150 = vmatmul.mubr.f32.gmra.mrb[46].mxu0 %v10258_v57 }
 0x31c   :  { %4254 = vmatprep.mubr.f32.mxu1 %v10267_v26  ;;  %4364 = vmatprep.mubr.f32.mxu0 %v11755_v35 }
 0x31d   :  { %4255 = vmatmul.mubr.f32.gmra.mrb[46].mxu1 %v10264_v6 }
 0x31e   :  { %4477 = vmatprep.mubr.f32.mxu1 %v11755_v35 }
 0x3c7   :  { %v7261_v27 = vpop.f32.mrb[32].mxu0 }
 0x3c8   :  { %v7262_v11 = vpop.f32.mrb[33].mxu0 }
 0x3c9   :  { %v7317_v43 = vpop.f32.mrb[32].mxu1  ;;  %v7263_v12 = vadd.f32 %v7262_v11, %v7261_v27 }
 0x3ca   :  { %v7318_v48 = vpop.f32.mrb[33].mxu1 }
 0x3cb   :  { %v7319_v3 = vadd.f32 %v7318_v48, %v7317_v43 }
 0x3cd   :  { %v4222_v1 = vadd.f32 %v7319_v3, %v7263_v12 }
 0x3cf   :  { %v7264_v47 = vpop.f32.mrb[34].mxu0  ;;  %7165 = vmatmul.mubr.msk.f32.vlgmr.msra.gmra.mrb[48].mxu0 %vm105_vm0, %v4222_v1  ;;  %7173 = vmatmul.mubr.msk.f32.vlgmr.msra.gmra.mrb[48].mxu1 %vm105_vm0, %v4222_v1 }
 0x3d0   :  { %v7265_v31 = vpop.f32.mrb[35].mxu0  ;;  %4370 = vmatprep.mubr.f32.mxu0 %v11755_v35  ;;  %4483 = vmatprep.mubr.f32.mxu1 %v11755_v35 }
 0x3d1   :  { %v7320_v40 = vpop.f32.mrb[34].mxu1  ;;  %v7266_v28 = vadd.f32 %v7265_v31, %v7264_v47 }
 0x3d2   :  { %v7321_v19 = vpop.f32.mrb[35].mxu1 }
 0x3d3   :  { %v7322_v9 = vadd.f32 %v7321_v19, %v7320_v40 }
 0x3d5   :  { %v4227_v56 = vadd.f32 %v7322_v9, %v7266_v28 }
 0x3d6   :  { %v7267_v46 = vpop.f32.mrb[36].mxu0 }
 0x3d7   :  { %v7268_v62 = vpop.f32.mrb[37].mxu0  ;;  %7166 = vmatmul.mubr.msk.f32.gmra.mrb[50].mxu0 %vm105_vm0, %v4227_v56  ;;  %7174 = vmatmul.mubr.msk.f32.gmra.mrb[50].mxu1 %vm105_vm0, %v4227_v56 }
 0x3d8   :  { %v7323_v32 = vpop.f32.mrb[36].mxu1  ;;  %v7269_v42 = vadd.f32 %v7268_v62, %v7267_v46  ;;  %4376 = vmatprep.mubr.f32.mxu0 %v11755_v35  ;;  %4489 = vmatprep.mubr.f32.mxu1 %v11755_v35 }
 0x3d9   :  { %v7324_v61 = vpop.f32.mrb[37].mxu1 }
 0x3da   :  { %v7325_v36 = vadd.f32 %v7324_v61, %v7323_v32 }
 0x3dc   :  { %v4232_v13 = vadd.f32 %v7325_v36, %v7269_v42  ;;  %v7270_v33 = vpop.f32.mrb[38].mxu0 }
 0x3dd   :  { %v7271_v5 = vpop.f32.mrb[39].mxu0 }
 0x3de   :  { %v7326_v10 = vpop.f32.mrb[38].mxu1  ;;  %v7272_v27 = vadd.f32 %v7271_v5, %v7270_v33  ;;  %7167 = vmatmul.mubr.msk.f32.gmra.mrb[52].mxu0 %vm105_vm0, %v4232_v13  ;;  %7175 = vmatmul.mubr.msk.f32.gmra.mrb[52].mxu1 %vm105_vm0, %v4232_v13 }
 0x3df   :  { %v7327_v11 = vpop.f32.mrb[39].mxu1  ;;  %4382 = vmatprep.mubr.f32.mxu0 %v11755_v35  ;;  %4495 = vmatprep.mubr.f32.mxu1 %v11755_v35 }
 0x3e0   :  { %v7328_v43 = vadd.f32 %v7327_v11, %v7326_v10 }
 0x3e2   :  { %v4237_v12 = vadd.f32 %v7328_v43, %v7272_v27  ;;  %v7273_v48 = vpop.f32.mrb[40].mxu0 }
 0x3e3   :  { %v7274_v3 = vpop.f32.mrb[41].mxu0 }
 0x3e4   :  { %v7329_v1 = vpop.f32.mrb[40].mxu1  ;;  %v7275_v47 = vadd.f32 %v7274_v3, %v7273_v48  ;;  %7168 = vmatmul.mubr.msk.f32.gmra.mrb[54].mxu0 %vm105_vm0, %v4237_v12  ;;  %7176 = vmatmul.mubr.msk.f32.gmra.mrb[54].mxu1 %vm105_vm0, %v4237_v12 }
 0x3e5   :  { %v7330_v31 = vpop.f32.mrb[41].mxu1  ;;  %4388 = vmatprep.mubr.f32.mxu0 %v11755_v35  ;;  %4501 = vmatprep.mubr.f32.mxu1 %v11755_v35 }
 0x3e6   :  { %v7331_v40 = vadd.f32 %v7330_v31, %v7329_v1  ;;  %v7276_v28 = vpop.f32.mrb[42].mxu0 }
 0x3e7   :  { %v7277_v19 = vpop.f32.mrb[43].mxu0 }
 0x3e8   :  { %v4242_v9 = vadd.f32 %v7331_v40, %v7275_v47  ;;  %v7332_v56 = vpop.f32.mrb[42].mxu1  ;;  %v7278_v46 = vadd.f32 %v7277_v19, %v7276_v28 }
 0x3e9   :  { %v7333_v62 = vpop.f32.mrb[43].mxu1 }
 0x3ea   :  { %v7334_v32 = vadd.f32 %v7333_v62, %v7332_v56  ;;  %7169 = vmatmul.mubr.msk.f32.gmra.mrb[56].mxu0 %vm105_vm0, %v4242_v9  ;;  %7177 = vmatmul.mubr.msk.f32.gmra.mrb[56].mxu1 %vm105_vm0, %v4242_v9  ;;  %v7279_v42 = vpop.f32.mrb[44].mxu0 }
 0x3eb   :  { %v7280_v61 = vpop.f32.mrb[45].mxu0  ;;  %4394 = vmatprep.mubr.f32.mxu0 %v11755_v35  ;;  %4507 = vmatprep.mubr.f32.mxu1 %v11755_v35 }
 0x3ec   :  { %v4247_v36 = vadd.f32 %v7334_v32, %v7278_v46  ;;  %v7335_v13 = vpop.f32.mrb[44].mxu1  ;;  %v7281_v33 = vadd.f32 %v7280_v61, %v7279_v42 }
 0x3ed   :  { %v7336_v5 = vpop.f32.mrb[45].mxu1 }
 0x3ee   :  { %v7337_v10 = vadd.f32 %v7336_v5, %v7335_v13  ;;  %7170 = vmatmul.mubr.msk.f32.gmra.mrb[58].mxu0 %vm105_vm0, %v4247_v36  ;;  %7178 = vmatmul.mubr.msk.f32.gmra.mrb[58].mxu1 %vm105_vm0, %v4247_v36  ;;  %v7282_v27 = vpop.f32.mrb[46].mxu0 }
 0x3ef   :  { %v7283_v11 = vpop.f32.mrb[47].mxu0  ;;  %4400 = vmatprep.mubr.f32.mxu0 %v11755_v35  ;;  %4513 = vmatprep.mubr.f32.mxu1 %v11755_v35 }
 0x3f0   :  { %v4252_v43 = vadd.f32 %v7337_v10, %v7281_v33  ;;  %v7338_v12 = vpop.f32.mrb[46].mxu1  ;;  %v7284_v48 = vadd.f32 %v7283_v11, %v7282_v27 }
 0x3f1   :  { %v7339_v3 = vpop.f32.mrb[47].mxu1 }
 0x3f2   :  { %v7340_v1 = vadd.f32 %v7339_v3, %v7338_v12  ;;  %7171 = vmatmul.mubr.msk.f32.gmra.mrb[60].mxu0 %vm105_vm0, %v4252_v43  ;;  %7179 = vmatmul.mubr.msk.f32.gmra.mrb[60].mxu1 %vm105_vm0, %v4252_v43 }
 0x3f3   :  { %4406 = vmatprep.mubr.f32.mxu0 %v11755_v35  ;;  %4519 = vmatprep.mubr.f32.mxu1 %v11755_v35 }
 0x3f4   :  { %v4257_v47 = vadd.f32 %v7340_v1, %v7284_v48 }
 0x3f6   :  { %7172 = vmatmul.mubr.msk.f32.gmra.mrb[62].mxu0 %vm105_vm0, %v4257_v47  ;;  %7180 = vmatmul.mubr.msk.f32.gmra.mrb[62].mxu1 %vm105_vm0, %v4257_v47  ;;  %vm4630_vm0 = vcmask 523264  }
 0x3f7   :  { %4719 = vmatprep.mubr.f32.mxu0 %v11755_v35  ;;  %4832 = vmatprep.mubr.f32.mxu1 %v11755_v35 }
 0x4a2   :  { %v4366_v31 = vpop.f32.mrb[48].mxu0  ;;  %v4479_v40 = vpop.f32.mrb[48].mxu1 }
 0x4a3   :  { %v4368_v28 = vpop.f32.mrb[49].mxu0  ;;  %v4481_v19 = vpop.f32.mrb[49].mxu1  ;;  %v4526_v9 = vmax.f32 %v4366_v31, 1e-30  ;;  %v4528_v56 = vmax.f32 %v4479_v40, 1e-30 }
 0x4a4   :  { %v4527_v46 = vmax.f32 %v4368_v28, 1e-30  ;;  %v4529_v62 = vmax.f32 %v4481_v19, 1e-30 }
 0x4a5   :  { %8452 = vrcp.f32 %v4526_v9 }
 0x4a6   :  { %8454 = vrcp.f32 %v4528_v56 }
 0x4a7   :  { %8456 = vrcp.f32 %v4527_v46 }
 0x4a8   :  { %8458 = vrcp.f32 %v4529_v62 }
 0x4aa   :  { %v4372_v32 = vpop.f32.mrb[50].mxu0  ;;  %v4485_v42 = vpop.f32.mrb[50].mxu1 }
 0x4ab   :  { %v4530_v61 = vmax.f32 %v4372_v32, 1e-30  ;;  %v4532_v36 = vmax.f32 %v4485_v42, 1e-30  ;;  %v4374_v13 = vpop.f32.mrb[51].mxu0  ;;  %v4487_v33 = vpop.f32.mrb[51].mxu1 }
 0x4ac   :  { %v4531_v5 = vmax.f32 %v4374_v13, 1e-30  ;;  %v4533_v10 = vmax.f32 %v4487_v33, 1e-30 }
 0x4ad   :  { %8460 = vrcp.f32 %v4530_v61 }
 0x4ae   :  { %8462 = vrcp.f32 %v4532_v36 }
 0x4af   :  { %8464 = vrcp.f32 %v4531_v5  ;;  %v8453_v1 = vpop.eup %8452 }
 0x4b0   :  { %8466 = vrcp.f32 %v4533_v10  ;;  %v8455_v31 = vpop.eup %8454  ;;  %v4590_v62 = vmul.f32 %v8453_v1, %v10134_v8 }
 0x4b1   :  { %v4378_v27 = vpop.f32.mrb[52].mxu0  ;;  %v4491_v11 = vpop.f32.mrb[52].mxu1 }
 0x4b2   :  { %v4534_v43 = vmax.f32 %v4378_v27, 1e-30  ;;  %v4536_v12 = vmax.f32 %v4491_v11, 1e-30  ;;  %v4380_v48 = vpop.f32.mrb[53].mxu0  ;;  %v4493_v3 = vpop.f32.mrb[53].mxu1  ;;  %v4592_v11 = vmul.f32 %v8455_v31, %v10153_v4 }
 0x4b3   :  { %v4535_v47 = vmax.f32 %v4380_v48, 1e-30  ;;  %v4537_v40 = vmax.f32 %v4493_v3, 1e-30  ;;  %v8457_v28 = vpop.eup %8456 }
 0x4b4   :  { %8468 = vrcp.f32 %v4534_v43  ;;  %v8459_v19 = vpop.eup %8458  ;;  %v4591_v48 = vmul.f32 %v8457_v28, %v10142_v51 }
 0x4b5   :  { %8470 = vrcp.f32 %v4536_v12  ;;  %v4593_v1 = vmul.f32 %v8459_v19, %v10163_v58 }
 0x4b6   :  { %8472 = vrcp.f32 %v4535_v47 }
 0x4b7   :  { %v8461_v9 = vpop.eup %8460  ;;  %v4384_v56 = vpop.f32.mrb[54].mxu0  ;;  %8474 = vrcp.f32 %v4537_v40 }
 0x4b8   :  { %v4497_v46 = vpop.f32.mrb[54].mxu1  ;;  %v8463_v32 = vpop.eup %8462  ;;  %v4538_v42 = vmax.f32 %v4384_v56, 1e-30  ;;  %v4594_v33 = vmul.f32 %v8461_v9, %v10171_v34 }
 0x4b9   :  { %v4540_v61 = vmax.f32 %v4497_v46, 1e-30  ;;  %v4386_v36 = vpop.f32.mrb[55].mxu0  ;;  %v4499_v13 = vpop.f32.mrb[55].mxu1  ;;  %v4596_v43 = vmul.f32 %v8463_v32, %v10176_v39 }
 0x4ba   :  { %v8465_v5 = vpop.eup %8464  ;;  %v4539_v10 = vmax.f32 %v4386_v36, 1e-30  ;;  %v4541_v27 = vmax.f32 %v4499_v13, 1e-30  ;;  %8476 = vrcp.f32 %v4538_v42  ;;  %v7615_v3 = vpack.c.bf16 %v4594_v33, %v4590_v62 }
 0x4bb   :  { %v8467_v12 = vpop.eup %8466  ;;  %v4595_v8 = vmul.f32 %v8465_v5, %v10174_v44  ;;  %8478 = vrcp.f32 %v4540_v61  ;;  %v7631_v34 = vpack.c.bf16 %v4596_v43, %v4592_v11 }
 0x4bc   :  { %v4597_v47 = vmul.f32 %v8467_v12, %v10179_v15  ;;  %8480 = vrcp.f32 %v4539_v10 }
 0x4bd   :  { %v7613_v40 = vpack.c.bf16 %v4595_v8, %v4591_v48  ;;  %8482 = vrcp.f32 %v4541_v27  ;;  %v4390_v9 = vpop.f32.mrb[56].mxu0  ;;  %v4503_v4 = vpop.f32.mrb[56].mxu1 }
 0x4be   :  { %v7629_v31 = vpack.c.bf16 %v4597_v47, %v4593_v1  ;;  %v4542_v39 = vmax.f32 %v4390_v9, 1e-30  ;;  %v4544_v56 = vmax.f32 %v4503_v4, 1e-30  ;;  %v4392_v46 = vpop.f32.mrb[57].mxu0  ;;  %v4505_v32 = vpop.f32.mrb[57].mxu1 }
 0x4bf   :  { %7614 = vmatprep.subr.bf16.mxu0 %v7613_v40  ;;  %v8469_v51 = vpop.eup %8468  ;;  %v4543_v44 = vmax.f32 %v4392_v46, 1e-30  ;;  %v4545_v28 = vmax.f32 %v4505_v32, 1e-30 }
 0x4c0   :  { %7630 = vmatprep.subr.bf16.mxu1 %v7629_v31  ;;  %7616 = vmatpush1.bf16.msra.mxu0 %v7615_v3  ;;  %v8471_v58 = vpop.eup %8470  ;;  %8484 = vrcp.f32 %v4542_v39  ;;  %v4598_v11 = vmul.f32 %v8469_v51, %v10190_v25 }
 0x4c1   :  { %7632 = vmatpush1.bf16.msra.mxu1 %v7631_v34  ;;  %v8473_v15 = vpop.eup %8472  ;;  %8486 = vrcp.f32 %v4544_v56  ;;  %v4396_v19 = vpop.f32.mrb[58].mxu0  ;;  %v4600_v43 = vmul.f32 %v8471_v58, %v10196_v50 }
 0x4c2   :  { %v4509_v62 = vpop.f32.mrb[58].mxu1  ;;  %v8475_v42 = vpop.eup %8474  ;;  %8488 = vrcp.f32 %v4543_v44  ;;  %v4546_v61 = vmax.f32 %v4396_v19, 1e-30  ;;  %v4599_v3 = vmul.f32 %v8473_v15, %v10193_v38 }
 0x4c3   :  { %v4548_v36 = vmax.f32 %v4509_v62, 1e-30  ;;  %v4398_v13 = vpop.f32.mrb[59].mxu0  ;;  %v4511_v33 = vpop.f32.mrb[59].mxu1  ;;  %8490 = vrcp.f32 %v4545_v28  ;;  %v4601_v1 = vmul.f32 %v8475_v42, %v10200_v7 }
 0x4c4   :  { %v4547_v5 = vmax.f32 %v4398_v13, 1e-30  ;;  %v4549_v10 = vmax.f32 %v4511_v33, 1e-30  ;;  %v8477_v27 = vpop.eup %8476  ;;  %8492 = vrcp.f32 %v4546_v61 }
 0x4c5   :  { %v8479_v12 = vpop.eup %8478  ;;  %8494 = vrcp.f32 %v4548_v36  ;;  %v4402_v48 = vpop.f32.mrb[60].mxu0  ;;  %v4602_v47 = vmul.f32 %v8477_v27, %v10208_v45 }
 0x4c6   :  { %v4515_v8 = vpop.f32.mrb[60].mxu1  ;;  %v8481_v34 = vpop.eup %8480  ;;  %8496 = vrcp.f32 %v4547_v5  ;;  %v4550_v40 = vmax.f32 %v4402_v48, 1e-30  ;;  %v4604_v25 = vmul.f32 %v8479_v12, %v10214_v20 }
 0x4c7   :  { %v4552_v9 = vmax.f32 %v4515_v8, 1e-30  ;;  %v4404_v4 = vpop.f32.mrb[61].mxu0  ;;  %v4517_v31 = vpop.f32.mrb[61].mxu1  ;;  %8498 = vrcp.f32 %v4549_v10  ;;  %v4603_v46 = vmul.f32 %v8481_v34, %v10211_v41  ;;  %v7619_v7 = vpack.c.bf16 %v4602_v47, %v4598_v11 }
 0x4c8   :  { %v8483_v39 = vpop.eup %8482  ;;  %v4551_v50 = vmax.f32 %v4404_v4, 1e-30  ;;  %v4553_v56 = vmax.f32 %v4517_v31, 1e-30  ;;  %8500 = vrcp.f32 %v4550_v40  ;;  %v7635_v32 = vpack.c.bf16 %v4604_v25, %v4600_v43 }
 0x4c9   :  { %v4605_v38 = vmul.f32 %v8483_v39, %v10218_v52  ;;  %8502 = vrcp.f32 %v4552_v9  ;;  %v4408_v45 = vpop.f32.mrb[62].mxu0  ;;  %v4521_v51 = vpop.f32.mrb[62].mxu1  ;;  %v7617_v44 = vpack.c.bf16 %v4603_v46, %v4599_v3 }
 0x4ca   :  { %v8485_v28 = vpop.eup %8484  ;;  %8504 = vrcp.f32 %v4551_v50  ;;  %v4554_v58 = vmax.f32 %v4408_v45, 1e-30  ;;  %v4556_v15 = vmax.f32 %v4521_v51, 1e-30  ;;  %v4410_v20 = vpop.f32.mrb[63].mxu0  ;;  %v4629_v51 = vld [vmem:[%s11618_s7 + $0x38] sm:$0xff] }
 0x4cb   :  { %v4523_v19 = vpop.f32.mrb[63].mxu1  ;;  %v7633_v62 = vpack.c.bf16 %v4605_v38, %v4601_v1  ;;  %v8487_v42 = vpop.eup %8486  ;;  %8506 = vrcp.f32 %v4553_v56  ;;  %v4555_v61 = vmax.f32 %v4410_v20, 1e-30  ;;  %7618 = vmatprep.subr.bf16.mxu0 %v7617_v44  ;;  %v4606_v5 = vmul.f32 %v8485_v28, %v10224_v55  ;;  %v4883_v20 = vld [vmem:[%s11619_s8 + $0x10] sm:$0xff] }
 0x4cc   :  { %v4557_v41 = vmax.f32 %v4523_v19, 1e-30  ;;  %v8489_v36 = vpop.eup %8488  ;;  %8508 = vrcp.f32 %v4554_v58  ;;  %7620 = vmatpush1.bf16.msra.mxu0 %v7619_v7  ;;  %v4608_v11 = vmul.f32 %v8487_v42, %v10228_v22  ;;  %v68_v44 = vpop.permute.xlu1 %67  ;;  %v4881_v58 = vld [vmem:[%s11619_s8] sm:$0xff] }
 0x4cd   :  { %7634 = vmatprep.subr.bf16.mxu1 %v7633_v62  ;;  %v8491_v52 = vpop.eup %8490  ;;  %8510 = vrcp.f32 %v4556_v15  ;;  %v4607_v48 = vmul.f32 %v8489_v36, %v10226_v21  ;;  %v4882_v15 = vld [vmem:[%s11619_s8 + $0x8] sm:$0xff]  ;;  %v4922_v19 = vsel %vm4630_vm0, %v4881_v58, 0  ;;  %v73_v62 = vpop.permute.xlu0 %72 }
 0x4ce   :  { %7636 = vmatpush1.bf16.msra.mxu1 %v7635_v32  ;;  %v8493_v13 = vpop.eup %8492  ;;  %8512 = vrcp.f32 %v4555_v61  ;;  %v4609_v47 = vmul.f32 %v8491_v52, %v10231_v60  ;;  %v4925_v42 = vsel %vm4630_vm0, %v4882_v15, 0  ;;  %v4928_v61 = vsel %vm4630_vm0, %v4883_v20, 0  ;;  %v4884_v52 = vld [vmem:[%s11619_s8 + $0x18] sm:$0xff]  ;;  %v11832_v15 = vld [vmem:[#allocation18_spill] sm:$0xff] }
 0x4cf   :  { %v8495_v33 = vpop.eup %8494  ;;  %8514 = vrcp.f32 %v4557_v41  ;;  %v4610_v10 = vmul.f32 %v8493_v13, %v10234_v2  ;;  %v10406_v36 = vand.u32 4294901760, %v4922_v19  ;;  %v10411_v13 = vand.u32 4294901760, %v4925_v42 }
 0x4d0   :  { %v8497_v27 = vpop.eup %8496  ;;  %v4612_v43 = vmul.f32 %v8495_v33, %v10240_v29  ;;  %v78_v28 = vpop.permute.xlu1 %77  ;;  %v10413_v33 = vand.u32 4294901760, %v4928_v61 }
 0x4d1   :  { %v8499_v12 = vpop.eup %8498  ;;  %v4611_v8 = vmul.f32 %v8497_v27, %v10237_v53  ;;  %v7623_v3 = vpack.c.bf16 %v4610_v10, %v4606_v5  ;;  %11806 = vst [vmem:[#allocation30_spill] sm:$0xff] %v10406_v36  ;;  %11807 = vst [vmem:[#allocation31_spill] sm:$0xff] %v10411_v13  ;;  %v4885_v5 = vld [vmem:[%s11619_s8 + $0x20] sm:$0xff]  ;;  %v4886_v10 = vld [vmem:[%s11619_s8 + $0x28] sm:$0xff]  ;;  %v7837_v27 = vadd.f32 %v9661_v16, %v68_v44 }
 0x4d2   :  { %v8501_v1 = vpop.eup %8500  ;;  %v4613_v34 = vmul.f32 %v8499_v12, %v10243_v49  ;;  %v7639_v40 = vpack.c.bf16 %v4612_v43, %v4608_v11  ;;  %11808 = vst [vmem:[#allocation32_spill] sm:$0xff] %v10413_v33  ;;  %v10423_v11 = vadd.f32 %v9663_v23, %v68_v44  ;;  %v10426_v43 = vadd.f32 %v9665_v24, %v68_v44 }
 0x4d3   :  { %v8503_v55 = vpop.eup %8502  ;;  %v7621_v9 = vpack.c.bf16 %v4611_v8, %v4607_v48  ;;  %v4614_v21 = vmul.f32 %v8501_v1, %v10246_v18  ;;  %v4931_v12 = vsel %vm4630_vm0, %v4884_v52, 0  ;;  %v88_v48 = vpop.permute.xlu0 %87  ;;  %v10430_v8 = vadd.f32 %v9667_v30, %v68_v44  ;;  %v11836_v52 = vld [vmem:[#allocation21_spill] sm:$0xff] }
 0x4d4   :  { %v8505_v2 = vpop.eup %8504  ;;  %v7637_v4 = vpack.c.bf16 %v4613_v34, %v4609_v47  ;;  %v4616_v60 = vmul.f32 %v8503_v55, %v10252_v63  ;;  %v4622_v63 = vld [vmem:[%s11618_s7] sm:$0xff]  ;;  %v83_v41 = vpop.permute.xlu1 %82  ;;  %v10436_v1 = vsub.f32 %v4922_v19, %v10406_v36  ;;  %v4934_v16 = vsel %vm4630_vm0, %v4885_v5, 0  ;;  %v11833_v19 = vld [vmem:[#allocation19_spill] sm:$0xff] }
 0x4d5   :  { %v8507_v31 = vpop.eup %8506  ;;  %7622 = vmatprep.subr.bf16.mxu0 %v7621_v9  ;;  %v4615_v50 = vmul.f32 %v8505_v2, %v10249_v0  ;;  %v4623_v0 = vld [vmem:[%s11618_s7 + $0x8] sm:$0xff]  ;;  %v10440_v23 = vadd.f32 %v9687_v14, %v78_v28  ;;  %v10443_v24 = vsub.f32 %v4925_v42, %v10411_v13  ;;  %v10446_v34 = vsub.f32 %v4928_v61, %v10413_v33  ;;  %v11813_v9 = vld [vmem:[#allocation11_spill] sm:$0xff]  ;;  %v11815_v14 = vld [vmem:[#allocation9_spill] sm:$0xff] }
 0x4d6   :  { %v8509_v22 = vpop.eup %8508  ;;  %7638 = vmatprep.subr.bf16.mxu1 %v7637_v4  ;;  %7624 = vmatpush1.bf16.msra.mxu0 %v7623_v3  ;;  %v4617_v38 = vmul.f32 %v8507_v31, %v10255_v17  ;;  %v4624_v17 = vld [vmem:[%s11618_s7 + $0x10] sm:$0xff]  ;;  %v10433_v3 = vadd.f32 %v9685_v54, %v78_v28  ;;  %11809 = vst [vmem:[#allocation33_spill] sm:$0xff] %v10436_v1  ;;  %v4937_v30 = vsel %vm4630_vm0, %v4886_v10, 0  ;;  %v10458_v4 = vand.u32 4294901760, %v4931_v12  ;;  %v11835_v61 = vld [vmem:[#allocation20_spill] sm:$0xff] }
 0x4d7   :  { %v8511_v29 = vpop.eup %8510  ;;  %7640 = vmatpush1.bf16.msra.mxu1 %v7639_v40  ;;  %v4618_v53 = vmul.f32 %v8509_v22, %v10258_v57  ;;  %v4625_v57 = vld [vmem:[%s11618_s7 + $0x18] sm:$0xff]  ;;  %11810 = vst [vmem:[#allocation34_spill] sm:$0xff] %v10443_v24  ;;  %11811 = vst [vmem:[#allocation35_spill] sm:$0xff] %v10446_v34  ;;  %v10450_v54 = vadd.f32 %v9673_v37, %v73_v62  ;;  %v11812_v40 = vld [vmem:[#allocation5_spill] sm:$0xff]  ;;  %v10456_v2 = vadd.f32 %v11813_v9, %v78_v28 }
 0x4d8   :  { %v8513_v25 = vpop.eup %8512  ;;  %v4620_v49 = vmul.f32 %v8511_v29, %v10264_v6  ;;  %v4627_v6 = vld [vmem:[%s11618_s7 + $0x28] sm:$0xff]  ;;  %v93_v47 = vpop.permute.xlu1 %92  ;;  %v10453_v55 = vadd.f32 %v11812_v40, %v73_v62  ;;  %11814 = vst [vmem:[#allocation5_spill] sm:$0xff] %v10458_v4  ;;  %v10461_v31 = vadd.f32 %v11815_v14, %v73_v62  ;;  %v11839_v9 = vld [vmem:[#allocation23_spill] sm:$0xff] }
 0x4d9   :  { %v8515_v39 = vpop.eup %8514  ;;  %v4619_v56 = vmul.f32 %v8513_v25, %v10261_v59  ;;  %v7627_v46 = vpack.c.bf16 %v4618_v53, %v4614_v21  ;;  %v4626_v59 = vld [vmem:[%s11618_s7 + $0x20] sm:$0xff]  ;;  %v11816_v22 = vld [vmem:[#allocation10_spill] sm:$0xff]  ;;  %v11817_v21 = vld [vmem:[#allocation12_spill] sm:$0xff]  ;;  %v10469_v25 = vand.u32 4294901760, %v4934_v16  ;;  %v10510_v20 = vadd.f32 %v11832_v15, %v93_v47 }
 0x4da   :  { %v4621_v7 = vmul.f32 %v8515_v39, %v10267_v26  ;;  %v7643_v32 = vpack.c.bf16 %v4620_v49, %v4616_v60  ;;  %v4628_v26 = vld [vmem:[%s11618_s7 + $0x30] sm:$0xff]  ;;  %v10464_v29 = vadd.f32 %v11816_v22, %v73_v62  ;;  %v10467_v53 = vadd.f32 %v11817_v21, %v78_v28  ;;  %v11819_v37 = vld [vmem:[#allocation6_spill] sm:$0xff]  ;;  %v11820_v49 = vld [vmem:[#allocation8_spill] sm:$0xff] }
 0x4db   :  { %v7625_v45 = vpack.c.bf16 %v4619_v56, %v4615_v50  ;;  %11818 = vst [vmem:[#allocation11_spill] sm:$0xff] %v10469_v25  ;;  %v10472_v60 = vadd.f32 %v11819_v37, %v83_v41  ;;  %v10475_v39 = vadd.f32 %v11820_v49, %v83_v41  ;;  %v10478_v50 = vand.u32 4294901760, %v10436_v1  ;;  %v11831_v28 = vld [vmem:[#allocation17_spill] sm:$0xff]  ;;  %v11840_v21 = vld [vmem:[#allocation24_spill] sm:$0xff] }
 0x4dc   :  { %v7641_v18 = vpack.c.bf16 %v4621_v7, %v4617_v38  ;;  %v10480_v56 = vand.u32 4294901760, %v4937_v30  ;;  %v11824_v7 = vld [vmem:[#allocation13_spill] sm:$0xff]  ;;  %v103_v44 = vpop.permute.xlu1 %102  ;;  %v10507_v58 = vadd.f32 %v11831_v28, %v88_v48  ;;  %v10513_v62 = vadd.f32 %v11833_v19, %v93_v47  ;;  %v11845_v15 = vld [vmem:[#allocation28_spill] sm:$0xff] }
 0x4dd   :  { %7626 = vmatprep.subr.bf16.mxu0 %v7625_v45  ;;  %11821 = vst [vmem:[#allocation9_spill] sm:$0xff] %v10478_v50  ;;  %v10489_v45 = vand.u32 4294901760, %v10443_v24  ;;  %v10516_v42 = vsub.f32 %v4934_v16, %v10469_v25  ;;  %v10522_v5 = vadd.f32 %v11836_v52, %v93_v47  ;;  %v5029_v10 = vsub.f32 %v10436_v1, %v10478_v50 }
 0x4de   :  { %7642 = vmatprep.subr.bf16.mxu1 %v7641_v18  ;;  %7628 = vmatpush1.bf16.msra.mxu0 %v7627_v46  ;;  %11822 = vst [vmem:[#allocation10_spill] sm:$0xff] %v10480_v56  ;;  %v11823_v46 = vld [vmem:[#allocation7_spill] sm:$0xff]  ;;  %v10492_v18 = vand.u32 4294901760, %v10446_v34  ;;  %v10558_v19 = vadd.f32 %v11845_v15, %v103_v44 }
 0x4df   :  { %7644 = vmatpush1.bf16.msra.mxu1 %v7643_v32  ;;  %v10483_v38 = vadd.f32 %v11823_v46, %v83_v41  ;;  %v10486_v32 = vadd.f32 %v11824_v7, %v83_v41  ;;  %11825 = vst [vmem:[#allocation12_spill] sm:$0xff] %v10489_v45  ;;  %11834 = vst [vmem:[#allocation7_spill] sm:$0xff] %v10516_v42  ;;  %v10519_v41 = vadd.f32 %v11835_v61, %v93_v47  ;;  %v4887_v47 = vld [vmem:[%s11619_s8 + $0x30] sm:$0xff]  ;;  %v11842_v46 = vld [vmem:[#allocation26_spill] sm:$0xff] }
 0x4e0   :  { %11826 = vst [vmem:[#allocation6_spill] sm:$0xff] %v10492_v18  ;;  %v5040_v16 = vsub.f32 %v10443_v24, %v10489_v45  ;;  %v5051_v22 = vsub.f32 %v10446_v34, %v10492_v18  ;;  %v10549_v7 = vadd.f32 %v11842_v46, %v103_v44  ;;  %v11846_v61 = vld [vmem:[#allocation29_spill] sm:$0xff]  ;;  %v10569_v46 = vand.u32 4294901760, %v5029_v10 }
 0x4e1   :  { %7181 = vmatmul.mubr.msk.f32.vlgmr.msra.gmra.mrb[64].mxu0 %vm4630_vm0, %v4622_v63  ;;  %v10561_v52 = vadd.f32 %v11846_v61, %v103_v44  ;;  %v4940_v15 = vsel %vm4630_vm0, %v4887_v47, 0 }
 0x4e2   :  { %7189 = vmatmul.mubr.msk.f32.vlgmr.msra.gmra.mrb[64].mxu1 %vm4630_vm0, %v4622_v63  ;;  %4725 = vmatprep.mubr.f32.mxu0 %v11755_v35  ;;  %v98_v63 = vpop.permute.xlu0 %97  ;;  %v10579_v45 = vand.u32 4294901760, %v5040_v16  ;;  %v10581_v50 = vand.u32 4294901760, %v5051_v22  ;;  %v10592_v16 = vand.u32 4294901760, %v4940_v15 }
 0x4e3   :  { %4838 = vmatprep.mubr.f32.mxu1 %v11755_v35  ;;  %v10533_v14 = vadd.f32 %v11839_v9, %v98_v63  ;;  %v10543_v37 = vadd.f32 %v11840_v21, %v98_v63 }
 0x4e4   :  { %11849 = vst [vmem:[#allocation17_spill] sm:$0xff] %v10579_v45  ;;  %11850 = vst [vmem:[#allocation18_spill] sm:$0xff] %v10581_v50 }
 0x4e5   :  { %7182 = vmatmul.mubr.msk.f32.gmra.mrb[66].mxu0 %vm4630_vm0, %v4623_v0  ;;  %11851 = vst [vmem:[#allocation19_spill] sm:$0xff] %v10592_v16 }
 0x4e6   :  { %7190 = vmatmul.mubr.msk.f32.gmra.mrb[66].mxu1 %vm4630_vm0, %v4623_v0  ;;  %4731 = vmatprep.mubr.f32.mxu0 %v11755_v35  ;;  %v11827_v0 = vld [vmem:[#allocation14_spill] sm:$0xff] }
 0x4e7   :  { %4844 = vmatprep.mubr.f32.mxu1 %v11755_v35 }
 0x4e9   :  { %7183 = vmatmul.mubr.msk.f32.gmra.mrb[68].mxu0 %vm4630_vm0, %v4624_v17 }
 0x4ea   :  { %7191 = vmatmul.mubr.msk.f32.gmra.mrb[68].mxu1 %vm4630_vm0, %v4624_v17  ;;  %4737 = vmatprep.mubr.f32.mxu0 %v11755_v35  ;;  %v10495_v17 = vadd.f32 %v11827_v0, %v88_v48 }
 0x4eb   :  { %4850 = vmatprep.mubr.f32.mxu1 %v11755_v35 }
 0x4ed   :  { %7184 = vmatmul.mubr.msk.f32.gmra.mrb[70].mxu0 %vm4630_vm0, %v4625_v57 }
 0x4ee   :  { %7192 = vmatmul.mubr.msk.f32.gmra.mrb[70].mxu1 %vm4630_vm0, %v4625_v57  ;;  %4743 = vmatprep.mubr.f32.mxu0 %v11755_v35  ;;  %v11828_v57 = vld [vmem:[#allocation16_spill] sm:$0xff] }
 0x4ef   :  { %4856 = vmatprep.mubr.f32.mxu1 %v11755_v35 }
 0x4f1   :  { %7185 = vmatmul.mubr.msk.f32.gmra.mrb[72].mxu0 %vm4630_vm0, %v4626_v59 }
 0x4f2   :  { %7193 = vmatmul.mubr.msk.f32.gmra.mrb[72].mxu1 %vm4630_vm0, %v4626_v59  ;;  %4749 = vmatprep.mubr.f32.mxu0 %v11755_v35  ;;  %v10498_v59 = vadd.f32 %v11828_v57, %v88_v48 }
 0x4f3   :  { %4862 = vmatprep.mubr.f32.mxu1 %v11755_v35 }
 0x4f5   :  { %7186 = vmatmul.mubr.msk.f32.gmra.mrb[74].mxu0 %vm4630_vm0, %v4627_v6 }
 0x4f6   :  { %7194 = vmatmul.mubr.msk.f32.gmra.mrb[74].mxu1 %vm4630_vm0, %v4627_v6  ;;  %4755 = vmatprep.mubr.f32.mxu0 %v11755_v35  ;;  %v11829_v6 = vld [vmem:[#allocation15_spill] sm:$0xff] }
 0x4f7   :  { %4868 = vmatprep.mubr.f32.mxu1 %v11755_v35 }
 0x4f9   :  { %7187 = vmatmul.mubr.msk.f32.gmra.mrb[76].mxu0 %vm4630_vm0, %v4628_v26 }
 0x4fa   :  { %7195 = vmatmul.mubr.msk.f32.gmra.mrb[76].mxu1 %vm4630_vm0, %v4628_v26  ;;  %4761 = vmatprep.mubr.f32.mxu0 %v11755_v35  ;;  %v10501_v26 = vadd.f32 %v11829_v6, %v88_v48  ;;  %v11838_v48 = vld [vmem:[#allocation22_spill] sm:$0xff]  ;;  %v11844_v6 = vld [vmem:[#allocation27_spill] sm:$0xff] }
 0x4fb   :  { %4874 = vmatprep.mubr.f32.mxu1 %v11755_v35  ;;  %v10530_v40 = vadd.f32 %v11838_v48, %v98_v63  ;;  %v10555_v28 = vadd.f32 %v11844_v6, %v103_v44  ;;  %v10564_v48 = vand.u32 4294901760, %v10516_v42 }
 0x4fd   :  { %7188 = vmatmul.mubr.msk.f32.gmra.mrb[78].mxu0 %vm4630_vm0, %v4629_v51  ;;  %11847 = vst [vmem:[#allocation16_spill] sm:$0xff] %v10564_v48 }
 0x4fe   :  { %7196 = vmatmul.mubr.msk.f32.gmra.mrb[78].mxu1 %vm4630_vm0, %v4629_v51  ;;  %5025 = vmatprep.mubr.f32.mxu0 %v11755_v35  ;;  %v10504_v51 = vsub.f32 %v4931_v12, %v10458_v4  ;;  %v10527_v12 = vsub.f32 %v4937_v30, %v10480_v56  ;;  %v11841_v30 = vld [vmem:[#allocation25_spill] sm:$0xff] }
 0x4ff   :  { %6015 = vmatprep.mubr.f32.mxu1 %v11755_v35  ;;  %v10546_v49 = vadd.f32 %v11841_v30, %v98_v63  ;;  %v4888_v63 = vld [vmem:[%s11619_s8 + $0x38] sm:$0xff]  ;;  %s8606_s8 = smov [#allocation2]  }
 0x500   :  { %11830 = vst [vmem:[#allocation8_spill] sm:$0xff] %v10504_v51  ;;  %11837 = vst [vmem:[#allocation13_spill] sm:$0xff] %v10527_v12  ;;  %v10552_v0 = vand.u32 4294901760, %v10504_v51  ;;  %v10572_v6 = vand.u32 4294901760, %v10527_v12  ;;  %v4943_v34 = vsel %vm4630_vm0, %v4888_v63, 0  ;;  %s7154_s4 = sshll.u32 %s8606_s8, 4  ;;  %s7155_s4 = int_to_ptr.vmem [resolvable:$true] %s7154_s4 }
 0x501   :  { %v10604_v56 = vand.u32 4294901760, %v4943_v34  ;;  %s8580_s2 = scalar_lea.vmem %s7155_s4, 4096  ;;  %p8585_p1 = scmp.lt.s32.totalorder %s7155_s4, %s7155_s4 }
 0x502   :  { %11843 = vst [vmem:[#allocation14_spill] sm:$0xff] %v10552_v0  ;;  %11848 = vst [vmem:[#allocation15_spill] sm:$0xff] %v10572_v6  ;;  %p8581_p0 = scmp.ne.s32.totalorder %s7155_s4, %s8580_s2  ;;  %p8586_p2 = scmp.lt.s32.totalorder %s8580_s2, %s8580_s2 }
 0x503   :  { %11854 = vst [vmem:[#allocation22_spill] sm:$0xff] %v10604_v56 }
 0x504   :  { %p8587_p3 = por %p8586_p2, %p8585_p1 }
 0x506   :  { %p8588_p4 = pnand %p8587_p3, %p8581_p0 }
 0x5b4   :  { %v4721_v57 = vpop.f32.mrb[64].mxu0 }
 0x5b5   :  { %v4889_v9 = vmul.f32 %v7837_v27, %v4721_v57  ;;  %v4834_v21 = vpop.f32.mrb[64].mxu1  ;;  %v4723_v30 = vpop.f32.mrb[65].mxu0 }
 0x5b6   :  { %v4891_v44 = vmul.f32 %v10423_v11, %v4834_v21  ;;  %v10577_v61 = vmul.f32 %v10426_v43, %v4723_v30  ;;  %v4836_v18 = vpop.f32.mrb[65].mxu1 }
 0x5b7   :  { %v4947_v27 = vand.u32 4294901760, %v4889_v9  ;;  %v10584_v57 = vmul.f32 %v10430_v8, %v4836_v18 }
 0x5b8   :  { %v5937_v47 = vand.u32 4294901760, %v4891_v44  ;;  %v4727_v21 = vpop.f32.mrb[66].mxu0  ;;  %v11855_v30 = vand.u32 4294901760, %v10577_v61 }
 0x5b9   :  { %v10594_v22 = vsub.f32 %v4889_v9, %v4947_v27  ;;  %v4893_v8 = vmul.f32 %v10450_v54, %v4727_v21  ;;  %v4840_v18 = vpop.f32.mrb[66].mxu1  ;;  %v4729_v24 = vpop.f32.mrb[67].mxu0  ;;  %v11856_v63 = vand.u32 4294901760, %v10584_v57 }
 0x5ba   :  { %v10600_v10 = vsub.f32 %v4891_v44, %v5937_v47  ;;  %v4895_v11 = vmul.f32 %v10453_v55, %v4840_v18  ;;  %v4894_v1 = vmul.f32 %v10461_v31, %v4729_v24  ;;  %v4842_v43 = vpop.f32.mrb[67].mxu1  ;;  %v10610_v54 = vsub.f32 %v10577_v61, %v11855_v30 }
 0x5bb   :  { %11852 = vst [vmem:[#allocation20_spill] sm:$0xff] %v10594_v22  ;;  %v11678_v9 = vand.u32 4294901760, %v10594_v22  ;;  %v4951_v21 = vand.u32 4294901760, %v4893_v8  ;;  %v4896_v25 = vmul.f32 %v10464_v29, %v4842_v43  ;;  %v10617_v55 = vsub.f32 %v10584_v57, %v11856_v63 }
 0x5bc   :  { %11853 = vst [vmem:[#allocation21_spill] sm:$0xff] %v10600_v10  ;;  %v5941_v24 = vand.u32 4294901760, %v4895_v11  ;;  %v4949_v31 = vand.u32 4294901760, %v4894_v1  ;;  %v4733_v18 = vpop.f32.mrb[68].mxu0  ;;  %v10629_v44 = vsub.f32 %v4940_v15, %v10592_v16  ;;  %v11860_v63 = vand.u32 4294901760, %v10600_v10 }
 0x5bd   :  { %v10622_v4 = vsub.f32 %v10594_v22, %v11678_v9  ;;  %v10624_v30 = vpack.c.bf16 %v4951_v21, %v4947_v27  ;;  %v10626_v33 = vsub.f32 %v4893_v8, %v4951_v21  ;;  %v4846_v29 = vpop.f32.mrb[68].mxu1  ;;  %v4735_v43 = vpop.f32.mrb[69].mxu0  ;;  %v5939_v12 = vand.u32 4294901760, %v4896_v25 }
 0x5be   :  { %11859 = vst [vmem:[#allocation25_spill] sm:$0xff] %v10629_v44  ;;  %v10634_v13 = vsub.f32 %v10600_v10, %v11860_v63  ;;  %v10636_v36 = vpack.c.bf16 %v5941_v24, %v5937_v47  ;;  %v10638_v6 = vsub.f32 %v4895_v11, %v5941_v24  ;;  %v10640_v9 = vsub.f32 %v4894_v1, %v4949_v31  ;;  %v4848_v27 = vpop.f32.mrb[69].mxu1 }
 0x5bf   :  { %11857 = vst [vmem:[#allocation23_spill] sm:$0xff] %v10624_v30  ;;  %11858 = vst [vmem:[#allocation24_spill] sm:$0xff] %v10626_v33  ;;  %v10646_v15 = vsub.f32 %v4943_v34, %v10604_v56  ;;  %v4897_v21 = vmul.f32 %v10433_v3, %v4733_v18  ;;  %v4899_v44 = vmul.f32 %v10440_v23, %v4846_v29  ;;  %v11864_v24 = vand.u32 4294901760, %v10626_v33 }
 0x5c0   :  { %11861 = vst [vmem:[#allocation26_spill] sm:$0xff] %v10636_v36  ;;  %11862 = vst [vmem:[#allocation27_spill] sm:$0xff] %v10638_v6  ;;  %v4739_v11 = vpop.f32.mrb[70].mxu0  ;;  %v10659_v63 = vmul.f32 %v10456_v2, %v4735_v43  ;;  %v10662_v47 = vmul.f32 %v10467_v53, %v4848_v27  ;;  %v10670_v3 = vsub.f32 %v4896_v25, %v5939_v12  ;;  %v11865_v29 = vand.u32 4294901760, %v10638_v6 }
 0x5c1   :  { %11863 = vst [vmem:[#allocation28_spill] sm:$0xff] %v10646_v15  ;;  %v4852_v34 = vpop.f32.mrb[70].mxu1  ;;  %v4741_v56 = vpop.f32.mrb[71].mxu0  ;;  %v4901_v1 = vmul.f32 %v10472_v60, %v4739_v11  ;;  %v10668_v8 = vsub.f32 %v10626_v33, %v11864_v24  ;;  %v4955_v23 = vand.u32 4294901760, %v4897_v21  ;;  %v5945_v18 = vand.u32 4294901760, %v4899_v44 }
 0x5c2   :  { %v4854_v15 = vpop.f32.mrb[71].mxu1  ;;  %v10675_v2 = vsub.f32 %v10638_v6, %v11865_v29  ;;  %v11695_v53 = vand.u32 4294901760, %v10659_v63  ;;  %v11698_v43 = vand.u32 4294901760, %v10662_v47  ;;  %v4903_v25 = vmul.f32 %v10475_v39, %v4852_v34 }
 0x5c3   :  { %v4959_v60 = vand.u32 4294901760, %v4901_v1  ;;  %v10679_v11 = vsub.f32 %v4897_v21, %v4955_v23  ;;  %v10681_v16 = vsub.f32 %v4899_v44, %v5945_v18  ;;  %v11868_v24 = vand.u32 4294901760, %v10577_v61 }
 0x5c4   :  { %v4745_v27 = vpop.f32.mrb[72].mxu0  ;;  %v10691_v29 = vsub.f32 %v10659_v63, %v11695_v53  ;;  %v10696_v21 = vsub.f32 %v10662_v47, %v11698_v43  ;;  %v5949_v34 = vand.u32 4294901760, %v4903_v25 }
 0x5c5   :  { %11866 = vst [vmem:[#allocation29_spill] sm:$0xff] %v10679_v11  ;;  %11867 = vst [vmem:[#allocation36_spill] sm:$0xff] %v10681_v16  ;;  %v10686_v48 = vpack.c.bf16 %v4949_v31, %v11868_v24  ;;  %v4858_v42 = vpop.f32.mrb[72].mxu1  ;;  %v4747_v10 = vpop.f32.mrb[73].mxu0  ;;  %v10698_v44 = vpack.c.bf16 %v4959_v60, %v4955_v23  ;;  %v10700_v6 = vsub.f32 %v4901_v1, %v4959_v60  ;;  %v11872_v24 = vand.u32 4294901760, %v10584_v57 }
 0x5c6   :  { %v4860_v39 = vpop.f32.mrb[73].mxu1  ;;  %v11876_v33 = vand.u32 4294901760, %v10679_v11  ;;  %v4902_v1 = vmul.f32 %v10483_v38, %v4741_v56  ;;  %v4904_v23 = vmul.f32 %v10486_v32, %v4854_v15  ;;  %v4907_v31 = vmul.f32 %v10498_v59, %v4858_v42 }
 0x5c7   :  { %11869 = vst [vmem:[#allocation37_spill] sm:$0xff] %v10686_v48  ;;  %11870 = vst [vmem:[#allocation38_spill] sm:$0xff] %v10698_v44  ;;  %7646 = vmatprep.subr.bf16.mxu0 %v10686_v48  ;;  %v10707_v53 = vpack.c.bf16 %v5939_v12, %v11872_v24  ;;  %v10717_v48 = vpack.c.bf16 %v5949_v34, %v5945_v18  ;;  %v10719_v12 = vsub.f32 %v4903_v25, %v5949_v34 }
 0x5c8   :  { %11871 = vst [vmem:[#allocation39_spill] sm:$0xff] %v10700_v6  ;;  %7648 = vmatpush1.bf16.msra.mxu0 %v10624_v30  ;;  %v4751_v60 = vpop.f32.mrb[74].mxu0  ;;  %v10725_v43 = vsub.f32 %v10679_v11, %v11876_v33  ;;  %v4905_v18 = vmul.f32 %v10495_v17, %v4745_v27  ;;  %v11877_v25 = vand.u32 4294901760, %v10681_v16  ;;  %v11878_v56 = vand.u32 4294901760, %v10700_v6 }
 0x5c9   :  { %11873 = vst [vmem:[#allocation40_spill] sm:$0xff] %v10707_v53  ;;  %11874 = vst [vmem:[#allocation41_spill] sm:$0xff] %v10717_v48  ;;  %7742 = vmatprep.subr.bf16.mxu1 %v10707_v53  ;;  %v4864_v57 = vpop.f32.mrb[74].mxu1  ;;  %v4753_v24 = vpop.f32.mrb[75].mxu0  ;;  %v11715_v30 = vand.u32 4294901760, %v10719_v12  ;;  %v4957_v32 = vand.u32 4294901760, %v4902_v1  ;;  %v10755_v33 = vmul.f32 %v10507_v58, %v4860_v39  ;;  %v4909_v22 = vmul.f32 %v10510_v20, %v4751_v60 }
 0x5ca   :  { %11875 = vst [vmem:[#allocation42_spill] sm:$0xff] %v10719_v12  ;;  %7744 = vmatpush1.bf16.msra.mxu1 %v10636_v36  ;;  %v4866_v61 = vpop.f32.mrb[75].mxu1  ;;  %v10734_v34 = vsub.f32 %v10681_v16, %v11877_v25  ;;  %v10743_v38 = vsub.f32 %v10700_v6, %v11878_v56  ;;  %v5947_v17 = vand.u32 4294901760, %v4904_v23  ;;  %v4963_v15 = vand.u32 4294901760, %v4905_v18 }
 0x5cb   :  { %v10748_v25 = vsub.f32 %v10719_v12, %v11715_v30  ;;  %v10752_v36 = vmul.f32 %v10501_v26, %v4747_v10  ;;  %v10758_v6 = vsub.f32 %v4902_v1, %v4957_v32  ;;  %v5953_v59 = vand.u32 4294901760, %v4907_v31 }
 0x5cc   :  { %v4757_v27 = vpop.f32.mrb[76].mxu0  ;;  %v10760_v11 = vsub.f32 %v4905_v18, %v4963_v15  ;;  %v10763_v12 = vsub.f32 %v4904_v23, %v5947_v17  ;;  %v4967_v1 = vand.u32 4294901760, %v4909_v22  ;;  %v4911_v23 = vmul.f32 %v10513_v62, %v4864_v57 }
 0x5cd   :  { %v4870_v53 = vpop.f32.mrb[76].mxu1  ;;  %v4759_v56 = vpop.f32.mrb[77].mxu0  ;;  %v11722_v26 = vand.u32 4294901760, %v10752_v36  ;;  %v10771_v0 = vsub.f32 %v4907_v31, %v5953_v59  ;;  %v11879_v58 = vand.u32 4294901760, %v10755_v33  ;;  %v11881_v31 = vand.u32 4294901760, %v10659_v63 }
 0x5ce   :  { %v4872_v30 = vpop.f32.mrb[77].mxu1  ;;  %v10786_v39 = vpack.c.bf16 %v4967_v1, %v4963_v15  ;;  %v10788_v18 = vsub.f32 %v4909_v22, %v4967_v1  ;;  %v5957_v45 = vand.u32 4294901760, %v4911_v23  ;;  %v4912_v63 = vmul.f32 %v10522_v5, %v4866_v61 }
 0x5cf   :  { %v10776_v20 = vsub.f32 %v10752_v36, %v11722_v26  ;;  %v10784_v10 = vsub.f32 %v10755_v33, %v11879_v58  ;;  %v10792_v51 = vpack.c.bf16 %v4957_v32, %v11881_v31  ;;  %v11725_v50 = vand.u32 4294901760, %v10771_v0 }
 0x5d0   :  { %v4763_v16 = vpop.f32.mrb[78].mxu0  ;;  %11880 = vst [vmem:[#allocation43_spill] sm:$0xff] %v10786_v39  ;;  %v11882_v58 = vand.u32 4294901760, %v10760_v11  ;;  %v11883_v32 = vand.u32 4294901760, %v10662_v47  ;;  %v10813_v57 = vpack.c.bf16 %v5957_v45, %v5953_v59  ;;  %v10815_v62 = vsub.f32 %v4911_v23, %v5957_v45 }
 0x5d1   :  { %v4876_v60 = vpop.f32.mrb[78].mxu1  ;;  %v10779_v42 = vpop.f32.mrb[79].mxu0  ;;  %7650 = vmatprep.subr.bf16.mxu0 %v10792_v51  ;;  %v4913_v47 = vmul.f32 %v10530_v40, %v4757_v27  ;;  %v10827_v59 = vsub.f32 %v10771_v0, %v11725_v50  ;;  %v11886_v23 = vand.u32 4294901760, %v10788_v18  ;;  %v5955_v40 = vand.u32 4294901760, %v4912_v63 }
 0x5d2   :  { %v10794_v26 = vpop.f32.mrb[79].mxu1  ;;  %v10802_v15 = vsub.f32 %v10760_v11, %v11882_v58  ;;  %v10810_v1 = vpack.c.bf16 %v5947_v17, %v11883_v32  ;;  %11885 = vst [vmem:[#allocation45_spill] sm:$0xff] %v10813_v57  ;;  %v4910_v58 = vmul.f32 %v10519_v41, %v4753_v24  ;;  %7652 = vmatpush1.bf16.msra.mxu0 %v10698_v44  ;;  %v11730_v45 = vand.u32 4294901760, %v10815_v62 }
 0x5d3   :  { %v4915_v17 = vmul.f32 %v10533_v14, %v4870_v53  ;;  %v10836_v5 = vsub.f32 %v10788_v18, %v11886_v23  ;;  %v4971_v14 = vand.u32 4294901760, %v4913_v47  ;;  %v4914_v32 = vmul.f32 %v10543_v37, %v4759_v56 }
 0x5d4   :  { %11884 = vst [vmem:[#allocation44_spill] sm:$0xff] %v10810_v1  ;;  %7746 = vmatprep.subr.bf16.mxu1 %v10810_v1  ;;  %v4965_v24 = vand.u32 4294901760, %v4910_v58  ;;  %v10841_v61 = vsub.f32 %v10815_v62, %v11730_v45  ;;  %v4916_v41 = vmul.f32 %v10546_v49, %v4872_v30  ;;  %v10847_v50 = vsub.f32 %v4912_v63, %v5955_v40 }
 0x5d5   :  { %7748 = vmatpush1.bf16.msra.mxu1 %v10717_v48  ;;  %v5961_v53 = vand.u32 4294901760, %v4915_v17  ;;  %v10849_v22 = vsub.f32 %v4913_v47, %v4971_v14  ;;  %v4917_v31 = vmul.f32 %v10549_v7, %v4763_v16  ;;  %v4969_v45 = vand.u32 4294901760, %v4914_v32 }
 0x5d6   :  { %v10843_v27 = vsub.f32 %v4910_v58, %v4965_v24  ;;  %v5959_v1 = vand.u32 4294901760, %v4916_v41  ;;  %v4919_v47 = vmul.f32 %v10555_v28, %v4876_v60  ;;  %v11887_v7 = vand.u32 4294901760, %v10752_v36 }
 0x5d7   :  { %v10851_v23 = vsub.f32 %v4915_v17, %v5961_v53  ;;  %v11735_v37 = vand.u32 4294901760, %v10849_v22  ;;  %v4975_v30 = vand.u32 4294901760, %v4917_v31  ;;  %v10860_v63 = vsub.f32 %v4914_v32, %v4969_v45 }
 0x5d8   :  { %v10865_v16 = vpack.c.bf16 %v4965_v24, %v11887_v7  ;;  %v10878_v32 = vsub.f32 %v4916_v41, %v5959_v1  ;;  %v5965_v28 = vand.u32 4294901760, %v4919_v47  ;;  %v11888_v36 = vand.u32 4294901760, %v10755_v33 }
 0x5d9   :  { %v11733_v49 = vand.u32 4294901760, %v10851_v23  ;;  %v10869_v58 = vpack.c.bf16 %v4975_v30, %v4971_v14  ;;  %v10871_v48 = vsub.f32 %v4917_v31, %v4975_v30  ;;  %v10876_v56 = vsub.f32 %v10849_v22, %v11735_v37 }
 0x5da   :  { %7654 = vmatprep.subr.bf16.mxu0 %v10865_v16  ;;  %v10883_v60 = vpack.c.bf16 %v5955_v40, %v11888_v36  ;;  %v10895_v30 = vpack.c.bf16 %v5965_v28, %v5961_v53  ;;  %v10897_v7 = vsub.f32 %v4919_v47, %v5965_v28  ;;  %v4918_v33 = vmul.f32 %v10558_v19, %v10779_v42 }
 0x5db   :  { %v10888_v24 = vsub.f32 %v10851_v23, %v11733_v49  ;;  %v11734_v14 = vand.u32 4294901760, %v10871_v48  ;;  %7656 = vmatpush1.bf16.msra.mxu0 %v10786_v39  ;;  %v4920_v40 = vmul.f32 %v10561_v52, %v10794_v26  ;;  %v11891_v53 = vand.u32 4294901760, %v10610_v54 }
 0x5dc   :  { %11889 = vst [vmem:[#allocation46_spill] sm:$0xff] %v10883_v60  ;;  %11890 = vst [vmem:[#allocation47_spill] sm:$0xff] %v10895_v30  ;;  %7750 = vmatprep.subr.bf16.mxu1 %v10883_v60  ;;  %v11892_v28 = vand.u32 4294901760, %v10640_v9  ;;  %v11893_v19 = vand.u32 4294901760, %v10617_v55  ;;  %v4973_v49 = vand.u32 4294901760, %v4918_v33  ;;  %v11894_v26 = vand.u32 4294901760, %v10670_v3 }
 0x5dd   :  { %v10907_v36 = vsub.f32 %v10871_v48, %v11734_v14  ;;  %7752 = vmatpush1.bf16.msra.mxu1 %v10813_v57  ;;  %v5117_v47 = vsub.f32 %v10610_v54, %v11891_v53  ;;  %v5963_v14 = vand.u32 4294901760, %v4920_v40  ;;  %v11895_v37 = vand.u32 4294901760, %v10622_v4 }
 0x5de   :  { %v5129_v41 = vsub.f32 %v10640_v9, %v11892_v28  ;;  %v6107_v42 = vsub.f32 %v10617_v55, %v11893_v19  ;;  %v10925_v28 = vsub.f32 %v4918_v33, %v4973_v49  ;;  %v10929_v19 = vpack.c.bf16 %v4973_v49, %v4969_v45 }
 0x5df   :  { %v5118_v53 = vand.u32 4294901760, %v5117_v47  ;;  %v10927_v57 = vsub.f32 %v4920_v40, %v5963_v14  ;;  %v10931_v52 = vpack.c.bf16 %v5963_v14, %v5959_v1  ;;  %v6119_v60 = vsub.f32 %v10670_v3, %v11894_v26 }
 0x5e0   :  { %v5130_v44 = vand.u32 4294901760, %v5129_v41  ;;  %v11896_v47 = vand.u32 4294901760, %v10668_v8  ;;  %v11897_v17 = vand.u32 4294901760, %v10897_v7  ;;  %7658 = vmatprep.subr.bf16.mxu0 %v10929_v19  ;;  %v6108_v1 = vand.u32 4294901760, %v6107_v42 }
 0x5e1   :  { %v11899_v45 = vand.u32 4294901760, %v10675_v2  ;;  %7754 = vmatprep.subr.bf16.mxu1 %v10931_v52  ;;  %7660 = vmatpush1.bf16.msra.mxu0 %v10869_v58  ;;  %v6120_v4 = vand.u32 4294901760, %v6119_v60  ;;  %v11900_v8 = vand.u32 4294901760, %v10691_v29  ;;  %v11902_v42 = vand.u32 4294901760, %v10696_v21 }
 0x5e2   :  { %v7661_v39 = vpack.c.bf16 %v5130_v44, %v5118_v53  ;;  %v7663_v41 = vpack.c.bf16 %v11896_v47, %v11895_v37  ;;  %v6197_v33 = vsub.f32 %v10897_v7, %v11897_v17  ;;  %v11898_v44 = vand.u32 4294901760, %v10634_v13  ;;  %7756 = vmatpush1.bf16.msra.mxu1 %v10895_v30 }
 0x5e3   :  { %v5141_v37 = vsub.f32 %v10691_v29, %v11900_v8  ;;  %v11901_v17 = vand.u32 4294901760, %v10758_v6  ;;  %v6131_v13 = vsub.f32 %v10696_v21, %v11902_v42  ;;  %v11903_v26 = vand.u32 4294901760, %v10763_v12 }
 0x5e4   :  { %v7759_v49 = vpack.c.bf16 %v11899_v45, %v11898_v44  ;;  %7662 = vmatprep.subr.bf16.mxu0 %v7661_v39  ;;  %v11904_v53 = vand.u32 4294901760, %v10725_v43  ;;  %v11905_v47 = vand.u32 4294901760, %v10743_v38  ;;  %v11906_v45 = vand.u32 4294901760, %v10734_v34  ;;  %5031 = vmatmul.mubr.f32.vlgmr.msra.gmra.mrb[80].mxu0 %v10569_v46 }
 0x5e5   :  { %v5153_v14 = vsub.f32 %v10758_v6, %v11901_v17  ;;  %v6143_v60 = vsub.f32 %v10763_v12, %v11903_v26  ;;  %v11907_v8 = vand.u32 4294901760, %v10748_v25  ;;  %v7757_v42 = vpack.c.bf16 %v6120_v4, %v6108_v1  ;;  %6021 = vmatmul.mubr.f32.vlgmr.msra.gmra.mrb[80].mxu1 %v10569_v46  ;;  %7664 = vmatpush1.bf16.msra.mxu0 %v7663_v41 }
 0x5e6   :  { %v7667_v44 = vpack.c.bf16 %v11905_v47, %v11904_v53  ;;  %v5142_v31 = vand.u32 4294901760, %v5141_v37  ;;  %v6132_v40 = vand.u32 4294901760, %v6131_v13  ;;  %v11908_v30 = vand.u32 4294901760, %v10776_v20  ;;  %5036 = vmatprep.mubr.f32.mxu0 %v11755_v35  ;;  %6026 = vmatprep.mubr.f32.mxu1 %v11755_v35 }
 0x5e7   :  { %v7763_v17 = vpack.c.bf16 %v11907_v8, %v11906_v45  ;;  %v5154_v2 = vand.u32 4294901760, %v5153_v14  ;;  %v6144_v39 = vand.u32 4294901760, %v6143_v60  ;;  %v11909_v43 = vand.u32 4294901760, %v10843_v27  ;;  %7758 = vmatprep.subr.bf16.mxu1 %v7757_v42 }
 0x5e8   :  { %v5165_v26 = vsub.f32 %v10776_v20, %v11908_v30  ;;  %v11910_v34 = vand.u32 4294901760, %v10784_v10  ;;  %v6198_v53 = vand.u32 4294901760, %v6197_v33  ;;  %v11911_v4 = vand.u32 4294901760, %v10847_v50  ;;  %7760 = vmatpush1.bf16.msra.mxu1 %v7759_v49 }
 0x5e9   :  { %v5177_v38 = vsub.f32 %v10843_v27, %v11909_v43  ;;  %v7665_v1 = vpack.c.bf16 %v5154_v2, %v5142_v31  ;;  %v11912_v14 = vand.u32 4294901760, %v10802_v15  ;;  %v11913_v30 = vand.u32 4294901760, %v10836_v5  ;;  %v11920_v43 = vld [vmem:[#allocation17_spill] sm:$0xff] }
 0x5ea   :  { %v6155_v25 = vsub.f32 %v10784_v10, %v11910_v34  ;;  %v6167_v37 = vsub.f32 %v10847_v50, %v11911_v4  ;;  %v7761_v60 = vpack.c.bf16 %v6144_v39, %v6132_v40  ;;  %v5166_v47 = vand.u32 4294901760, %v5165_v26  ;;  %5042 = vmatmul.mubr.f32.gmra.mrb[82].mxu0 %v11920_v43  ;;  %6032 = vmatmul.mubr.f32.gmra.mrb[82].mxu1 %v11920_v43 }
 0x5eb   :  { %v7671_v13 = vpack.c.bf16 %v11913_v30, %v11912_v14  ;;  %v5178_v45 = vand.u32 4294901760, %v5177_v38  ;;  %7666 = vmatprep.subr.bf16.mxu0 %v7665_v1  ;;  %v11914_v31 = vand.u32 4294901760, %v10827_v59  ;;  %v11915_v33 = vand.u32 4294901760, %v10841_v61  ;;  %5047 = vmatprep.mubr.f32.mxu0 %v11755_v35 }
 0x5ec   :  { %v6156_v8 = vand.u32 4294901760, %v6155_v25  ;;  %v6168_v46 = vand.u32 4294901760, %v6167_v37  ;;  %v11916_v15 = vand.u32 4294901760, %v10860_v63  ;;  %v11917_v41 = vand.u32 4294901760, %v10925_v28  ;;  %7762 = vmatprep.subr.bf16.mxu1 %v7761_v60  ;;  %7668 = vmatpush1.bf16.msra.mxu0 %v7667_v44 }
 0x5ed   :  { %v7767_v2 = vpack.c.bf16 %v11915_v33, %v11914_v31  ;;  %v6186_v49 = vand.u32 4294901760, %v10888_v24  ;;  %v7669_v42 = vpack.c.bf16 %v5178_v45, %v5166_v47  ;;  %v11918_v39 = vand.u32 4294901760, %v10878_v32  ;;  %7764 = vmatpush1.bf16.msra.mxu1 %v7763_v17  ;;  %6037 = vmatprep.mubr.f32.mxu1 %v11755_v35 }
 0x5ee   :  { %v5189_v5 = vsub.f32 %v10860_v63, %v11916_v15  ;;  %v5201_v40 = vsub.f32 %v10925_v28, %v11917_v41  ;;  %v11919_v61 = vand.u32 4294901760, %v10927_v57  ;;  %v7765_v38 = vpack.c.bf16 %v6168_v46, %v6156_v8  ;;  %v11924_v8 = vld [vmem:[#allocation8_spill] sm:$0xff]  ;;  %v11925_v46 = vld [vmem:[#allocation14_spill] sm:$0xff] }
 0x5ef   :  { %v6179_v59 = vsub.f32 %v10878_v32, %v11918_v39  ;;  %v11921_v24 = vand.u32 4294901760, %v10876_v56  ;;  %v11922_v1 = vand.u32 4294901760, %v10907_v36  ;;  %v7771_v30 = vpack.c.bf16 %v6198_v53, %v6186_v49  ;;  %7670 = vmatprep.subr.bf16.mxu0 %v7669_v42  ;;  %v11923_v53 = vld [vmem:[#allocation18_spill] sm:$0xff] }
 0x5f0   :  { %v6191_v26 = vsub.f32 %v10927_v57, %v11919_v61  ;;  %v5190_v34 = vand.u32 4294901760, %v5189_v5  ;;  %v5202_v25 = vand.u32 4294901760, %v5201_v40  ;;  %v7677_v60 = vpack.c.bf16 %v10640_v9, %v10610_v54  ;;  %7766 = vmatprep.subr.bf16.mxu1 %v7765_v38  ;;  %5053 = vmatmul.mubr.f32.gmra.mrb[84].mxu0 %v11923_v53  ;;  %v11933_v38 = vld [vmem:[#allocation24_spill] sm:$0xff] }
 0x5f1   :  { %v7675_v4 = vpack.c.bf16 %v11922_v1, %v11921_v24  ;;  %v6180_v37 = vand.u32 4294901760, %v6179_v59  ;;  %v7773_v45 = vpack.c.bf16 %v10670_v3, %v10617_v55  ;;  %6043 = vmatmul.mubr.f32.gmra.mrb[84].mxu1 %v11923_v53  ;;  %v11926_v31 = vsub.f32 %v11924_v8, %v11925_v46  ;;  %7672 = vmatpush1.bf16.msra.mxu0 %v7671_v13  ;;  %v11935_v13 = vld [vmem:[#allocation21_spill] sm:$0xff] }
 0x5f2   :  { %v6192_v14 = vand.u32 4294901760, %v6191_v26  ;;  %v7673_v47 = vpack.c.bf16 %v5202_v25, %v5190_v34  ;;  %7768 = vmatpush1.bf16.msra.mxu1 %v7767_v2  ;;  %v11927_v40 = vand.u32 4294901760, %v10610_v54  ;;  %v11928_v49 = vand.u32 4294901760, %v10640_v9  ;;  %v11931_v26 = vld [vmem:[#allocation20_spill] sm:$0xff]  ;;  %v11937_v2 = vld [vmem:[#allocation27_spill] sm:$0xff]  ;;  %5058 = vmatprep.mubr.f32.mxu0 %v11755_v35 }
 0x5f3   :  { %v5063_v33 = vand.u32 4294901760, %v11926_v31  ;;  %v11929_v39 = vand.u32 4294901760, %v10617_v55  ;;  %v11930_v59 = vand.u32 4294901760, %v10670_v3  ;;  %v11932_v43 = vand.u32 4294901760, %v11931_v26  ;;  %6048 = vmatprep.mubr.f32.mxu1 %v11755_v35 }
 0x5f4   :  { %v7769_v36 = vpack.c.bf16 %v6192_v14, %v6180_v37  ;;  %v11043_v42 = vpack.c.bf16 %v11928_v49, %v11927_v40  ;;  %v11934_v34 = vand.u32 4294901760, %v11933_v38  ;;  %7674 = vmatprep.subr.bf16.mxu0 %v7673_v47  ;;  %v11936_v54 = vand.u32 4294901760, %v11935_v13  ;;  %v11943_v47 = vld [vmem:[#allocation7_spill] sm:$0xff]  ;;  %v11946_v49 = vld [vmem:[#allocation29_spill] sm:$0xff] }
 0x5f5   :  { %v11049_v61 = vpack.c.bf16 %v11930_v59, %v11929_v39  ;;  %v11938_v9 = vand.u32 4294901760, %v11937_v2  ;;  %v11939_v55 = vand.u32 4294901760, %v10691_v29  ;;  %v11940_v3 = vand.u32 4294901760, %v10758_v6  ;;  %v11948_v59 = vld [vmem:[#allocation39_spill] sm:$0xff]  ;;  %5064 = vmatmul.mubr.f32.gmra.mrb[86].mxu0 %v5063_v33  ;;  %6054 = vmatmul.mubr.f32.gmra.mrb[86].mxu1 %v5063_v33 }
 0x5f6   :  { %v11055_v25 = vpack.c.bf16 %v11934_v34, %v11932_v43  ;;  %7770 = vmatprep.subr.bf16.mxu1 %v7769_v36  ;;  %v11941_v37 = vand.u32 4294901760, %v10696_v21  ;;  %v11942_v14 = vand.u32 4294901760, %v10763_v12  ;;  %v11944_v36 = vld [vmem:[#allocation16_spill] sm:$0xff]  ;;  %v11947_v39 = vand.u32 4294901760, %v11946_v49  ;;  %7676 = vmatpush1.bf16.msra.mxu0 %v7675_v4 }
 0x5f7   :  { %v11061_v24 = vpack.c.bf16 %v11938_v9, %v11936_v54  ;;  %v11067_v1 = vpack.c.bf16 %v11940_v3, %v11939_v55  ;;  %v11945_v31 = vsub.f32 %v11943_v47, %v11944_v36  ;;  %v11949_v43 = vand.u32 4294901760, %v11948_v59  ;;  %v11950_v54 = vld [vmem:[#allocation36_spill] sm:$0xff]  ;;  %v11952_v55 = vld [vmem:[#allocation42_spill] sm:$0xff]  ;;  %7772 = vmatpush1.bf16.msra.mxu1 %v7771_v30  ;;  %7678 = vmatprep.subr.bf16.mxu0 %v7677_v60 }
 0x5f8   :  { %v11073_v53 = vpack.c.bf16 %v11942_v14, %v11941_v37  ;;  %v11951_v9 = vand.u32 4294901760, %v11950_v54  ;;  %v11953_v3 = vand.u32 4294901760, %v11952_v55  ;;  %v11954_v14 = vand.u32 4294901760, %v10776_v20  ;;  %7774 = vmatprep.subr.bf16.mxu1 %v7773_v45  ;;  %5069 = vmatprep.mubr.f32.mxu0 %v11755_v35  ;;  %v11975_v45 = vld [vmem:[#allocation28_spill] sm:$0xff] }
 0x5f9   :  { %v5074_v40 = vand.u32 4294901760, %v11945_v31  ;;  %v11084_v34 = vpack.c.bf16 %v11949_v43, %v11947_v39  ;;  %v11955_v41 = vand.u32 4294901760, %v10843_v27  ;;  %v11956_v31 = vld [vmem:[#allocation25_spill] sm:$0xff]  ;;  %v11957_v39 = vand.u32 4294901760, %v10784_v10  ;;  %6059 = vmatprep.mubr.f32.mxu1 %v11755_v35 }
 0x5fa   :  { %v11090_v37 = vpack.c.bf16 %v11953_v3, %v11951_v9  ;;  %v11099_v15 = vand.u32 4294901760, %v11956_v31  ;;  %v11958_v43 = vand.u32 4294901760, %v10847_v50  ;;  %v11959_v9 = vand.u32 4294901760, %v10760_v11 }
 0x5fb   :  { %v11096_v5 = vpack.c.bf16 %v11955_v41, %v11954_v14  ;;  %v11960_v3 = vand.u32 4294901760, %v10788_v18  ;;  %v11962_v41 = vand.u32 4294901760, %v10771_v0  ;;  %v11963_v14 = vand.u32 4294901760, %v10815_v62  ;;  %5075 = vmatmul.mubr.f32.gmra.mrb[88].mxu0 %v5074_v40  ;;  %6065 = vmatmul.mubr.f32.gmra.mrb[88].mxu1 %v5074_v40 }
 0x5fc   :  { %v11105_v17 = vpack.c.bf16 %v11958_v43, %v11957_v39  ;;  %v11964_v56 = vand.u32 4294901760, %v10860_v63  ;;  %v11965_v36 = vand.u32 4294901760, %v10925_v28  ;;  %v11966_v43 = vand.u32 4294901760, %v10878_v32  ;;  %5080 = vmatprep.mubr.f32.mxu0 %v11755_v35  ;;  %6070 = vmatprep.mubr.f32.mxu1 %v11755_v35 }
 0x5fd   :  { %v11111_v44 = vpack.c.bf16 %v11960_v3, %v11959_v9  ;;  %v11117_v33 = vpack.c.bf16 %v11963_v14, %v11962_v41  ;;  %v11967_v46 = vand.u32 4294901760, %v10927_v57  ;;  %v11968_v3 = vand.u32 4294901760, %v10849_v22 }
 0x5fe   :  { %v11123_v39 = vpack.c.bf16 %v11965_v36, %v11964_v56  ;;  %v11970_v4 = vand.u32 4294901760, %v10851_v23  ;;  %v11971_v30 = vand.u32 4294901760, %v10897_v7  ;;  %v11973_v36 = vld [vmem:[#allocation15_spill] sm:$0xff]  ;;  %v5095_v60 = vsub.f32 %v11956_v31, %v11099_v15 }
 0x5ff   :  { %11961 = vst [vmem:[#allocation17_spill] sm:$0xff] %v11111_v44  ;;  %v11129_v9 = vpack.c.bf16 %v11967_v46, %v11966_v43  ;;  %v11969_v44 = vand.u32 4294901760, %v10871_v48  ;;  %v11972_v46 = vld [vmem:[#allocation13_spill] sm:$0xff] }
 0x600   :  { %v11141_v56 = vpack.c.bf16 %v11971_v30, %v11970_v4  ;;  %v11974_v14 = vsub.f32 %v11972_v46, %v11973_v36  ;;  %v11976_v30 = vld [vmem:[#allocation30_spill] sm:$0xff] }
 0x601   :  { %v11135_v41 = vpack.c.bf16 %v11969_v44, %v11968_v3  ;;  %v11151_v44 = vand.u32 4294901760, %v11975_v45  ;;  %v5096_v3 = vand.u32 4294901760, %v5095_v60  ;;  %v11979_v60 = vpack.c.bf16 %v10758_v6, %v10691_v29 }
 0x602   :  { %v5085_v43 = vand.u32 4294901760, %v11974_v14  ;;  %v11977_v14 = vpack.c.bf16 %v11933_v38, %v11931_v26  ;;  %v11982_v26 = vpack.c.bf16 %v11948_v59, %v11946_v49  ;;  %v11983_v6 = vpack.c.bf16 %v11952_v55, %v11950_v54  ;;  %v12006_v49 = vld [vmem:[#allocation41_spill] sm:$0xff]  ;;  %v12007_v59 = vld [vmem:[#allocation46_spill] sm:$0xff]  ;;  %v12008_v54 = vld [vmem:[#allocation35_spill] sm:$0xff] }
 0x603   :  { %v5106_v40 = vsub.f32 %v11975_v45, %v11151_v44  ;;  %v11984_v29 = vpack.c.bf16 %v10843_v27, %v10776_v20  ;;  %v11987_v38 = vpack.c.bf16 %v10788_v18, %v10760_v11  ;;  %v11988_v20 = vpack.c.bf16 %v10815_v62, %v10771_v0  ;;  %v11991_v27 = vld [vmem:[#allocation5_spill] sm:$0xff]  ;;  %v11995_v62 = vld [vmem:[#allocation40_spill] sm:$0xff]  ;;  %v12009_v55 = vld [vmem:[#allocation43_spill] sm:$0xff] }
 0x604   :  { %5086 = vmatmul.mubr.f32.gmra.mrb[90].mxu0 %v5085_v43  ;;  %6076 = vmatmul.mubr.f32.gmra.mrb[90].mxu1 %v5085_v43  ;;  %v11978_v43 = vpack.c.bf16 %v11937_v2, %v11935_v13  ;;  %v11992_v0 = vpack.c.bf16 %v10871_v48, %v10849_v22  ;;  %v11993_v11 = vpack.c.bf16 %v10897_v7, %v10851_v23  ;;  %v11994_v18 = vld [vmem:[#allocation37_spill] sm:$0xff]  ;;  %v11997_v48 = vld [vmem:[#allocation10_spill] sm:$0xff]  ;;  %v11998_v22 = vld [vmem:[#allocation19_spill] sm:$0xff] }
 0x605   :  { %5091 = vmatprep.mubr.f32.mxu0 %v11755_v35  ;;  %6081 = vmatprep.mubr.f32.mxu1 %v11755_v35  ;;  %v5107_v4 = vand.u32 4294901760, %v5106_v40  ;;  %v11981_v40 = vld [vmem:[#allocation31_spill] sm:$0xff]  ;;  %v11999_v23 = vld [vmem:[#allocation22_spill] sm:$0xff] }
 0x606   :  { %v12002_v7 = vld [vmem:[#allocation26_spill] sm:$0xff] }
 0x607   :  { %v12004_v13 = vld [vmem:[#allocation34_spill] sm:$0xff] }
 0x608   :  { %5097 = vmatmul.mubr.f32.gmra.mrb[92].mxu0 %v5096_v3  ;;  %6087 = vmatmul.mubr.f32.gmra.mrb[92].mxu1 %v5096_v3  ;;  %v11980_v3 = vpack.c.bf16 %v10763_v12, %v10696_v21  ;;  %v11985_v21 = vpack.c.bf16 %v10847_v50, %v10784_v10  ;;  %v11986_v12 = vld [vmem:[#allocation32_spill] sm:$0xff]  ;;  %v11989_v50 = vpack.c.bf16 %v10925_v28, %v10860_v63  ;;  %v12000_v63 = vld [vmem:[#allocation33_spill] sm:$0xff]  ;;  %v12005_v2 = vld [vmem:[#allocation38_spill] sm:$0xff] }
 0x609   :  { %5102 = vmatprep.mubr.f32.mxu0 %v11755_v35  ;;  %6092 = vmatprep.mubr.f32.mxu1 %v11755_v35  ;;  %v11990_v10 = vpack.c.bf16 %v10927_v57, %v10878_v32  ;;  %v11996_v57 = vld [vmem:[#allocation11_spill] sm:$0xff]  ;;  %v12003_v28 = vld [vmem:[#allocation44_spill] sm:$0xff] }
 0x60a   :  { %v12001_v32 = vld [vmem:[#allocation23_spill] sm:$0xff] }
 0x60c   :  { %5108 = vmatmul.mubr.f32.gmra.mrb[94].mxu0 %v5107_v4  ;;  %6098 = vmatmul.mubr.f32.gmra.mrb[94].mxu1 %v5107_v4  ;;  %v12010_v4 = vld [vmem:[#allocation45_spill] sm:$0xff] }
 0x60d   :  { %5258 = vmatprep.mubr.f32.mxu0 %v11755_v35  ;;  %6248 = vmatprep.mubr.f32.mxu1 %v11755_v35 }
 0x610   :  { %5260 = vmatmul.mubr.f32.vlgmr.msra.gmra.mrb[80].mxu0 %v11976_v30  ;;  %6250 = vmatmul.mubr.f32.vlgmr.msra.gmra.mrb[80].mxu1 %v11976_v30 }
 0x611   :  { %7680 = vmatpush1.bf16.msra.mxu0 %v11977_v14  ;;  %7776 = vmatpush1.bf16.msra.mxu1 %v11978_v43  ;;  %v12011_v14 = vld [vmem:[#allocation47_spill] sm:$0xff] }
 0x612   :  { %7682 = vmatprep.subr.bf16.mxu0 %v11979_v60  ;;  %7778 = vmatprep.subr.bf16.mxu1 %v11980_v3 }
 0x613   :  { %5265 = vmatprep.mubr.f32.mxu0 %v11755_v35  ;;  %6255 = vmatprep.mubr.f32.mxu1 %v11755_v35 }
 0x614   :  { %5267 = vmatmul.mubr.f32.gmra.mrb[82].mxu0 %v11981_v40  ;;  %6257 = vmatmul.mubr.f32.gmra.mrb[82].mxu1 %v11981_v40 }
 0x615   :  { %7684 = vmatpush1.bf16.msra.mxu0 %v11982_v26  ;;  %7780 = vmatpush1.bf16.msra.mxu1 %v11983_v6 }
 0x616   :  { %7686 = vmatprep.subr.bf16.mxu0 %v11984_v29  ;;  %7782 = vmatprep.subr.bf16.mxu1 %v11985_v21 }
 0x617   :  { %5272 = vmatprep.mubr.f32.mxu0 %v11755_v35  ;;  %6262 = vmatprep.mubr.f32.mxu1 %v11755_v35 }
 0x618   :  { %5274 = vmatmul.mubr.f32.gmra.mrb[84].mxu0 %v11986_v12  ;;  %6264 = vmatmul.mubr.f32.gmra.mrb[84].mxu1 %v11986_v12 }
 0x619   :  { %7688 = vmatpush1.bf16.msra.mxu0 %v11987_v38  ;;  %7784 = vmatpush1.bf16.msra.mxu1 %v11988_v20 }
 0x61a   :  { %7690 = vmatprep.subr.bf16.mxu0 %v11989_v50  ;;  %7786 = vmatprep.subr.bf16.mxu1 %v11990_v10 }
 0x61b   :  { %5279 = vmatprep.mubr.f32.mxu0 %v11755_v35  ;;  %6269 = vmatprep.mubr.f32.mxu1 %v11755_v35 }
 0x61c   :  { %5281 = vmatmul.mubr.f32.gmra.mrb[86].mxu0 %v11991_v27  ;;  %6271 = vmatmul.mubr.f32.gmra.mrb[86].mxu1 %v11991_v27 }
 0x61d   :  { %7692 = vmatpush1.bf16.msra.mxu0 %v11992_v0  ;;  %7788 = vmatpush1.bf16.msra.mxu1 %v11993_v11 }
 0x61e   :  { %7694 = vmatprep.subr.bf16.mxu0 %v11994_v18  ;;  %7790 = vmatprep.subr.bf16.mxu1 %v11995_v62 }
 0x61f   :  { %5286 = vmatprep.mubr.f32.mxu0 %v11755_v35  ;;  %6276 = vmatprep.mubr.f32.mxu1 %v11755_v35 }
 0x620   :  { %5288 = vmatmul.mubr.f32.gmra.mrb[88].mxu0 %v11996_v57  ;;  %6278 = vmatmul.mubr.f32.gmra.mrb[88].mxu1 %v11996_v57 }
 0x621   :  { %5293 = vmatprep.mubr.f32.mxu0 %v11755_v35  ;;  %6283 = vmatprep.mubr.f32.mxu1 %v11755_v35 }
 0x624   :  { %5295 = vmatmul.mubr.f32.gmra.mrb[90].mxu0 %v11997_v48  ;;  %6285 = vmatmul.mubr.f32.gmra.mrb[90].mxu1 %v11997_v48 }
 0x625   :  { %5300 = vmatprep.mubr.f32.mxu0 %v11755_v35  ;;  %6290 = vmatprep.mubr.f32.mxu1 %v11755_v35 }
 0x628   :  { %5302 = vmatmul.mubr.f32.gmra.mrb[92].mxu0 %v11998_v22  ;;  %6292 = vmatmul.mubr.f32.gmra.mrb[92].mxu1 %v11998_v22 }
 0x629   :  { %5307 = vmatprep.mubr.f32.mxu0 %v11755_v35  ;;  %6297 = vmatprep.mubr.f32.mxu1 %v11755_v35 }
 0x62c   :  { %5309 = vmatmul.mubr.f32.gmra.mrb[94].mxu0 %v11999_v23  ;;  %6299 = vmatmul.mubr.f32.gmra.mrb[94].mxu1 %v11999_v23 }
 0x62d   :  { %5411 = vmatprep.mubr.f32.mxu0 %v11755_v35  ;;  %6401 = vmatprep.mubr.f32.mxu1 %v11755_v35 }
 0x630   :  { %5414 = vmatmul.mubr.f32.vlgmr.msra.gmra.mrb[80].mxu0 %v12000_v63  ;;  %6404 = vmatmul.mubr.f32.vlgmr.msra.gmra.mrb[80].mxu1 %v12000_v63 }
 0x631   :  { %7696 = vmatpush1.bf16.msra.mxu0 %v12001_v32  ;;  %7792 = vmatpush1.bf16.msra.mxu1 %v12002_v7 }
 0x632   :  { %7698 = vmatprep.subr.bf16.mxu0 %v10792_v51  ;;  %7794 = vmatprep.subr.bf16.mxu1 %v12003_v28 }
 0x633   :  { %5419 = vmatprep.mubr.f32.mxu0 %v11755_v35  ;;  %6409 = vmatprep.mubr.f32.mxu1 %v11755_v35 }
 0x634   :  { %5422 = vmatmul.mubr.f32.gmra.mrb[82].mxu0 %v12004_v13  ;;  %6412 = vmatmul.mubr.f32.gmra.mrb[82].mxu1 %v12004_v13 }
 0x635   :  { %7700 = vmatpush1.bf16.msra.mxu0 %v12005_v2  ;;  %7796 = vmatpush1.bf16.msra.mxu1 %v12006_v49 }
 0x636   :  { %7702 = vmatprep.subr.bf16.mxu0 %v10865_v16  ;;  %7798 = vmatprep.subr.bf16.mxu1 %v12007_v59 }
 0x637   :  { %5427 = vmatprep.mubr.f32.mxu0 %v11755_v35  ;;  %6417 = vmatprep.mubr.f32.mxu1 %v11755_v35 }
 0x638   :  { %5430 = vmatmul.mubr.f32.gmra.mrb[84].mxu0 %v12008_v54  ;;  %6420 = vmatmul.mubr.f32.gmra.mrb[84].mxu1 %v12008_v54 }
 0x639   :  { %7704 = vmatpush1.bf16.msra.mxu0 %v12009_v55  ;;  %7800 = vmatpush1.bf16.msra.mxu1 %v12010_v4 }
 0x63a   :  { %7706 = vmatprep.subr.bf16.mxu0 %v10929_v19  ;;  %7802 = vmatprep.subr.bf16.mxu1 %v10931_v52 }
 0x63b   :  { %5435 = vmatprep.mubr.f32.mxu0 %v11755_v35  ;;  %6425 = vmatprep.mubr.f32.mxu1 %v11755_v35 }
 0x63c   :  { %5438 = vmatmul.mubr.f32.gmra.mrb[86].mxu0 %v11924_v8  ;;  %6428 = vmatmul.mubr.f32.gmra.mrb[86].mxu1 %v11924_v8  ;;  %v12012_v8 = vld [vmem:[#allocation9_spill] sm:$0xff] }
 0x63d   :  { %7708 = vmatpush1.bf16.msra.mxu0 %v10869_v58  ;;  %7804 = vmatpush1.bf16.msra.mxu1 %v12011_v14 }
 0x63e   :  { %7710 = vmatprep.subr.bf16.mxu0 %v11043_v42  ;;  %7806 = vmatprep.subr.bf16.mxu1 %v11049_v61  ;;  %v12013_v42 = vld [vmem:[#allocation12_spill] sm:$0xff]  ;;  %v12014_v61 = vld [vmem:[#allocation6_spill] sm:$0xff] }
 0x63f   :  { %5443 = vmatprep.mubr.f32.mxu0 %v11755_v35  ;;  %6433 = vmatprep.mubr.f32.mxu1 %v11755_v35 }
 0x640   :  { %5446 = vmatmul.mubr.f32.gmra.mrb[88].mxu0 %v11943_v47  ;;  %6436 = vmatmul.mubr.f32.gmra.mrb[88].mxu1 %v11943_v47 }
 0x641   :  { %5451 = vmatprep.mubr.f32.mxu0 %v11755_v35  ;;  %6441 = vmatprep.mubr.f32.mxu1 %v11755_v35 }
 0x644   :  { %5454 = vmatmul.mubr.f32.gmra.mrb[90].mxu0 %v11972_v46  ;;  %6444 = vmatmul.mubr.f32.gmra.mrb[90].mxu1 %v11972_v46 }
 0x645   :  { %5459 = vmatprep.mubr.f32.mxu0 %v11755_v35  ;;  %6449 = vmatprep.mubr.f32.mxu1 %v11755_v35 }
 0x648   :  { %5462 = vmatmul.mubr.f32.gmra.mrb[92].mxu0 %v11956_v31  ;;  %6452 = vmatmul.mubr.f32.gmra.mrb[92].mxu1 %v11956_v31 }
 0x649   :  { %5467 = vmatprep.mubr.f32.mxu0 %v11755_v35  ;;  %6457 = vmatprep.mubr.f32.mxu1 %v11755_v35 }
 0x64c   :  { %5470 = vmatmul.mubr.f32.gmra.mrb[94].mxu0 %v11975_v45  ;;  %6460 = vmatmul.mubr.f32.gmra.mrb[94].mxu1 %v11975_v45 }
 0x64d   :  { %5556 = vmatprep.mubr.f32.mxu0 %v11755_v35  ;;  %6546 = vmatprep.mubr.f32.mxu1 %v11755_v35 }
 0x650   :  { %5560 = vmatmul.mubr.f32.vlgmr.msra.gmra.mrb[80].mxu0 %v12012_v8  ;;  %6550 = vmatmul.mubr.f32.vlgmr.msra.gmra.mrb[80].mxu1 %v12012_v8 }
 0x651   :  { %7712 = vmatpush1.bf16.msra.mxu0 %v11055_v25  ;;  %7808 = vmatpush1.bf16.msra.mxu1 %v11061_v24  ;;  %v12015_v25 = vld [vmem:[#allocation17_spill] sm:$0xff] }
 0x652   :  { %7714 = vmatprep.subr.bf16.mxu0 %v11067_v1  ;;  %7810 = vmatprep.subr.bf16.mxu1 %v11073_v53 }
 0x653   :  { %5565 = vmatprep.mubr.f32.mxu0 %v11755_v35  ;;  %6555 = vmatprep.mubr.f32.mxu1 %v11755_v35 }
 0x654   :  { %5569 = vmatmul.mubr.f32.gmra.mrb[82].mxu0 %v12013_v42  ;;  %6559 = vmatmul.mubr.f32.gmra.mrb[82].mxu1 %v12013_v42 }
 0x655   :  { %7716 = vmatpush1.bf16.msra.mxu0 %v11084_v34  ;;  %7812 = vmatpush1.bf16.msra.mxu1 %v11090_v37 }
 0x656   :  { %7718 = vmatprep.subr.bf16.mxu0 %v11096_v5  ;;  %7814 = vmatprep.subr.bf16.mxu1 %v11105_v17  ;;  %v12016_v17 = vld [vmem:[#allocation14_spill] sm:$0xff]  ;;  %v12017_v5 = vld [vmem:[#allocation16_spill] sm:$0xff] }
 0x657   :  { %5574 = vmatprep.mubr.f32.mxu0 %v11755_v35  ;;  %6564 = vmatprep.mubr.f32.mxu1 %v11755_v35 }
 0x658   :  { %5578 = vmatmul.mubr.f32.gmra.mrb[84].mxu0 %v12014_v61  ;;  %6568 = vmatmul.mubr.f32.gmra.mrb[84].mxu1 %v12014_v61 }
 0x659   :  { %7720 = vmatpush1.bf16.msra.mxu0 %v12015_v25  ;;  %7816 = vmatpush1.bf16.msra.mxu1 %v11117_v33 }
 0x65a   :  { %7722 = vmatprep.subr.bf16.mxu0 %v11123_v39  ;;  %7818 = vmatprep.subr.bf16.mxu1 %v11129_v9 }
 0x65b   :  { %5583 = vmatprep.mubr.f32.mxu0 %v11755_v35  ;;  %6573 = vmatprep.mubr.f32.mxu1 %v11755_v35 }
 0x65c   :  { %5587 = vmatmul.mubr.f32.gmra.mrb[86].mxu0 %v12016_v17  ;;  %6577 = vmatmul.mubr.f32.gmra.mrb[86].mxu1 %v12016_v17 }
 0x65d   :  { %7724 = vmatpush1.bf16.msra.mxu0 %v11135_v41  ;;  %7820 = vmatpush1.bf16.msra.mxu1 %v11141_v56 }
 0x65e   :  { %7726 = vmatprep.subr.bf16.mxu0 %v11994_v18  ;;  %7822 = vmatprep.subr.bf16.mxu1 %v11995_v62 }
 0x65f   :  { %5592 = vmatprep.mubr.f32.mxu0 %v11755_v35  ;;  %6582 = vmatprep.mubr.f32.mxu1 %v11755_v35 }
 0x660   :  { %5596 = vmatmul.mubr.f32.gmra.mrb[88].mxu0 %v12017_v5  ;;  %6586 = vmatmul.mubr.f32.gmra.mrb[88].mxu1 %v12017_v5 }
 0x661   :  { %5601 = vmatprep.mubr.f32.mxu0 %v11755_v35  ;;  %6591 = vmatprep.mubr.f32.mxu1 %v11755_v35 }
 0x664   :  { %5605 = vmatmul.mubr.f32.gmra.mrb[90].mxu0 %v11973_v36  ;;  %6595 = vmatmul.mubr.f32.gmra.mrb[90].mxu1 %v11973_v36 }
 0x665   :  { %5610 = vmatprep.mubr.f32.mxu0 %v11755_v35  ;;  %6600 = vmatprep.mubr.f32.mxu1 %v11755_v35 }
 0x668   :  { %5614 = vmatmul.mubr.f32.gmra.mrb[92].mxu0 %v11099_v15  ;;  %6604 = vmatmul.mubr.f32.gmra.mrb[92].mxu1 %v11099_v15 }
 0x669   :  { %5619 = vmatprep.mubr.f32.mxu0 %v11755_v35  ;;  %6609 = vmatprep.mubr.f32.mxu1 %v11755_v35 }
 0x66c   :  { %5623 = vmatmul.mubr.f32.gmra.mrb[94].mxu0 %v11151_v44  ;;  %6613 = vmatmul.mubr.f32.gmra.mrb[94].mxu1 %v11151_v44 }
 0x66d   :  { %5741 = vmatprep.mubr.f32.mxu0 %v11755_v35  ;;  %6731 = vmatprep.mubr.f32.mxu1 %v11755_v35 }
 0x670   :  { %5743 = vmatmul.mubr.f32.vlgmr.msra.gmra.mrb[80].mxu0 %v11976_v30  ;;  %6733 = vmatmul.mubr.f32.vlgmr.msra.gmra.mrb[80].mxu1 %v11976_v30 }
 0x671   :  { %7728 = vmatpush1.bf16.msra.mxu0 %v12001_v32  ;;  %7824 = vmatpush1.bf16.msra.mxu1 %v12002_v7 }
 0x672   :  { %7730 = vmatprep.subr.bf16.mxu0 %v10792_v51  ;;  %7826 = vmatprep.subr.bf16.mxu1 %v12003_v28 }
 0x673   :  { %5748 = vmatprep.mubr.f32.mxu0 %v11755_v35  ;;  %6738 = vmatprep.mubr.f32.mxu1 %v11755_v35 }
 0x674   :  { %5750 = vmatmul.mubr.f32.gmra.mrb[82].mxu0 %v11981_v40  ;;  %6740 = vmatmul.mubr.f32.gmra.mrb[82].mxu1 %v11981_v40 }
 0x675   :  { %7732 = vmatpush1.bf16.msra.mxu0 %v12005_v2  ;;  %7828 = vmatpush1.bf16.msra.mxu1 %v12006_v49 }
 0x676   :  { %7734 = vmatprep.subr.bf16.mxu0 %v10865_v16  ;;  %7830 = vmatprep.subr.bf16.mxu1 %v12007_v59 }
 0x677   :  { %5755 = vmatprep.mubr.f32.mxu0 %v11755_v35  ;;  %6745 = vmatprep.mubr.f32.mxu1 %v11755_v35 }
 0x678   :  { %5757 = vmatmul.mubr.f32.gmra.mrb[84].mxu0 %v11986_v12  ;;  %6747 = vmatmul.mubr.f32.gmra.mrb[84].mxu1 %v11986_v12 }
 0x679   :  { %7736 = vmatpush1.bf16.msra.mxu0 %v12009_v55  ;;  %7832 = vmatpush1.bf16.msra.mxu1 %v12010_v4 }
 0x67a   :  { %7738 = vmatprep.subr.bf16.mxu0 %v10929_v19  ;;  %7834 = vmatprep.subr.bf16.mxu1 %v10931_v52 }
 0x67b   :  { %5762 = vmatprep.mubr.f32.mxu0 %v11755_v35  ;;  %6752 = vmatprep.mubr.f32.mxu1 %v11755_v35 }
 0x67c   :  { %5764 = vmatmul.mubr.f32.gmra.mrb[86].mxu0 %v11991_v27  ;;  %6754 = vmatmul.mubr.f32.gmra.mrb[86].mxu1 %v11991_v27 }
 0x67d   :  { %7740 = vmatpush1.bf16.msra.mxu0 %v10869_v58  ;;  %7836 = vmatpush1.bf16.msra.mxu1 %v12011_v14 }
 0x67e   :  { %5769 = vmatprep.mubr.f32.mxu0 %v11755_v35  ;;  %6759 = vmatprep.mubr.f32.mxu1 %v11755_v35 }
 0x680   :  { %5771 = vmatmul.mubr.f32.gmra.mrb[88].mxu0 %v11996_v57  ;;  %6761 = vmatmul.mubr.f32.gmra.mrb[88].mxu1 %v11996_v57 }
 0x681   :  { %5776 = vmatprep.mubr.f32.mxu0 %v11755_v35  ;;  %6766 = vmatprep.mubr.f32.mxu1 %v11755_v35 }
 0x684   :  { %5778 = vmatmul.mubr.f32.gmra.mrb[90].mxu0 %v11997_v48  ;;  %6768 = vmatmul.mubr.f32.gmra.mrb[90].mxu1 %v11997_v48 }
 0x685   :  { %5783 = vmatprep.mubr.f32.mxu0 %v11755_v35  ;;  %6773 = vmatprep.mubr.f32.mxu1 %v11755_v35 }
 0x688   :  { %5785 = vmatmul.mubr.f32.gmra.mrb[92].mxu0 %v11998_v22  ;;  %6775 = vmatmul.mubr.f32.gmra.mrb[92].mxu1 %v11998_v22 }
 0x689   :  { %5790 = vmatprep.mubr.f32.mxu0 %v11755_v35  ;;  %6780 = vmatprep.mubr.f32.mxu1 %v11755_v35 }
 0x68c   :  { %5792 = vmatmul.mubr.f32.gmra.mrb[94].mxu0 %v11999_v23  ;;  %6782 = vmatmul.mubr.f32.gmra.mrb[94].mxu1 %v11999_v23 }
 0x68d   :  { %5878 = vmatprep.mubr.f32.mxu0 %v11755_v35  ;;  %6868 = vmatprep.mubr.f32.mxu1 %v11755_v35 }
 0x690   :  { %5880 = vmatmul.mubr.f32.vlgmr.msra.gmra.mrb[80].mxu0 %v11976_v30  ;;  %6870 = vmatmul.mubr.f32.vlgmr.msra.gmra.mrb[80].mxu1 %v11976_v30 }
 0x691   :  { %5885 = vmatprep.mubr.f32.mxu0 %v11755_v35  ;;  %6875 = vmatprep.mubr.f32.mxu1 %v11755_v35 }
 0x694   :  { %5887 = vmatmul.mubr.f32.gmra.mrb[82].mxu0 %v11981_v40  ;;  %6877 = vmatmul.mubr.f32.gmra.mrb[82].mxu1 %v11981_v40 }
 0x695   :  { %5892 = vmatprep.mubr.f32.mxu0 %v11755_v35  ;;  %6882 = vmatprep.mubr.f32.mxu1 %v11755_v35 }
 0x698   :  { %5894 = vmatmul.mubr.f32.gmra.mrb[84].mxu0 %v11986_v12  ;;  %6884 = vmatmul.mubr.f32.gmra.mrb[84].mxu1 %v11986_v12 }
 0x699   :  { %5899 = vmatprep.mubr.f32.mxu0 %v11755_v35  ;;  %6889 = vmatprep.mubr.f32.mxu1 %v11755_v35 }
 0x69c   :  { %5901 = vmatmul.mubr.f32.gmra.mrb[86].mxu0 %v11991_v27  ;;  %6891 = vmatmul.mubr.f32.gmra.mrb[86].mxu1 %v11991_v27 }
 0x69d   :  { %5906 = vmatprep.mubr.f32.mxu0 %v11755_v35  ;;  %6896 = vmatprep.mubr.f32.mxu1 %v11755_v35 }
 0x6a0   :  { %5908 = vmatmul.mubr.f32.gmra.mrb[88].mxu0 %v11996_v57  ;;  %6898 = vmatmul.mubr.f32.gmra.mrb[88].mxu1 %v11996_v57 }
 0x6a1   :  { %5913 = vmatprep.mubr.f32.mxu0 %v11755_v35  ;;  %6903 = vmatprep.mubr.f32.mxu1 %v11755_v35 }
 0x6a4   :  { %5915 = vmatmul.mubr.f32.gmra.mrb[90].mxu0 %v11997_v48  ;;  %6905 = vmatmul.mubr.f32.gmra.mrb[90].mxu1 %v11997_v48 }
 0x6a5   :  { %5920 = vmatprep.mubr.f32.mxu0 %v11755_v35  ;;  %6910 = vmatprep.mubr.f32.mxu1 %v11755_v35 }
 0x6a8   :  { %5922 = vmatmul.mubr.f32.gmra.mrb[92].mxu0 %v11998_v22  ;;  %6912 = vmatmul.mubr.f32.gmra.mrb[92].mxu1 %v11998_v22 }
 0x6a9   :  { %5927 = vmatprep.mubr.f32.mxu0 %v11755_v35  ;;  %6917 = vmatprep.mubr.f32.mxu1 %v11755_v35 }
 0x6ac   :  { %5929 = vmatmul.mubr.f32.gmra.mrb[94].mxu0 %v11999_v23  ;;  %6919 = vmatmul.mubr.f32.gmra.mrb[94].mxu1 %v11999_v23 }
 0x763   :  { %v11411_v51 = vpop.f32.mrb[80].mxu0  ;;  %v11413_v58 = vpop.f32.mrb[80].mxu1 }
 0x764   :  { %v6957_v16 = vmin.f32 %v11411_v51, 0.0  ;;  %v6959_v52 = vmin.f32 %v11413_v58, 0.0  ;;  %v11417_v19 = vpop.f32.mrb[81].mxu0  ;;  %v11419_v15 = vpop.f32.mrb[81].mxu1  ;;  %vm6925_vm3 = vcmp.gt.f32.partialorder %v11411_v51, 0.0  ;;  %vm6927_vm4 = vcmp.gt.f32.partialorder %v11413_v58, 0.0 }
 0x765   :  { %v6958_v24 = vmin.f32 %v11417_v19, 0.0  ;;  %v6960_v35 = vmin.f32 %v11419_v15, 0.0  ;;  %vm6926_vm5 = vcmp.gt.f32.partialorder %v11417_v19, 0.0  ;;  %vm6928_vm6 = vcmp.gt.f32.partialorder %v11419_v15, 0.0 }
 0x766   :  { %v6989_v1 = vmul.f32 1.442695, %v6957_v16  ;;  %v6993_v53 = vmul.f32 1.442695, %v6959_v52 }
 0x767   :  { %v6991_v47 = vmul.f32 1.442695, %v6958_v24  ;;  %v6995_v34 = vmul.f32 1.442695, %v6960_v35  ;;  %v11423_v37 = vpop.f32.mrb[82].mxu0  ;;  %v11425_v31 = vpop.f32.mrb[82].mxu1 }
 0x768   :  { %8516 = vpow2.f32 %v6989_v1  ;;  %v6961_v33 = vmin.f32 %v11423_v37, 0.0  ;;  %v11428_v39 = vpop.f32.mrb[83].mxu0  ;;  %v11430_v9 = vpop.f32.mrb[83].mxu1  ;;  %v6963_v41 = vmin.f32 %v11425_v31, 0.0  ;;  %vm6929_vm7 = vcmp.gt.f32.partialorder %v11423_v37, 0.0 }
 0x769   :  { %8518 = vpow2.f32 %v6993_v53  ;;  %v6962_v56 = vmin.f32 %v11428_v39, 0.0  ;;  %v6964_v36 = vmin.f32 %v11430_v9, 0.0  ;;  %vm6931_vm8 = vcmp.gt.f32.partialorder %v11425_v31, 0.0 }
 0x76a   :  { %8520 = vpow2.f32 %v6991_v47  ;;  %v6997_v46 = vmul.f32 1.442695, %v6961_v33  ;;  %v7001_v45 = vmul.f32 1.442695, %v6963_v41  ;;  %vm6930_vm9 = vcmp.gt.f32.partialorder %v11428_v39, 0.0 }
 0x76b   :  { %8522 = vpow2.f32 %v6995_v34  ;;  %v6999_v44 = vmul.f32 1.442695, %v6962_v56  ;;  %v11435_v30 = vpop.f32.mrb[84].mxu0  ;;  %v11437_v43 = vpop.f32.mrb[84].mxu1  ;;  %v7003_v60 = vmul.f32 1.442695, %v6964_v36 }
 0x76c   :  { %8524 = vpow2.f32 %v6997_v46  ;;  %v6965_v3 = vmin.f32 %v11435_v30, 0.0  ;;  %v11440_v40 = vpop.f32.mrb[85].mxu0  ;;  %v11442_v26 = vpop.f32.mrb[85].mxu1  ;;  %v6967_v6 = vmin.f32 %v11437_v43, 0.0  ;;  %vm6932_vm10 = vcmp.gt.f32.partialorder %v11430_v9, 0.0 }
 0x76d   :  { %8526 = vpow2.f32 %v7001_v45  ;;  %v6966_v21 = vmin.f32 %v11440_v40, 0.0  ;;  %v6968_v38 = vmin.f32 %v11442_v26, 0.0  ;;  %vm6933_vm11 = vcmp.gt.f32.partialorder %v11435_v30, 0.0 }
 0x76e   :  { %8528 = vpow2.f32 %v6999_v44  ;;  %v7005_v29 = vmul.f32 1.442695, %v6965_v3  ;;  %v7009_v12 = vmul.f32 1.442695, %v6967_v6  ;;  %vm6935_vm12 = vcmp.gt.f32.partialorder %v11437_v43, 0.0 }
 0x76f   :  { %8530 = vpow2.f32 %v7003_v60  ;;  %v11451_v20 = vpop.f32.mrb[86].mxu0  ;;  %v11453_v50 = vpop.f32.mrb[86].mxu1  ;;  %v7007_v10 = vmul.f32 1.442695, %v6966_v21  ;;  %v7011_v18 = vmul.f32 1.442695, %v6968_v38 }
 0x770   :  { %8532 = vpow2.f32 %v7005_v29  ;;  %v6969_v27 = vmin.f32 %v11451_v20, 0.0  ;;  %v11457_v0 = vpop.f32.mrb[87].mxu0  ;;  %v11459_v11 = vpop.f32.mrb[87].mxu1  ;;  %v6971_v62 = vmin.f32 %v11453_v50, 0.0  ;;  %vm6934_vm13 = vcmp.gt.f32.partialorder %v11440_v40, 0.0 }
 0x771   :  { %8534 = vpow2.f32 %v7009_v12  ;;  %v6970_v22 = vmin.f32 %v11457_v0, 0.0  ;;  %v6972_v59 = vmin.f32 %v11459_v11, 0.0  ;;  %vm6936_vm14 = vcmp.gt.f32.partialorder %v11442_v26, 0.0 }
 0x772   :  { %v8517_v57 = vpop.eup %8516  ;;  %8536 = vpow2.f32 %v7007_v10  ;;  %v7013_v48 = vmul.f32 1.442695, %v6969_v27  ;;  %v7017_v32 = vmul.f32 1.442695, %v6971_v62  ;;  %vm6937_vm15 = vcmp.gt.f32.partialorder %v11451_v20, 0.0 }
 0x773   :  { %v8519_v23 = vpop.eup %8518  ;;  %v7197_v63 = vadd.f32 -1.0, %v8517_v57  ;;  %8538 = vpow2.f32 %v7011_v18  ;;  %v11466_v7 = vpop.f32.mrb[88].mxu0  ;;  %v7015_v49 = vmul.f32 1.442695, %v6970_v22  ;;  %v7019_v17 = vmul.f32 1.442695, %v6972_v59 }
 0x774   :  { %v11468_v28 = vpop.f32.mrb[88].mxu1  ;;  %v8521_v13 = vpop.eup %8520  ;;  %v7199_v2 = vadd.f32 -1.0, %v8519_v23  ;;  %8540 = vpow2.f32 %v7013_v48  ;;  %v6973_v52 = vmin.f32 %v11466_v7, 0.0  ;;  %vm6939_vm1 = vcmp.gt.f32.partialorder %v11453_v50, 0.0 }
 0x775   :  { %v11471_v54 = vpop.f32.mrb[89].mxu0  ;;  %v11473_v55 = vpop.f32.mrb[89].mxu1  ;;  %v7085_v14 = vsel %vm6925_vm3, %v11411_v51, %v7197_v63  ;;  %v7198_v8 = vadd.f32 -1.0, %v8521_v13  ;;  %8542 = vpow2.f32 %v7017_v32  ;;  %v6975_v47 = vmin.f32 %v11468_v28, 0.0 }
 0x776   :  { %v8523_v4 = vpop.eup %8522  ;;  %7117 = vst [vmem:[#allocation2] sm:$0xff] %v7085_v14  ;;  %v7087_v61 = vsel %vm6927_vm4, %v11413_v58, %v7199_v2  ;;  %8544 = vpow2.f32 %v7015_v49  ;;  %v7021_v46 = vmul.f32 1.442695, %v6973_v52  ;;  %v6974_v60 = vmin.f32 %v11471_v54, 0.0 }
 0x777   :  { %v8525_v42 = vpop.eup %8524  ;;  %v7200_v25 = vadd.f32 -1.0, %v8523_v4  ;;  %7119 = vst [vmem:[#allocation2 + $0x10] sm:$0xff] %v7087_v61  ;;  %v7086_v16 = vsel %vm6926_vm5, %v11417_v19, %v7198_v8  ;;  %v11487_v24 = vpop.f32.mrb[90].mxu0  ;;  %8546 = vpow2.f32 %v7019_v17  ;;  %v7025_v44 = vmul.f32 1.442695, %v6975_v47 }
 0x778   :  { %v8527_v5 = vpop.eup %8526  ;;  %v7201_v51 = vadd.f32 -1.0, %v8525_v42  ;;  %v11489_v35 = vpop.f32.mrb[90].mxu1  ;;  %7118 = vst [vmem:[#allocation2 + $0x8] sm:$0xff] %v7086_v16  ;;  %8548 = vpow2.f32 %v7021_v46  ;;  %v7023_v10 = vmul.f32 1.442695, %v6974_v60  ;;  %v6976_v48 = vmin.f32 %v11473_v55, 0.0 }
 0x779   :  { %v8529_v1 = vpop.eup %8528  ;;  %v7088_v58 = vsel %vm6928_vm6, %v11419_v15, %v7200_v25  ;;  %v7203_v53 = vadd.f32 -1.0, %v8527_v5  ;;  %v11495_v19 = vpop.f32.mrb[91].mxu0  ;;  %8550 = vpow2.f32 %v7025_v44  ;;  %v6977_v63 = vmin.f32 %v11487_v24, 0.0 }
 0x77a   :  { %v11497_v34 = vpop.f32.mrb[91].mxu1  ;;  %v8531_v33 = vpop.eup %8530  ;;  %7120 = vst [vmem:[#allocation2 + $0x18] sm:$0xff] %v7088_v58  ;;  %v7089_v41 = vsel %vm6929_vm7, %v11423_v37, %v7201_v51  ;;  %v7202_v56 = vadd.f32 -1.0, %v8529_v1  ;;  %8552 = vpow2.f32 %v7023_v10  ;;  %v7027_v2 = vmul.f32 1.442695, %v6976_v48 }
 0x77b   :  { %v8533_v36 = vpop.eup %8532  ;;  %7121 = vst [vmem:[#allocation2 + $0x20] sm:$0xff] %v7089_v41  ;;  %v7091_v15 = vsel %vm6931_vm8, %v11425_v31, %v7203_v53  ;;  %v7204_v45 = vadd.f32 -1.0, %v8531_v33  ;;  %v11511_v29 = vpop.f32.mrb[92].mxu0  ;;  %v7029_v8 = vmul.f32 1.442695, %v6977_v63  ;;  %v6979_v42 = vmin.f32 %v11489_v35, 0.0 }
 0x77c   :  { %v8535_v3 = vpop.eup %8534  ;;  %7123 = vst [vmem:[#allocation2 + $0x30] sm:$0xff] %v7091_v15  ;;  %v7090_v37 = vsel %vm6930_vm9, %v11428_v39, %v7202_v56  ;;  %v7205_v6 = vadd.f32 -1.0, %v8533_v36  ;;  %v11513_v21 = vpop.f32.mrb[92].mxu1  ;;  %vm6938_vm2 = vcmp.gt.f32.partialorder %v11457_v0, 0.0  ;;  %8554 = vpow2.f32 %v7027_v2 }
 0x77d   :  { %v8537_v12 = vpop.eup %8536  ;;  %7122 = vst [vmem:[#allocation2 + $0x28] sm:$0xff] %v7090_v37  ;;  %v7092_v31 = vsel %vm6932_vm10, %v11430_v9, %v7204_v45  ;;  %v7207_v38 = vadd.f32 -1.0, %v8535_v3  ;;  %v11518_v27 = vpop.f32.mrb[93].mxu0  ;;  %8556 = vpow2.f32 %v7029_v8  ;;  %v7033_v16 = vmul.f32 1.442695, %v6979_v42 }
 0x77e   :  { %v11520_v39 = vpop.f32.mrb[93].mxu1  ;;  %v8539_v18 = vpop.eup %8538  ;;  %7124 = vst [vmem:[#allocation2 + $0x38] sm:$0xff] %v7092_v31  ;;  %v7093_v62 = vsel %vm6933_vm11, %v11435_v30, %v7205_v6  ;;  %v7206_v57 = vadd.f32 -1.0, %v8537_v12  ;;  %v6978_v51 = vmin.f32 %v11495_v19, 0.0  ;;  %vm6940_vm0 = vcmp.gt.f32.partialorder %v11459_v11, 0.0 }
 0x77f   :  { %v8541_v22 = vpop.eup %8540  ;;  %7125 = vst [vmem:[#allocation2 + $0x40] sm:$0xff] %v7093_v62  ;;  %v7095_v9 = vsel %vm6935_vm12, %v11437_v43, %v7207_v38  ;;  %v7208_v23 = vadd.f32 -1.0, %v8539_v18  ;;  %v11535_v49 = vpop.f32.mrb[94].mxu0  ;;  %8558 = vpow2.f32 %v7033_v16  ;;  %v6981_v53 = vmin.f32 %v11511_v29, 0.0 }
 0x780   :  { %v8543_v32 = vpop.eup %8542  ;;  %7127 = vst [vmem:[#allocation2 + $0x50] sm:$0xff] %v7095_v9  ;;  %v7094_v30 = vsel %vm6934_vm13, %v11440_v40, %v7206_v57  ;;  %v7209_v13 = vadd.f32 -1.0, %v8541_v22  ;;  %v11537_v59 = vpop.f32.mrb[94].mxu1  ;;  %v7031_v58 = vmul.f32 1.442695, %v6978_v51  ;;  %v6983_v41 = vmin.f32 %v11513_v21, 0.0 }
 0x781   :  { %v8545_v4 = vpop.eup %8544  ;;  %7126 = vst [vmem:[#allocation2 + $0x48] sm:$0xff] %v7094_v30  ;;  %v7096_v43 = vsel %vm6936_vm14, %v11442_v26, %v7208_v23  ;;  %v7211_v14 = vadd.f32 -1.0, %v8543_v32  ;;  %v11543_v61 = vpop.f32.mrb[95].mxu0  ;;  %vm6941_vm3 = vcmp.gt.f32.partialorder %v11466_v7, 0.0  ;;  %v7037_v46 = vmul.f32 1.442695, %v6981_v53 }
 0x782   :  { %v11545_v40 = vpop.f32.mrb[95].mxu1  ;;  %7128 = vst [vmem:[#allocation2 + $0x58] sm:$0xff] %v7096_v43  ;;  %v7097_v25 = vsel %vm6937_vm15, %v11451_v20, %v7209_v13  ;;  %v7210_v17 = vadd.f32 -1.0, %v8545_v4  ;;  %v8547_v5 = vpop.eup %8546  ;;  %v6980_v20 = vmin.f32 %v11497_v34, 0.0  ;;  %8560 = vpow2.f32 %v7031_v58 }
 0x783   :  { %7129 = vst [vmem:[#allocation2 + $0x60] sm:$0xff] %v7097_v25  ;;  %v7099_v26 = vsel %vm6939_vm1, %v11453_v50, %v7211_v14  ;;  %v7212_v1 = vadd.f32 -1.0, %v8547_v5  ;;  %v8549_v47 = vpop.eup %8548  ;;  %v7041_v15 = vmul.f32 1.442695, %v6983_v41  ;;  %v6982_v45 = vmin.f32 %v11518_v27, 0.0 }
 0x784   :  { %7131 = vst [vmem:[#allocation2 + $0x70] sm:$0xff] %v7099_v26  ;;  %v7098_v52 = vsel %vm6938_vm2, %v11457_v0, %v7210_v17  ;;  %v7035_v33 = vmul.f32 1.442695, %v6980_v20  ;;  %v8551_v56 = vpop.eup %8550  ;;  %v7213_v0 = vadd.f32 -1.0, %v8549_v47  ;;  %vm6943_vm4 = vcmp.gt.f32.partialorder %v11468_v28, 0.0 }
 0x785   :  { %7130 = vst [vmem:[#allocation2 + $0x68] sm:$0xff] %v7098_v52  ;;  %v7100_v50 = vsel %vm6940_vm0, %v11459_v11, %v7212_v1  ;;  %v7215_v36 = vadd.f32 -1.0, %v8551_v56  ;;  %v8553_v44 = vpop.eup %8552  ;;  %v6984_v11 = vmin.f32 %v11520_v39, 0.0  ;;  %v7039_v6 = vmul.f32 1.442695, %v6982_v45 }
 0x786   :  { %7132 = vst [vmem:[#allocation2 + $0x78] sm:$0xff] %v7100_v50  ;;  %8562 = vpow2.f32 %v7035_v33  ;;  %v7101_v60 = vsel %vm6941_vm3, %v11466_v7, %v7213_v0  ;;  %v7214_v37 = vadd.f32 -1.0, %v8553_v44  ;;  %vm6942_vm5 = vcmp.gt.f32.partialorder %v11471_v54, 0.0  ;;  %v8555_v38 = vpop.eup %8554 }
 0x787   :  { %8564 = vpow2.f32 %v7037_v46  ;;  %7133 = vst [vmem:[#allocation2 + $0x80] sm:$0xff] %v7101_v60  ;;  %v7103_v3 = vsel %vm6943_vm4, %v11468_v28, %v7215_v36  ;;  %v7043_v12 = vmul.f32 1.442695, %v6984_v11  ;;  %v6985_v31 = vmin.f32 %v11535_v49, 0.0  ;;  %v8557_v18 = vpop.eup %8556 }
 0x788   :  { %8566 = vpow2.f32 %v7041_v15  ;;  %7135 = vst [vmem:[#allocation2 + $0x90] sm:$0xff] %v7103_v3  ;;  %v7102_v7 = vsel %vm6942_vm5, %v11471_v54, %v7214_v37  ;;  %v6987_v10 = vmin.f32 %v11537_v59, 0.0  ;;  %v7216_v62 = vadd.f32 -1.0, %v8555_v38 }
 0x789   :  { %8568 = vpow2.f32 %v7039_v6  ;;  %7134 = vst [vmem:[#allocation2 + $0x88] sm:$0xff] %v7102_v7  ;;  %v7045_v28 = vmul.f32 1.442695, %v6985_v31  ;;  %v6986_v57 = vmin.f32 %v11543_v61, 0.0  ;;  %vm6944_vm6 = vcmp.gt.f32.partialorder %v11473_v55, 0.0  ;;  %v8559_v23 = vpop.eup %8558 }
 0x78a   :  { %8570 = vpow2.f32 %v7043_v12  ;;  %v7217_v48 = vadd.f32 -1.0, %v8557_v18  ;;  %v7049_v22 = vmul.f32 1.442695, %v6987_v10  ;;  %v6988_v9 = vmin.f32 %v11545_v40, 0.0 }
 0x78b   :  { %v7104_v63 = vsel %vm6944_vm6, %v11473_v55, %v7216_v62  ;;  %vm6945_vm7 = vcmp.gt.f32.partialorder %v11487_v24, 0.0  ;;  %8572 = vpow2.f32 %v7045_v28  ;;  %v7047_v54 = vmul.f32 1.442695, %v6986_v57 }
 0x78c   :  { %7136 = vst [vmem:[#allocation2 + $0x98] sm:$0xff] %v7104_v63  ;;  %v7105_v32 = vsel %vm6945_vm7, %v11487_v24, %v7217_v48  ;;  %v7219_v30 = vadd.f32 -1.0, %v8559_v23  ;;  %8574 = vpow2.f32 %v7049_v22  ;;  %v7051_v13 = vmul.f32 1.442695, %v6988_v9  ;;  %v8561_v2 = vpop.eup %8560 }
 0x78d   :  { %7137 = vst [vmem:[#allocation2 + $0xa0] sm:$0xff] %v7105_v32  ;;  %vm6947_vm8 = vcmp.gt.f32.partialorder %v11489_v35, 0.0  ;;  %8576 = vpow2.f32 %v7047_v54  ;;  %v7218_v14 = vadd.f32 -1.0, %v8561_v2  ;;  %vm6946_vm9 = vcmp.gt.f32.partialorder %v11495_v19, 0.0 }
 0x78e   :  { %v7107_v43 = vsel %vm6947_vm8, %v11489_v35, %v7219_v30  ;;  %8578 = vpow2.f32 %v7051_v13  ;;  %vm6948_vm10 = vcmp.gt.f32.partialorder %v11497_v34, 0.0  ;;  %vm6949_vm11 = vcmp.gt.f32.partialorder %v11511_v29, 0.0 }
 0x78f   :  { %7139 = vst [vmem:[#allocation2 + $0xb0] sm:$0xff] %v7107_v43  ;;  %v7106_v24 = vsel %vm6946_vm9, %v11495_v19, %v7218_v14  ;;  %vm6951_vm12 = vcmp.gt.f32.partialorder %v11513_v21, 0.0  ;;  %vm6950_vm13 = vcmp.gt.f32.partialorder %v11518_v27, 0.0  ;;  %vm6952_vm14 = vcmp.gt.f32.partialorder %v11520_v39, 0.0 }
 0x790   :  { %v8563_v4 = vpop.eup %8562  ;;  %7138 = vst [vmem:[#allocation2 + $0xa8] sm:$0xff] %v7106_v24  ;;  %vm6953_vm15 = vcmp.gt.f32.partialorder %v11535_v49, 0.0  ;;  %vm6955_vm1 = vcmp.gt.f32.partialorder %v11537_v59, 0.0  ;;  %vm6954_vm2 = vcmp.gt.f32.partialorder %v11543_v61, 0.0  ;;  %vm6956_vm0 = vcmp.gt.f32.partialorder %v11545_v40, 0.0 }
 0x791   :  { %v8565_v55 = vpop.eup %8564  ;;  %v7220_v8 = vadd.f32 -1.0, %v8563_v4 }
 0x792   :  { %v8567_v42 = vpop.eup %8566  ;;  %v7221_v25 = vadd.f32 -1.0, %v8565_v55 }
 0x793   :  { %v7108_v17 = vsel %vm6948_vm10, %v11497_v34, %v7220_v8  ;;  %v7223_v5 = vadd.f32 -1.0, %v8567_v42  ;;  %v8569_v35 = vpop.eup %8568 }
 0x794   :  { %7140 = vst [vmem:[#allocation2 + $0xb8] sm:$0xff] %v7108_v17  ;;  %v7109_v26 = vsel %vm6949_vm11, %v11511_v29, %v7221_v25  ;;  %v8571_v16 = vpop.eup %8570  ;;  %v7222_v19 = vadd.f32 -1.0, %v8569_v35 }
 0x795   :  { %7141 = vst [vmem:[#allocation2 + $0xc0] sm:$0xff] %v7109_v26  ;;  %v7111_v51 = vsel %vm6951_vm12, %v11513_v21, %v7223_v5  ;;  %v7224_v52 = vadd.f32 -1.0, %v8571_v16  ;;  %v8573_v1 = vpop.eup %8572 }
 0x796   :  { %7143 = vst [vmem:[#allocation2 + $0xd0] sm:$0xff] %v7111_v51  ;;  %v7110_v34 = vsel %vm6950_vm13, %v11518_v27, %v7222_v19  ;;  %v8575_v20 = vpop.eup %8574  ;;  %v7225_v58 = vadd.f32 -1.0, %v8573_v1 }
 0x797   :  { %7142 = vst [vmem:[#allocation2 + $0xc8] sm:$0xff] %v7110_v34  ;;  %v7112_v29 = vsel %vm6952_vm14, %v11520_v39, %v7224_v52  ;;  %v8577_v53 = vpop.eup %8576  ;;  %v7227_v21 = vadd.f32 -1.0, %v8575_v20 }
 0x798   :  { %7144 = vst [vmem:[#allocation2 + $0xd8] sm:$0xff] %v7112_v29  ;;  %v8579_v47 = vpop.eup %8578  ;;  %v7113_v50 = vsel %vm6953_vm15, %v11535_v49, %v7225_v58  ;;  %v7226_v27 = vadd.f32 -1.0, %v8577_v53 }
 0x799   :  { %7145 = vst [vmem:[#allocation2 + $0xe0] sm:$0xff] %v7113_v50  ;;  %v7115_v33 = vsel %vm6955_vm1, %v11537_v59, %v7227_v21  ;;  %v7228_v39 = vadd.f32 -1.0, %v8579_v47 }
 0x79a   :  { %7147 = vst [vmem:[#allocation2 + $0xf0] sm:$0xff] %v7115_v33  ;;  %v7114_v41 = vsel %vm6954_vm2, %v11543_v61, %v7226_v27 }
 0x79b   :  { %7146 = vst [vmem:[#allocation2 + $0xe8] sm:$0xff] %v7114_v41  ;;  %v7116_v56 = vsel %vm6956_vm0, %v11545_v40, %v7228_v39 }
 0x79c   :  { %7148 = vst [vmem:[#allocation2 + $0xf8] sm:$0xff] %v7116_v56 }
 0x79d   :  { %8591 = shalt.err (!%p8588_p4)
}
 0x79e   :  { %s8592_s23 = scalar_lea.hbm %s11620_s9, 4096 }
 0x79f   :  { %p8593_p5 = scmp.ne.s32.totalorder %s11620_s9, %s8592_s23  ;;  %p8596_p6 = scmp.lt.u32.totalorder %s8592_s23, %s11620_s9 }
 0x7a1   :  { %p8598_p7 = pnand %p8596_p6, %p8593_p5 }
 0x7a3   :  { %8601 = shalt.err (!%p8598_p7)
}
 0x7a4   :  { %s8607_s27 = smov 512   ;;  %s8608_s5 = smov 32  }
 0x7a5   :  { %7160 = dma.vmem_to_hbm [thread:$0]  %s7155_s4, 4096, %s11620_s9, [#allocation3], %s8607_s27, %s8607_s27, %s8608_s5  }
 0x7a6   :  { %8602 = dma.done.wait [#allocation3], 4096  }
 0x7a7   :  { %8603 = vsyncadd [#allocation3], 4294963200 }
 0x7a8   :  { %7164 = vsyncpa [#allocation3], 1 }

</bundles_post_ra>
